<compile_context>
chip_gen: v7x
topology: tpu7x:2x2x1
jax: 0.10.0
libtpu: 0.0.40
codegen_flags: <defaults>
</compile_context>

<pallas_src>
import jax
import jax.numpy as jnp
from jax import lax
from jax.experimental import pallas as pl
from jax.experimental.pallas import tpu as pltpu


def _round_up(a, m):
    return ((a + m - 1) // m) * m


def _sigmoid(v):
    # 0.5*(tanh(v/2)+1): EUP tanh instead of a VALU f32 divide inside the GRU loop.
    return 0.5 * (jnp.tanh(0.5 * v) + 1.0)


def perm_inv_rnn_kernel(
    x_ref,              # (N, TB, D_in) time-major input block
    h0_ref,             # (TB, Rp) initial GRU hidden state (lane-padded)
    w1_ref, b1_ref,     # (D_in, Hp), (1, Hp)
    w2_ref, b2_ref,     # (Hp, Hp),   (1, Hp)
    w3_ref, b3_ref,     # (Hp, Rp),   (1, Rp)
    wi_ref,             # (Rp, 3*Rp) fused input-side GRU weights  [r | z | n]
    bi_ref,             # (1, 3*Rp)  fused biases [b_ir+b_hr | b_iz+b_hz | b_in]
    wh_ref,             # (Rp, 3*Rp) fused hidden-side GRU weights [r | z | n]
    bhn_ref,            # (1, Rp)    b_hn (must stay inside r * (...))
    w4_ref, b4_ref,     # (Rp, Hp), (1, Hp)
    w5_ref, b5_ref,     # (Hp, Dp), (1, Dp)
    y_ref,              # (TB, Dp) output (lane-padded)
    hout_ref,           # (TB, Rp) final hidden state
    gx_s,               # VMEM scratch (N, TB, 3*Rp): precomputed input-side gates
):
    N, TB, _ = x_ref.shape
    Rp = hout_ref.shape[-1]

    # --- encoder: PermEqui1_max + Tanh, three times (time-major layout) ---
    def perm_equi_tanh(h3, w_ref, b_ref):
        hm = jnp.max(h3, axis=0, keepdims=True)                 # max over the set dim
        hc = (h3 - hm).reshape(N * TB, h3.shape[-1])            # one big row block
        z = jnp.dot(hc.astype(w_ref.dtype), w_ref[...],
                    preferred_element_type=jnp.float32) + b_ref[...]
        return jnp.tanh(z)

    x3 = x_ref[...].astype(jnp.float32)
    h = perm_equi_tanh(x3, w1_ref, b1_ref)
    h = perm_equi_tanh(h.reshape(N, TB, -1), w2_ref, b2_ref)
    h = perm_equi_tanh(h.reshape(N, TB, -1), w3_ref, b3_ref)    # (N*TB, Rp)

    # --- GRU input-side gate pre-activations for ALL timesteps: ONE fused wide matmul ---
    gx_s[...] = (jnp.dot(h.astype(wi_ref.dtype), wi_ref[...],
                         preferred_element_type=jnp.float32)
                 + bi_ref[...]).reshape(N, TB, 3 * Rp)

    wh = wh_ref[...]
    bhn = jnp.broadcast_to(bhn_ref[...], (TB, Rp))   # hoisted: no per-step broadcast

    def gru_step(t, hidden):
        # PyTorch GRUCell:
        #   r = sigmoid(Wir x + bir + Whr h + bhr)
        #   z = sigmoid(Wiz x + biz + Whz h + bhz)
        #   n = tanh(Win x + bin + r * (Whn h + bhn))
        #   h' = (1 - z) * n + z * h
        gx = gx_s[t]                                            # (TB, 3*Rp)
        gh = jnp.dot(hidden.astype(wh.dtype), wh,               # ONE fused hidden matmul
                     preferred_element_type=jnp.float32)
        r = _sigmoid(gx[:, :Rp] + gh[:, :Rp])
        zg = _sigmoid(gx[:, Rp:2 * Rp] + gh[:, Rp:2 * Rp])
        n = jnp.tanh(gx[:, 2 * Rp:] + r * (gh[:, 2 * Rp:] + bhn))
        return (1.0 - zg) * n + zg * hidden

    hidden = h0_ref[...].astype(jnp.float32)
    if N <= 32:
        # Fully unrolled: static gx_s[t] loads, cross-step MXU/EUP overlap for the scheduler.
        for t in range(N):
            hidden = gru_step(t, hidden)
    else:
        hidden = lax.fori_loop(0, N, gru_step, hidden, unroll=8)

    # --- decoder (Dropout is identity in eval mode) ---
    zdec = jnp.tanh(jnp.dot(hidden.astype(w4_ref.dtype), w4_ref[...],
                            preferred_element_type=jnp.float32) + b4_ref[...])
    y = jnp.dot(zdec.astype(w5_ref.dtype), w5_ref[...],
                preferred_element_type=jnp.float32) + b5_ref[...]

    y_ref[...] = y.astype(y_ref.dtype)
    hout_ref[...] = hidden.astype(hout_ref.dtype)


def perm_inv_rnn_forward(x, params, hidden=None):
    """x: (B, N, dim_input) f32. Returns (y: (B, dim_output), hidden: (B, dim_rnn))."""
    enc, gru, dec = params
    (w1, b1), (w2, b2), (w3, b3) = enc
    (wir, wiz, win, whr, whz, whn, bir, biz, bin_, bhr, bhz, bhn) = gru
    (w4, b4), (w5, b5) = dec

    B, N, D_in = x.shape
    H = w1.shape[1]
    R = w3.shape[1]
    D_out = w5.shape[1]
    f32 = jnp.float32

    # Lane-pad every feature dim to a multiple of 128 -> unmasked stores, full MXU N-dim.
    Hp = _round_up(H, 128)
    Rp = _round_up(R, 128)
    Dp = _round_up(D_out, 128)

    # bf16 MXU operands only at the full-size config; accumulation and all non-dot math
    # stay f32 (v5e has no bf16 VPU/EUP).
    mm_dtype = jnp.bfloat16 if max(H, R) >= 256 else jnp.float32

    def pad2(a, r, c, dtype=f32):
        out = jnp.zeros((r, c), f32).at[:a.shape[0], :a.shape[1]].set(a.astype(f32))
        return out.astype(dtype)

    w1p = pad2(w1, D_in, Hp, mm_dtype); b1p = pad2(b1, 1, Hp)
    w2p = pad2(w2, Hp, Hp, mm_dtype);   b2p = pad2(b2, 1, Hp)
    w3p = pad2(w3, Hp, Rp, mm_dtype);   b3p = pad2(b3, 1, Rp)

    # Fused GRU weights: each gate (r, z, n) gets its own Rp-wide, 128-aligned lane slot
    # so in-kernel slices stay on (8,128) tile boundaries (no copies).
    wi = jnp.zeros((Rp, 3 * Rp), f32)
    wh = jnp.zeros((Rp, 3 * Rp), f32)
    bi = jnp.zeros((1, 3 * Rp), f32)
    gates = ((wir, whr, bir + bhr), (wiz, whz, biz + bhz), (win, whn, bin_))
    for g, (w_i, w_h, b_g) in enumerate(gates):
        wi = wi.at[:R, g * Rp:g * Rp + R].set(w_i.astype(f32))
        wh = wh.at[:R, g * Rp:g * Rp + R].set(w_h.astype(f32))
        bi = bi.at[:, g * Rp:g * Rp + R].set(b_g.astype(f32))
    wi = wi.astype(mm_dtype)
    wh = wh.astype(mm_dtype)
    bhnp = pad2(bhn, 1, Rp)

    w4p = pad2(w4, Rp, Hp, mm_dtype); b4p = pad2(b4, 1, Hp)
    w5p = pad2(w5, Hp, Dp, mm_dtype); b5p = pad2(b5, 1, Dp)

    # ---- batch-tile selection: fewest serial GRU chains that fit the VMEM budget ----
    kind = jax.devices()[0].device_kind.lower()
    is_v7 = "v7" in kind
    num_tc = 2 if is_v7 else 1
    # v7x has 64 MiB physical VMEM; v5e/v6e have 128 MiB (v5e's default scoped limit is
    # only 16 MiB, so raise it explicitly).
    vmem_limit = (48 if is_v7 else 96) * 1024 * 1024

    mm_size = 2 if mm_dtype == jnp.bfloat16 else 4
    per_row = (4 * N * 3 * Rp              # fused gate scratch
               + 2 * 4 * N * D_in          # double-buffered x block
               + 2 * 4 * (2 * Rp + Dp)     # h0 / hout / y blocks
               + 2 * 4 * N * max(Hp, Rp))  # encoder intermediate headroom
    weight_bytes = (mm_size * (D_in * Hp + Hp * Hp + Hp * Rp + 2 * Rp * 3 * Rp
                               + Rp * Hp + Hp * Dp)
                    + 4 * (3 * Hp + 5 * Rp + Dp))
    avail = max(vmem_limit - 2 * weight_bytes - (4 << 20), 8 * per_row)
    tb_max = max(8, min(256, (avail // per_row) // 8 * 8))

    Bp8 = _round_up(B, 8)
    TB = min(Bp8, tb_max)
    if num_tc > 1 and Bp8 > 8 and Bp8 <= TB:
        # v7x: split into >=2 batch tiles so "parallel" shards across both TensorCores.
        TB = max(8, _round_up((Bp8 + 1) // 2, 8))
    Bp = _round_up(B, TB)

    # Batch-pad, lane-pad and transpose to time-major once in the wrapper.
    xt = jnp.transpose(
        jnp.zeros((Bp, N, D_in), f32).at[:B].set(x.astype(f32)), (1, 0, 2))
    h0 = jnp.zeros((Bp, Rp), f32)
    if hidden is not None:
        h0 = h0.at[:B, :R].set(hidden.astype(f32))

    def full(a):
        # Constant index_map -> resident in VMEM across all grid steps.
        return pl.BlockSpec(a.shape, lambda b: (0,) * a.ndim)

    grid = (Bp // TB,)
    y_pad, h_out = pl.pallas_call(
        perm_inv_rnn_kernel,
        out_shape=(jax.ShapeDtypeStruct((Bp, Dp), f32),
                   jax.ShapeDtypeStruct((Bp, Rp), f32)),
        grid=grid,
        in_specs=[
            pl.BlockSpec((N, TB, D_in), lambda b: (0, b, 0)),   # x: TB batch rows per step
            pl.BlockSpec((TB, Rp), lambda b: (b, 0)),           # initial hidden state
            full(w1p), full(b1p), full(w2p), full(b2p), full(w3p), full(b3p),
            full(wi), full(bi), full(wh), full(bhnp),
            full(w4p), full(b4p), full(w5p), full(b5p),
        ],
        out_specs=(
            pl.BlockSpec((TB, Dp), lambda b: (b, 0)),
            pl.BlockSpec((TB, Rp), lambda b: (b, 0)),
        ),
        scratch_shapes=[pltpu.VMEM((N, TB, 3 * Rp), jnp.float32)],
        compiler_params=pltpu.CompilerParams(
            dimension_semantics=("parallel",),
            vmem_limit_bytes=vmem_limit),
    )(xt, h0,
      w1p, b1p, w2p, b2p, w3p, b3p,
      wi, bi, wh, bhnp,
      w4p, b4p, w5p, b5p)

    return y_pad[:B, :D_out], h_out[:B, :R]


def init_params(key, dim_input, dim_hidden, dim_rnn, dim_output):
    """Weights stored pre-transposed as (in, out); biases as (1, out).
    PyTorch-style uniform(+-1/sqrt(fan_in)) init."""
    def linear(k, d_in, d_out):
        kw, kb = jax.random.split(k)
        bound = 1.0 / (d_in ** 0.5)
        w = jax.random.uniform(kw, (d_in, d_out), jnp.float32, -bound, bound)
        b = jax.random.uniform(kb, (1, d_out), jnp.float32, -bound, bound)
        return w, b

    keys = jax.random.split(key, 6)
    enc = (linear(keys[0], dim_input, dim_hidden),
           linear(keys[1], dim_hidden, dim_hidden),
           linear(keys[2], dim_hidden, dim_rnn))

    R = dim_rnn
    bound = 1.0 / (R ** 0.5)
    gk = jax.random.split(keys[3], 12)

    def u(k, shape):
        return jax.random.uniform(k, shape, jnp.float32, -bound, bound)

    gru = (u(gk[0], (R, R)), u(gk[1], (R, R)), u(gk[2], (R, R)),      # w_ir, w_iz, w_in
           u(gk[3], (R, R)), u(gk[4], (R, R)), u(gk[5], (R, R)),      # w_hr, w_hz, w_hn
           u(gk[6], (1, R)), u(gk[7], (1, R)), u(gk[8], (1, R)),      # b_ir, b_iz, b_in
           u(gk[9], (1, R)), u(gk[10], (1, R)), u(gk[11], (1, R)))    # b_hr, b_hz, b_hn

    dec = (linear(keys[4], dim_rnn, dim_hidden),
           linear(keys[5], dim_hidden, dim_output))
    return enc, gru, dec


def perm_inv_rnn_reference(x, params, hidden=None):
    """Plain-JAX reference (eval mode) for correctness check."""
    enc, gru, dec = params
    (w1, b1), (w2, b2), (w3, b3) = enc
    (wir, wiz, win, whr, whz, whn, bir, biz, bin_, bhr, bhz, bhn) = gru
    (w4, b4), (w5, b5) = dec

    def perm_equi(h, w, b):
        hm = jnp.max(h, axis=1, keepdims=True)
        return jnp.tanh((h - hm) @ w + b)

    h = perm_equi(x, w1, b1)
    h = perm_equi(h, w2, b2)
    h = perm_equi(h, w3, b3)                       # (B, N, R)

    B, N, R = h.shape
    state = jnp.zeros((B, R), jnp.float32) if hidden is None else hidden
    for t in range(N):
        xt = h[:, t, :]
        r = jax.nn.sigmoid(xt @ wir + bir + state @ whr + bhr)
        z = jax.nn.sigmoid(xt @ wiz + biz + state @ whz + bhz)
        n = jnp.tanh(xt @ win + bin_ + r * (state @ whn + bhn))
        state = (1.0 - z) * n + z * state
    y = jnp.tanh(state @ w4 + b4) @ w5 + b5        # last RNN output == final state in eval
    return y, state


if __name__ == "__main__":
    B, N = 2, 8
    dim_input, dim_hidden, dim_rnn, dim_output = 3, 32, 32, 40

    key = jax.random.PRNGKey(0)
    kx, kp = jax.random.split(key)
    x = jax.random.normal(kx, (B, N, dim_input), jnp.float32)
    params = init_params(kp, dim_input, dim_hidden, dim_rnn, dim_output)

    y, h = perm_inv_rnn_forward(x, params, hidden=None)
    y = jax.block_until_ready(y)
    h = jax.block_until_ready(h)

    y_exp, h_exp = perm_inv_rnn_reference(x, params, hidden=None)
    assert y.shape == (B, dim_output)
    assert h.shape == (B, dim_rnn)
    assert jnp.allclose(y, y_exp, atol=2e-4, rtol=2e-4), "output mismatch vs reference"
    assert jnp.allclose(h, h_exp, atol=2e-4, rtol=2e-4), "hidden mismatch vs reference"

    print("KERNEL_OK")
</pallas_src>

<mosaic_0001>
module attributes {stable_mosaic.version = 11 : i64} {
  func.func @perm_inv_rnn_kernel(%arg0: i32, %arg1: memref<8x8x3xf32, #tpu.memory_space<vmem>>, %arg2: memref<8x128xf32, #tpu.memory_space<vmem>>, %arg3: memref<3x128xf32, #tpu.memory_space<vmem>>, %arg4: memref<1x128xf32, #tpu.memory_space<vmem>>, %arg5: memref<128x128xf32, #tpu.memory_space<vmem>>, %arg6: memref<1x128xf32, #tpu.memory_space<vmem>>, %arg7: memref<128x128xf32, #tpu.memory_space<vmem>>, %arg8: memref<1x128xf32, #tpu.memory_space<vmem>>, %arg9: memref<128x384xf32, #tpu.memory_space<vmem>>, %arg10: memref<1x384xf32, #tpu.memory_space<vmem>>, %arg11: memref<128x384xf32, #tpu.memory_space<vmem>>, %arg12: memref<1x128xf32, #tpu.memory_space<vmem>>, %arg13: memref<128x128xf32, #tpu.memory_space<vmem>>, %arg14: memref<1x128xf32, #tpu.memory_space<vmem>>, %arg15: memref<128x128xf32, #tpu.memory_space<vmem>>, %arg16: memref<1x128xf32, #tpu.memory_space<vmem>>, %arg17: memref<8x128xf32, #tpu.memory_space<vmem>>, %arg18: memref<8x128xf32, #tpu.memory_space<vmem>>, %arg19: memref<8x8x384xf32, #tpu.memory_space<vmem>>) attributes {dimension_semantics = [#tpu.dimension_semantics<parallel>], iteration_bounds = array<i64: 1>, scalar_prefetch = 0 : i64, scratch_operands = 1 : i64, tpu.core_type = #tpu.core_type<tc>, window_params = [{transform_indices = @transform_0, window_bounds = array<i64: 8, 8, 3>}, {transform_indices = @transform_1, window_bounds = array<i64: 8, 128>}, {pipeline_mode = #tpu.pipeline_mode<synchronous>, transform_indices = @transform_2, window_bounds = array<i64: 3, 128>}, {pipeline_mode = #tpu.pipeline_mode<synchronous>, transform_indices = @transform_3, window_bounds = array<i64: 1, 128>}, {pipeline_mode = #tpu.pipeline_mode<synchronous>, transform_indices = @transform_4, window_bounds = array<i64: 128, 128>}, {pipeline_mode = #tpu.pipeline_mode<synchronous>, transform_indices = @transform_5, window_bounds = array<i64: 1, 128>}, {pipeline_mode = #tpu.pipeline_mode<synchronous>, transform_indices = @transform_6, window_bounds = array<i64: 128, 128>}, {pipeline_mode = #tpu.pipeline_mode<synchronous>, transform_indices = @transform_7, window_bounds = array<i64: 1, 128>}, {pipeline_mode = #tpu.pipeline_mode<synchronous>, transform_indices = @transform_8, window_bounds = array<i64: 128, 384>}, {pipeline_mode = #tpu.pipeline_mode<synchronous>, transform_indices = @transform_9, window_bounds = array<i64: 1, 384>}, {pipeline_mode = #tpu.pipeline_mode<synchronous>, transform_indices = @transform_10, window_bounds = array<i64: 128, 384>}, {pipeline_mode = #tpu.pipeline_mode<synchronous>, transform_indices = @transform_11, window_bounds = array<i64: 1, 128>}, {pipeline_mode = #tpu.pipeline_mode<synchronous>, transform_indices = @transform_12, window_bounds = array<i64: 128, 128>}, {pipeline_mode = #tpu.pipeline_mode<synchronous>, transform_indices = @transform_13, window_bounds = array<i64: 1, 128>}, {pipeline_mode = #tpu.pipeline_mode<synchronous>, transform_indices = @transform_14, window_bounds = array<i64: 128, 128>}, {pipeline_mode = #tpu.pipeline_mode<synchronous>, transform_indices = @transform_15, window_bounds = array<i64: 1, 128>}, {transform_indices = @transform_16, window_bounds = array<i64: 8, 128>}, {transform_indices = @transform_17, window_bounds = array<i64: 8, 128>}]} {
    %c0 = arith.constant 0 : index
    %c0_0 = arith.constant 0 : index
    %c0_1 = arith.constant 0 : index
    %0 = vector.load %arg1[%c0, %c0_0, %c0_1] : memref<8x8x3xf32, #tpu.memory_space<vmem>>, vector<8x8x3xf32>
    %cst = arith.constant dense<0xFF800000> : vector<8x3xf32>
    %1 = vector.multi_reduction <maximumf>, %0, %cst [0] : vector<8x8x3xf32> to vector<8x3xf32>
    %2 = vector.shape_cast %1 : vector<8x3xf32> to vector<1x8x3xf32>
    %3 = vector.broadcast %2 : vector<1x8x3xf32> to vector<8x8x3xf32>
    %4 = arith.subf %0, %3 : vector<8x8x3xf32>
    %5 = vector.shape_cast %4 : vector<8x8x3xf32> to vector<64x3xf32>
    %c0_2 = arith.constant 0 : index
    %c0_3 = arith.constant 0 : index
    %6 = vector.load %arg3[%c0_2, %c0_3] : memref<3x128xf32, #tpu.memory_space<vmem>>, vector<3x128xf32>
    %cst_4 = arith.constant dense<0.000000e+00> : vector<64x128xf32>
    %7 = tpu.matmul %5, %6, %cst_4 {dimension_numbers = #tpu.dot_dimension_numbers<[1], [0], [0], [1], [0, 0, 1, 1], [], []>} : vector<64x3xf32>, vector<3x128xf32>, vector<64x128xf32> -> vector<64x128xf32>
    %c0_5 = arith.constant 0 : index
    %c0_6 = arith.constant 0 : index
    %8 = vector.load %arg4[%c0_5, %c0_6] : memref<1x128xf32, #tpu.memory_space<vmem>>, vector<1x128xf32>
    %9 = vector.broadcast %8 : vector<1x128xf32> to vector<64x128xf32>
    %10 = arith.addf %7, %9 : vector<64x128xf32>
    %11 = math.tanh %10 : vector<64x128xf32>
    %12 = vector.shape_cast %11 : vector<64x128xf32> to vector<8x8x128xf32>
    %cst_7 = arith.constant dense<0xFF800000> : vector<8x128xf32>
    %13 = vector.multi_reduction <maximumf>, %12, %cst_7 [0] : vector<8x8x128xf32> to vector<8x128xf32>
    %14 = vector.shape_cast %13 : vector<8x128xf32> to vector<1x8x128xf32>
    %15 = vector.broadcast %14 : vector<1x8x128xf32> to vector<8x8x128xf32>
    %16 = arith.subf %12, %15 : vector<8x8x128xf32>
    %17 = vector.shape_cast %16 : vector<8x8x128xf32> to vector<64x128xf32>
    %c0_8 = arith.constant 0 : index
    %c0_9 = arith.constant 0 : index
    %18 = vector.load %arg5[%c0_8, %c0_9] : memref<128x128xf32, #tpu.memory_space<vmem>>, vector<128x128xf32>
    %cst_10 = arith.constant dense<0.000000e+00> : vector<64x128xf32>
    %19 = tpu.matmul %17, %18, %cst_10 {dimension_numbers = #tpu.dot_dimension_numbers<[1], [0], [0], [1], [0, 0, 1, 1], [], []>} : vector<64x128xf32>, vector<128x128xf32>, vector<64x128xf32> -> vector<64x128xf32>
    %c0_11 = arith.constant 0 : index
    %c0_12 = arith.constant 0 : index
    %20 = vector.load %arg6[%c0_11, %c0_12] : memref<1x128xf32, #tpu.memory_space<vmem>>, vector<1x128xf32>
    %21 = vector.broadcast %20 : vector<1x128xf32> to vector<64x128xf32>
    %22 = arith.addf %19, %21 : vector<64x128xf32>
    %23 = math.tanh %22 : vector<64x128xf32>
    %24 = vector.shape_cast %23 : vector<64x128xf32> to vector<8x8x128xf32>
    %cst_13 = arith.constant dense<0xFF800000> : vector<8x128xf32>
    %25 = vector.multi_reduction <maximumf>, %24, %cst_13 [0] : vector<8x8x128xf32> to vector<8x128xf32>
    %26 = vector.shape_cast %25 : vector<8x128xf32> to vector<1x8x128xf32>
    %27 = vector.broadcast %26 : vector<1x8x128xf32> to vector<8x8x128xf32>
    %28 = arith.subf %24, %27 : vector<8x8x128xf32>
    %29 = vector.shape_cast %28 : vector<8x8x128xf32> to vector<64x128xf32>
    %c0_14 = arith.constant 0 : index
    %c0_15 = arith.constant 0 : index
    %30 = vector.load %arg7[%c0_14, %c0_15] : memref<128x128xf32, #tpu.memory_space<vmem>>, vector<128x128xf32>
    %cst_16 = arith.constant dense<0.000000e+00> : vector<64x128xf32>
    %31 = tpu.matmul %29, %30, %cst_16 {dimension_numbers = #tpu.dot_dimension_numbers<[1], [0], [0], [1], [0, 0, 1, 1], [], []>} : vector<64x128xf32>, vector<128x128xf32>, vector<64x128xf32> -> vector<64x128xf32>
    %c0_17 = arith.constant 0 : index
    %c0_18 = arith.constant 0 : index
    %32 = vector.load %arg8[%c0_17, %c0_18] : memref<1x128xf32, #tpu.memory_space<vmem>>, vector<1x128xf32>
    %33 = vector.broadcast %32 : vector<1x128xf32> to vector<64x128xf32>
    %34 = arith.addf %31, %33 : vector<64x128xf32>
    %35 = math.tanh %34 : vector<64x128xf32>
    %c0_19 = arith.constant 0 : index
    %c0_20 = arith.constant 0 : index
    %36 = vector.load %arg9[%c0_19, %c0_20] : memref<128x384xf32, #tpu.memory_space<vmem>>, vector<128x384xf32>
    %cst_21 = arith.constant dense<0.000000e+00> : vector<64x384xf32>
    %37 = tpu.matmul %35, %36, %cst_21 {dimension_numbers = #tpu.dot_dimension_numbers<[1], [0], [0], [1], [0, 0, 1, 1], [], []>} : vector<64x128xf32>, vector<128x384xf32>, vector<64x384xf32> -> vector<64x384xf32>
    %c0_22 = arith.constant 0 : index
    %c0_23 = arith.constant 0 : index
    %38 = vector.load %arg10[%c0_22, %c0_23] : memref<1x384xf32, #tpu.memory_space<vmem>>, vector<1x384xf32>
    %39 = vector.broadcast %38 : vector<1x384xf32> to vector<64x384xf32>
    %40 = arith.addf %37, %39 : vector<64x384xf32>
    %41 = vector.shape_cast %40 : vector<64x384xf32> to vector<8x8x384xf32>
    %c0_24 = arith.constant 0 : index
    %c0_25 = arith.constant 0 : index
    %c0_26 = arith.constant 0 : index
    %42 = vector.load %arg19[%c0_24, %c0_25, %c0_26] : memref<8x8x384xf32, #tpu.memory_space<vmem>>, vector<8x8x384xf32>
    tpu.vector_store %arg19[%c0_24, %c0_25, %c0_26], %41 {strides = array<i32>} : memref<8x8x384xf32, #tpu.memory_space<vmem>>, vector<8x8x384xf32>,
    %c0_27 = arith.constant 0 : index
    %c0_28 = arith.constant 0 : index
    %43 = vector.load %arg11[%c0_27, %c0_28] : memref<128x384xf32, #tpu.memory_space<vmem>>, vector<128x384xf32>
    %c0_29 = arith.constant 0 : index
    %c0_30 = arith.constant 0 : index
    %44 = vector.load %arg12[%c0_29, %c0_30] : memref<1x128xf32, #tpu.memory_space<vmem>>, vector<1x128xf32>
    %45 = vector.shape_cast %44 : vector<1x128xf32> to vector<1x128xf32>
    %46 = vector.broadcast %45 : vector<1x128xf32> to vector<8x128xf32>
    %c0_31 = arith.constant 0 : index
    %c0_32 = arith.constant 0 : index
    %47 = vector.load %arg2[%c0_31, %c0_32] : memref<8x128xf32, #tpu.memory_space<vmem>>, vector<8x128xf32>
    %c0_33 = arith.constant 0 : index
    %c0_34 = arith.constant 0 : index
    %c0_35 = arith.constant 0 : index
    %48 = vector.load %arg19[%c0_33, %c0_34, %c0_35] : memref<8x8x384xf32, #tpu.memory_space<vmem>>, vector<1x8x384xf32>
    %49 = vector.shape_cast %48 : vector<1x8x384xf32> to vector<8x384xf32>
    %cst_36 = arith.constant dense<0.000000e+00> : vector<8x384xf32>
    %50 = tpu.matmul %47, %43, %cst_36 {dimension_numbers = #tpu.dot_dimension_numbers<[1], [0], [0], [1], [0, 0, 1, 1], [], []>} : vector<8x128xf32>, vector<128x384xf32>, vector<8x384xf32> -> vector<8x384xf32>
    %51 = vector.extract_strided_slice %49 {offsets = [0, 0], sizes = [8, 128], strides = [1, 1]} : vector<8x384xf32> to vector<8x128xf32>
    %52 = vector.extract_strided_slice %50 {offsets = [0, 0], sizes = [8, 128], strides = [1, 1]} : vector<8x384xf32> to vector<8x128xf32>
    %53 = arith.addf %51, %52 : vector<8x128xf32>
    %cst_37 = arith.constant 5.000000e-01 : f32
    %54 = vector.broadcast %cst_37 : f32 to vector<8x128xf32>
    %55 = arith.mulf %54, %53 : vector<8x128xf32>
    %56 = math.tanh %55 : vector<8x128xf32>
    %cst_38 = arith.constant 1.000000e+00 : f32
    %57 = vector.broadcast %cst_38 : f32 to vector<8x128xf32>
    %58 = arith.addf %56, %57 : vector<8x128xf32>
    %cst_39 = arith.constant 5.000000e-01 : f32
    %59 = vector.broadcast %cst_39 : f32 to vector<8x128xf32>
    %60 = arith.mulf %59, %58 : vector<8x128xf32>
    %61 = vector.extract_strided_slice %49 {offsets = [0, 128], sizes = [8, 128], strides = [1, 1]} : vector<8x384xf32> to vector<8x128xf32>
    %62 = vector.extract_strided_slice %50 {offsets = [0, 128], sizes = [8, 128], strides = [1, 1]} : vector<8x384xf32> to vector<8x128xf32>
    %63 = arith.addf %61, %62 : vector<8x128xf32>
    %cst_40 = arith.constant 5.000000e-01 : f32
    %64 = vector.broadcast %cst_40 : f32 to vector<8x128xf32>
    %65 = arith.mulf %64, %63 : vector<8x128xf32>
    %66 = math.tanh %65 : vector<8x128xf32>
    %cst_41 = arith.constant 1.000000e+00 : f32
    %67 = vector.broadcast %cst_41 : f32 to vector<8x128xf32>
    %68 = arith.addf %66, %67 : vector<8x128xf32>
    %cst_42 = arith.constant 5.000000e-01 : f32
    %69 = vector.broadcast %cst_42 : f32 to vector<8x128xf32>
    %70 = arith.mulf %69, %68 : vector<8x128xf32>
    %71 = vector.extract_strided_slice %49 {offsets = [0, 256], sizes = [8, 128], strides = [1, 1]} : vector<8x384xf32> to vector<8x128xf32>
    %72 = vector.extract_strided_slice %50 {offsets = [0, 256], sizes = [8, 128], strides = [1, 1]} : vector<8x384xf32> to vector<8x128xf32>
    %73 = arith.addf %72, %46 : vector<8x128xf32>
    %74 = arith.mulf %60, %73 : vector<8x128xf32>
    %75 = arith.addf %71, %74 : vector<8x128xf32>
    %76 = math.tanh %75 : vector<8x128xf32>
    %cst_43 = arith.constant 1.000000e+00 : f32
    %77 = vector.broadcast %cst_43 : f32 to vector<8x128xf32>
    %78 = arith.subf %77, %70 : vector<8x128xf32>
    %79 = arith.mulf %78, %76 : vector<8x128xf32>
    %80 = arith.mulf %70, %47 : vector<8x128xf32>
    %81 = arith.addf %79, %80 : vector<8x128xf32>
    %c1 = arith.constant 1 : index
    %c0_44 = arith.constant 0 : index
    %c0_45 = arith.constant 0 : index
    %82 = vector.load %arg19[%c1, %c0_44, %c0_45] : memref<8x8x384xf32, #tpu.memory_space<vmem>>, vector<1x8x384xf32>
    %83 = vector.shape_cast %82 : vector<1x8x384xf32> to vector<8x384xf32>
    %cst_46 = arith.constant dense<0.000000e+00> : vector<8x384xf32>
    %84 = tpu.matmul %81, %43, %cst_46 {dimension_numbers = #tpu.dot_dimension_numbers<[1], [0], [0], [1], [0, 0, 1, 1], [], []>} : vector<8x128xf32>, vector<128x384xf32>, vector<8x384xf32> -> vector<8x384xf32>
    %85 = vector.extract_strided_slice %83 {offsets = [0, 0], sizes = [8, 128], strides = [1, 1]} : vector<8x384xf32> to vector<8x128xf32>
    %86 = vector.extract_strided_slice %84 {offsets = [0, 0], sizes = [8, 128], strides = [1, 1]} : vector<8x384xf32> to vector<8x128xf32>
    %87 = arith.addf %85, %86 : vector<8x128xf32>
    %cst_47 = arith.constant 5.000000e-01 : f32
    %88 = vector.broadcast %cst_47 : f32 to vector<8x128xf32>
    %89 = arith.mulf %88, %87 : vector<8x128xf32>
    %90 = math.tanh %89 : vector<8x128xf32>
    %cst_48 = arith.constant 1.000000e+00 : f32
    %91 = vector.broadcast %cst_48 : f32 to vector<8x128xf32>
    %92 = arith.addf %90, %91 : vector<8x128xf32>
    %cst_49 = arith.constant 5.000000e-01 : f32
    %93 = vector.broadcast %cst_49 : f32 to vector<8x128xf32>
    %94 = arith.mulf %93, %92 : vector<8x128xf32>
    %95 = vector.extract_strided_slice %83 {offsets = [0, 128], sizes = [8, 128], strides = [1, 1]} : vector<8x384xf32> to vector<8x128xf32>
    %96 = vector.extract_strided_slice %84 {offsets = [0, 128], sizes = [8, 128], strides = [1, 1]} : vector<8x384xf32> to vector<8x128xf32>
    %97 = arith.addf %95, %96 : vector<8x128xf32>
    %cst_50 = arith.constant 5.000000e-01 : f32
    %98 = vector.broadcast %cst_50 : f32 to vector<8x128xf32>
    %99 = arith.mulf %98, %97 : vector<8x128xf32>
    %100 = math.tanh %99 : vector<8x128xf32>
    %cst_51 = arith.constant 1.000000e+00 : f32
    %101 = vector.broadcast %cst_51 : f32 to vector<8x128xf32>
    %102 = arith.addf %100, %101 : vector<8x128xf32>
    %cst_52 = arith.constant 5.000000e-01 : f32
    %103 = vector.broadcast %cst_52 : f32 to vector<8x128xf32>
    %104 = arith.mulf %103, %102 : vector<8x128xf32>
    %105 = vector.extract_strided_slice %83 {offsets = [0, 256], sizes = [8, 128], strides = [1, 1]} : vector<8x384xf32> to vector<8x128xf32>
    %106 = vector.extract_strided_slice %84 {offsets = [0, 256], sizes = [8, 128], strides = [1, 1]} : vector<8x384xf32> to vector<8x128xf32>
    %107 = arith.addf %106, %46 : vector<8x128xf32>
    %108 = arith.mulf %94, %107 : vector<8x128xf32>
    %109 = arith.addf %105, %108 : vector<8x128xf32>
    %110 = math.tanh %109 : vector<8x128xf32>
    %cst_53 = arith.constant 1.000000e+00 : f32
    %111 = vector.broadcast %cst_53 : f32 to vector<8x128xf32>
    %112 = arith.subf %111, %104 : vector<8x128xf32>
    %113 = arith.mulf %112, %110 : vector<8x128xf32>
    %114 = arith.mulf %104, %81 : vector<8x128xf32>
    %115 = arith.addf %113, %114 : vector<8x128xf32>
    %c2 = arith.constant 2 : index
    %c0_54 = arith.constant 0 : index
    %c0_55 = arith.constant 0 : index
    %116 = vector.load %arg19[%c2, %c0_54, %c0_55] : memref<8x8x384xf32, #tpu.memory_space<vmem>>, vector<1x8x384xf32>
    %117 = vector.shape_cast %116 : vector<1x8x384xf32> to vector<8x384xf32>
    %cst_56 = arith.constant dense<0.000000e+00> : vector<8x384xf32>
    %118 = tpu.matmul %115, %43, %cst_56 {dimension_numbers = #tpu.dot_dimension_numbers<[1], [0], [0], [1], [0, 0, 1, 1], [], []>} : vector<8x128xf32>, vector<128x384xf32>, vector<8x384xf32> -> vector<8x384xf32>
    %119 = vector.extract_strided_slice %117 {offsets = [0, 0], sizes = [8, 128], strides = [1, 1]} : vector<8x384xf32> to vector<8x128xf32>
    %120 = vector.extract_strided_slice %118 {offsets = [0, 0], sizes = [8, 128], strides = [1, 1]} : vector<8x384xf32> to vector<8x128xf32>
    %121 = arith.addf %119, %120 : vector<8x128xf32>
    %cst_57 = arith.constant 5.000000e-01 : f32
    %122 = vector.broadcast %cst_57 : f32 to vector<8x128xf32>
    %123 = arith.mulf %122, %121 : vector<8x128xf32>
    %124 = math.tanh %123 : vector<8x128xf32>
    %cst_58 = arith.constant 1.000000e+00 : f32
    %125 = vector.broadcast %cst_58 : f32 to vector<8x128xf32>
    %126 = arith.addf %124, %125 : vector<8x128xf32>
    %cst_59 = arith.constant 5.000000e-01 : f32
    %127 = vector.broadcast %cst_59 : f32 to vector<8x128xf32>
    %128 = arith.mulf %127, %126 : vector<8x128xf32>
    %129 = vector.extract_strided_slice %117 {offsets = [0, 128], sizes = [8, 128], strides = [1, 1]} : vector<8x384xf32> to vector<8x128xf32>
    %130 = vector.extract_strided_slice %118 {offsets = [0, 128], sizes = [8, 128], strides = [1, 1]} : vector<8x384xf32> to vector<8x128xf32>
    %131 = arith.addf %129, %130 : vector<8x128xf32>
    %cst_60 = arith.constant 5.000000e-01 : f32
    %132 = vector.broadcast %cst_60 : f32 to vector<8x128xf32>
    %133 = arith.mulf %132, %131 : vector<8x128xf32>
    %134 = math.tanh %133 : vector<8x128xf32>
    %cst_61 = arith.constant 1.000000e+00 : f32
    %135 = vector.broadcast %cst_61 : f32 to vector<8x128xf32>
    %136 = arith.addf %134, %135 : vector<8x128xf32>
    %cst_62 = arith.constant 5.000000e-01 : f32
    %137 = vector.broadcast %cst_62 : f32 to vector<8x128xf32>
    %138 = arith.mulf %137, %136 : vector<8x128xf32>
    %139 = vector.extract_strided_slice %117 {offsets = [0, 256], sizes = [8, 128], strides = [1, 1]} : vector<8x384xf32> to vector<8x128xf32>
    %140 = vector.extract_strided_slice %118 {offsets = [0, 256], sizes = [8, 128], strides = [1, 1]} : vector<8x384xf32> to vector<8x128xf32>
    %141 = arith.addf %140, %46 : vector<8x128xf32>
    %142 = arith.mulf %128, %141 : vector<8x128xf32>
    %143 = arith.addf %139, %142 : vector<8x128xf32>
    %144 = math.tanh %143 : vector<8x128xf32>
    %cst_63 = arith.constant 1.000000e+00 : f32
    %145 = vector.broadcast %cst_63 : f32 to vector<8x128xf32>
    %146 = arith.subf %145, %138 : vector<8x128xf32>
    %147 = arith.mulf %146, %144 : vector<8x128xf32>
    %148 = arith.mulf %138, %115 : vector<8x128xf32>
    %149 = arith.addf %147, %148 : vector<8x128xf32>
    %c3 = arith.constant 3 : index
    %c0_64 = arith.constant 0 : index
    %c0_65 = arith.constant 0 : index
    %150 = vector.load %arg19[%c3, %c0_64, %c0_65] : memref<8x8x384xf32, #tpu.memory_space<vmem>>, vector<1x8x384xf32>
    %151 = vector.shape_cast %150 : vector<1x8x384xf32> to vector<8x384xf32>
    %cst_66 = arith.constant dense<0.000000e+00> : vector<8x384xf32>
    %152 = tpu.matmul %149, %43, %cst_66 {dimension_numbers = #tpu.dot_dimension_numbers<[1], [0], [0], [1], [0, 0, 1, 1], [], []>} : vector<8x128xf32>, vector<128x384xf32>, vector<8x384xf32> -> vector<8x384xf32>
    %153 = vector.extract_strided_slice %151 {offsets = [0, 0], sizes = [8, 128], strides = [1, 1]} : vector<8x384xf32> to vector<8x128xf32>
    %154 = vector.extract_strided_slice %152 {offsets = [0, 0], sizes = [8, 128], strides = [1, 1]} : vector<8x384xf32> to vector<8x128xf32>
    %155 = arith.addf %153, %154 : vector<8x128xf32>
    %cst_67 = arith.constant 5.000000e-01 : f32
    %156 = vector.broadcast %cst_67 : f32 to vector<8x128xf32>
    %157 = arith.mulf %156, %155 : vector<8x128xf32>
    %158 = math.tanh %157 : vector<8x128xf32>
    %cst_68 = arith.constant 1.000000e+00 : f32
    %159 = vector.broadcast %cst_68 : f32 to vector<8x128xf32>
    %160 = arith.addf %158, %159 : vector<8x128xf32>
    %cst_69 = arith.constant 5.000000e-01 : f32
    %161 = vector.broadcast %cst_69 : f32 to vector<8x128xf32>
    %162 = arith.mulf %161, %160 : vector<8x128xf32>
    %163 = vector.extract_strided_slice %151 {offsets = [0, 128], sizes = [8, 128], strides = [1, 1]} : vector<8x384xf32> to vector<8x128xf32>
    %164 = vector.extract_strided_slice %152 {offsets = [0, 128], sizes = [8, 128], strides = [1, 1]} : vector<8x384xf32> to vector<8x128xf32>
    %165 = arith.addf %163, %164 : vector<8x128xf32>
    %cst_70 = arith.constant 5.000000e-01 : f32
    %166 = vector.broadcast %cst_70 : f32 to vector<8x128xf32>
    %167 = arith.mulf %166, %165 : vector<8x128xf32>
    %168 = math.tanh %167 : vector<8x128xf32>
    %cst_71 = arith.constant 1.000000e+00 : f32
    %169 = vector.broadcast %cst_71 : f32 to vector<8x128xf32>
    %170 = arith.addf %168, %169 : vector<8x128xf32>
    %cst_72 = arith.constant 5.000000e-01 : f32
    %171 = vector.broadcast %cst_72 : f32 to vector<8x128xf32>
    %172 = arith.mulf %171, %170 : vector<8x128xf32>
    %173 = vector.extract_strided_slice %151 {offsets = [0, 256], sizes = [8, 128], strides = [1, 1]} : vector<8x384xf32> to vector<8x128xf32>
    %174 = vector.extract_strided_slice %152 {offsets = [0, 256], sizes = [8, 128], strides = [1, 1]} : vector<8x384xf32> to vector<8x128xf32>
    %175 = arith.addf %174, %46 : vector<8x128xf32>
    %176 = arith.mulf %162, %175 : vector<8x128xf32>
    %177 = arith.addf %173, %176 : vector<8x128xf32>
    %178 = math.tanh %177 : vector<8x128xf32>
    %cst_73 = arith.constant 1.000000e+00 : f32
    %179 = vector.broadcast %cst_73 : f32 to vector<8x128xf32>
    %180 = arith.subf %179, %172 : vector<8x128xf32>
    %181 = arith.mulf %180, %178 : vector<8x128xf32>
    %182 = arith.mulf %172, %149 : vector<8x128xf32>
    %183 = arith.addf %181, %182 : vector<8x128xf32>
    %c4 = arith.constant 4 : index
    %c0_74 = arith.constant 0 : index
    %c0_75 = arith.constant 0 : index
    %184 = vector.load %arg19[%c4, %c0_74, %c0_75] : memref<8x8x384xf32, #tpu.memory_space<vmem>>, vector<1x8x384xf32>
    %185 = vector.shape_cast %184 : vector<1x8x384xf32> to vector<8x384xf32>
    %cst_76 = arith.constant dense<0.000000e+00> : vector<8x384xf32>
    %186 = tpu.matmul %183, %43, %cst_76 {dimension_numbers = #tpu.dot_dimension_numbers<[1], [0], [0], [1], [0, 0, 1, 1], [], []>} : vector<8x128xf32>, vector<128x384xf32>, vector<8x384xf32> -> vector<8x384xf32>
    %187 = vector.extract_strided_slice %185 {offsets = [0, 0], sizes = [8, 128], strides = [1, 1]} : vector<8x384xf32> to vector<8x128xf32>
    %188 = vector.extract_strided_slice %186 {offsets = [0, 0], sizes = [8, 128], strides = [1, 1]} : vector<8x384xf32> to vector<8x128xf32>
    %189 = arith.addf %187, %188 : vector<8x128xf32>
    %cst_77 = arith.constant 5.000000e-01 : f32
    %190 = vector.broadcast %cst_77 : f32 to vector<8x128xf32>
    %191 = arith.mulf %190, %189 : vector<8x128xf32>
    %192 = math.tanh %191 : vector<8x128xf32>
    %cst_78 = arith.constant 1.000000e+00 : f32
    %193 = vector.broadcast %cst_78 : f32 to vector<8x128xf32>
    %194 = arith.addf %192, %193 : vector<8x128xf32>
    %cst_79 = arith.constant 5.000000e-01 : f32
    %195 = vector.broadcast %cst_79 : f32 to vector<8x128xf32>
    %196 = arith.mulf %195, %194 : vector<8x128xf32>
    %197 = vector.extract_strided_slice %185 {offsets = [0, 128], sizes = [8, 128], strides = [1, 1]} : vector<8x384xf32> to vector<8x128xf32>
    %198 = vector.extract_strided_slice %186 {offsets = [0, 128], sizes = [8, 128], strides = [1, 1]} : vector<8x384xf32> to vector<8x128xf32>
    %199 = arith.addf %197, %198 : vector<8x128xf32>
    %cst_80 = arith.constant 5.000000e-01 : f32
    %200 = vector.broadcast %cst_80 : f32 to vector<8x128xf32>
    %201 = arith.mulf %200, %199 : vector<8x128xf32>
    %202 = math.tanh %201 : vector<8x128xf32>
    %cst_81 = arith.constant 1.000000e+00 : f32
    %203 = vector.broadcast %cst_81 : f32 to vector<8x128xf32>
    %204 = arith.addf %202, %203 : vector<8x128xf32>
    %cst_82 = arith.constant 5.000000e-01 : f32
    %205 = vector.broadcast %cst_82 : f32 to vector<8x128xf32>
    %206 = arith.mulf %205, %204 : vector<8x128xf32>
    %207 = vector.extract_strided_slice %185 {offsets = [0, 256], sizes = [8, 128], strides = [1, 1]} : vector<8x384xf32> to vector<8x128xf32>
    %208 = vector.extract_strided_slice %186 {offsets = [0, 256], sizes = [8, 128], strides = [1, 1]} : vector<8x384xf32> to vector<8x128xf32>
    %209 = arith.addf %208, %46 : vector<8x128xf32>
    %210 = arith.mulf %196, %209 : vector<8x128xf32>
    %211 = arith.addf %207, %210 : vector<8x128xf32>
    %212 = math.tanh %211 : vector<8x128xf32>
    %cst_83 = arith.constant 1.000000e+00 : f32
    %213 = vector.broadcast %cst_83 : f32 to vector<8x128xf32>
    %214 = arith.subf %213, %206 : vector<8x128xf32>
    %215 = arith.mulf %214, %212 : vector<8x128xf32>
    %216 = arith.mulf %206, %183 : vector<8x128xf32>
    %217 = arith.addf %215, %216 : vector<8x128xf32>
    %c5 = arith.constant 5 : index
    %c0_84 = arith.constant 0 : index
    %c0_85 = arith.constant 0 : index
    %218 = vector.load %arg19[%c5, %c0_84, %c0_85] : memref<8x8x384xf32, #tpu.memory_space<vmem>>, vector<1x8x384xf32>
    %219 = vector.shape_cast %218 : vector<1x8x384xf32> to vector<8x384xf32>
    %cst_86 = arith.constant dense<0.000000e+00> : vector<8x384xf32>
    %220 = tpu.matmul %217, %43, %cst_86 {dimension_numbers = #tpu.dot_dimension_numbers<[1], [0], [0], [1], [0, 0, 1, 1], [], []>} : vector<8x128xf32>, vector<128x384xf32>, vector<8x384xf32> -> vector<8x384xf32>
    %221 = vector.extract_strided_slice %219 {offsets = [0, 0], sizes = [8, 128], strides = [1, 1]} : vector<8x384xf32> to vector<8x128xf32>
    %222 = vector.extract_strided_slice %220 {offsets = [0, 0], sizes = [8, 128], strides = [1, 1]} : vector<8x384xf32> to vector<8x128xf32>
    %223 = arith.addf %221, %222 : vector<8x128xf32>
    %cst_87 = arith.constant 5.000000e-01 : f32
    %224 = vector.broadcast %cst_87 : f32 to vector<8x128xf32>
    %225 = arith.mulf %224, %223 : vector<8x128xf32>
    %226 = math.tanh %225 : vector<8x128xf32>
    %cst_88 = arith.constant 1.000000e+00 : f32
    %227 = vector.broadcast %cst_88 : f32 to vector<8x128xf32>
    %228 = arith.addf %226, %227 : vector<8x128xf32>
    %cst_89 = arith.constant 5.000000e-01 : f32
    %229 = vector.broadcast %cst_89 : f32 to vector<8x128xf32>
    %230 = arith.mulf %229, %228 : vector<8x128xf32>
    %231 = vector.extract_strided_slice %219 {offsets = [0, 128], sizes = [8, 128], strides = [1, 1]} : vector<8x384xf32> to vector<8x128xf32>
    %232 = vector.extract_strided_slice %220 {offsets = [0, 128], sizes = [8, 128], strides = [1, 1]} : vector<8x384xf32> to vector<8x128xf32>
    %233 = arith.addf %231, %232 : vector<8x128xf32>
    %cst_90 = arith.constant 5.000000e-01 : f32
    %234 = vector.broadcast %cst_90 : f32 to vector<8x128xf32>
    %235 = arith.mulf %234, %233 : vector<8x128xf32>
    %236 = math.tanh %235 : vector<8x128xf32>
    %cst_91 = arith.constant 1.000000e+00 : f32
    %237 = vector.broadcast %cst_91 : f32 to vector<8x128xf32>
    %238 = arith.addf %236, %237 : vector<8x128xf32>
    %cst_92 = arith.constant 5.000000e-01 : f32
    %239 = vector.broadcast %cst_92 : f32 to vector<8x128xf32>
    %240 = arith.mulf %239, %238 : vector<8x128xf32>
    %241 = vector.extract_strided_slice %219 {offsets = [0, 256], sizes = [8, 128], strides = [1, 1]} : vector<8x384xf32> to vector<8x128xf32>
    %242 = vector.extract_strided_slice %220 {offsets = [0, 256], sizes = [8, 128], strides = [1, 1]} : vector<8x384xf32> to vector<8x128xf32>
    %243 = arith.addf %242, %46 : vector<8x128xf32>
    %244 = arith.mulf %230, %243 : vector<8x128xf32>
    %245 = arith.addf %241, %244 : vector<8x128xf32>
    %246 = math.tanh %245 : vector<8x128xf32>
    %cst_93 = arith.constant 1.000000e+00 : f32
    %247 = vector.broadcast %cst_93 : f32 to vector<8x128xf32>
    %248 = arith.subf %247, %240 : vector<8x128xf32>
    %249 = arith.mulf %248, %246 : vector<8x128xf32>
    %250 = arith.mulf %240, %217 : vector<8x128xf32>
    %251 = arith.addf %249, %250 : vector<8x128xf32>
    %c6 = arith.constant 6 : index
    %c0_94 = arith.constant 0 : index
    %c0_95 = arith.constant 0 : index
    %252 = vector.load %arg19[%c6, %c0_94, %c0_95] : memref<8x8x384xf32, #tpu.memory_space<vmem>>, vector<1x8x384xf32>
    %253 = vector.shape_cast %252 : vector<1x8x384xf32> to vector<8x384xf32>
    %cst_96 = arith.constant dense<0.000000e+00> : vector<8x384xf32>
    %254 = tpu.matmul %251, %43, %cst_96 {dimension_numbers = #tpu.dot_dimension_numbers<[1], [0], [0], [1], [0, 0, 1, 1], [], []>} : vector<8x128xf32>, vector<128x384xf32>, vector<8x384xf32> -> vector<8x384xf32>
    %255 = vector.extract_strided_slice %253 {offsets = [0, 0], sizes = [8, 128], strides = [1, 1]} : vector<8x384xf32> to vector<8x128xf32>
    %256 = vector.extract_strided_slice %254 {offsets = [0, 0], sizes = [8, 128], strides = [1, 1]} : vector<8x384xf32> to vector<8x128xf32>
    %257 = arith.addf %255, %256 : vector<8x128xf32>
    %cst_97 = arith.constant 5.000000e-01 : f32
    %258 = vector.broadcast %cst_97 : f32 to vector<8x128xf32>
    %259 = arith.mulf %258, %257 : vector<8x128xf32>
    %260 = math.tanh %259 : vector<8x128xf32>
    %cst_98 = arith.constant 1.000000e+00 : f32
    %261 = vector.broadcast %cst_98 : f32 to vector<8x128xf32>
    %262 = arith.addf %260, %261 : vector<8x128xf32>
    %cst_99 = arith.constant 5.000000e-01 : f32
    %263 = vector.broadcast %cst_99 : f32 to vector<8x128xf32>
    %264 = arith.mulf %263, %262 : vector<8x128xf32>
    %265 = vector.extract_strided_slice %253 {offsets = [0, 128], sizes = [8, 128], strides = [1, 1]} : vector<8x384xf32> to vector<8x128xf32>
    %266 = vector.extract_strided_slice %254 {offsets = [0, 128], sizes = [8, 128], strides = [1, 1]} : vector<8x384xf32> to vector<8x128xf32>
    %267 = arith.addf %265, %266 : vector<8x128xf32>
    %cst_100 = arith.constant 5.000000e-01 : f32
    %268 = vector.broadcast %cst_100 : f32 to vector<8x128xf32>
    %269 = arith.mulf %268, %267 : vector<8x128xf32>
    %270 = math.tanh %269 : vector<8x128xf32>
    %cst_101 = arith.constant 1.000000e+00 : f32
    %271 = vector.broadcast %cst_101 : f32 to vector<8x128xf32>
    %272 = arith.addf %270, %271 : vector<8x128xf32>
    %cst_102 = arith.constant 5.000000e-01 : f32
    %273 = vector.broadcast %cst_102 : f32 to vector<8x128xf32>
    %274 = arith.mulf %273, %272 : vector<8x128xf32>
    %275 = vector.extract_strided_slice %253 {offsets = [0, 256], sizes = [8, 128], strides = [1, 1]} : vector<8x384xf32> to vector<8x128xf32>
    %276 = vector.extract_strided_slice %254 {offsets = [0, 256], sizes = [8, 128], strides = [1, 1]} : vector<8x384xf32> to vector<8x128xf32>
    %277 = arith.addf %276, %46 : vector<8x128xf32>
    %278 = arith.mulf %264, %277 : vector<8x128xf32>
    %279 = arith.addf %275, %278 : vector<8x128xf32>
    %280 = math.tanh %279 : vector<8x128xf32>
    %cst_103 = arith.constant 1.000000e+00 : f32
    %281 = vector.broadcast %cst_103 : f32 to vector<8x128xf32>
    %282 = arith.subf %281, %274 : vector<8x128xf32>
    %283 = arith.mulf %282, %280 : vector<8x128xf32>
    %284 = arith.mulf %274, %251 : vector<8x128xf32>
    %285 = arith.addf %283, %284 : vector<8x128xf32>
    %c7 = arith.constant 7 : index
    %c0_104 = arith.constant 0 : index
    %c0_105 = arith.constant 0 : index
    %286 = vector.load %arg19[%c7, %c0_104, %c0_105] : memref<8x8x384xf32, #tpu.memory_space<vmem>>, vector<1x8x384xf32>
    %287 = vector.shape_cast %286 : vector<1x8x384xf32> to vector<8x384xf32>
    %cst_106 = arith.constant dense<0.000000e+00> : vector<8x384xf32>
    %288 = tpu.matmul %285, %43, %cst_106 {dimension_numbers = #tpu.dot_dimension_numbers<[1], [0], [0], [1], [0, 0, 1, 1], [], []>} : vector<8x128xf32>, vector<128x384xf32>, vector<8x384xf32> -> vector<8x384xf32>
    %289 = vector.extract_strided_slice %287 {offsets = [0, 0], sizes = [8, 128], strides = [1, 1]} : vector<8x384xf32> to vector<8x128xf32>
    %290 = vector.extract_strided_slice %288 {offsets = [0, 0], sizes = [8, 128], strides = [1, 1]} : vector<8x384xf32> to vector<8x128xf32>
    %291 = arith.addf %289, %290 : vector<8x128xf32>
    %cst_107 = arith.constant 5.000000e-01 : f32
    %292 = vector.broadcast %cst_107 : f32 to vector<8x128xf32>
    %293 = arith.mulf %292, %291 : vector<8x128xf32>
    %294 = math.tanh %293 : vector<8x128xf32>
    %cst_108 = arith.constant 1.000000e+00 : f32
    %295 = vector.broadcast %cst_108 : f32 to vector<8x128xf32>
    %296 = arith.addf %294, %295 : vector<8x128xf32>
    %cst_109 = arith.constant 5.000000e-01 : f32
    %297 = vector.broadcast %cst_109 : f32 to vector<8x128xf32>
    %298 = arith.mulf %297, %296 : vector<8x128xf32>
    %299 = vector.extract_strided_slice %287 {offsets = [0, 128], sizes = [8, 128], strides = [1, 1]} : vector<8x384xf32> to vector<8x128xf32>
    %300 = vector.extract_strided_slice %288 {offsets = [0, 128], sizes = [8, 128], strides = [1, 1]} : vector<8x384xf32> to vector<8x128xf32>
    %301 = arith.addf %299, %300 : vector<8x128xf32>
    %cst_110 = arith.constant 5.000000e-01 : f32
    %302 = vector.broadcast %cst_110 : f32 to vector<8x128xf32>
    %303 = arith.mulf %302, %301 : vector<8x128xf32>
    %304 = math.tanh %303 : vector<8x128xf32>
    %cst_111 = arith.constant 1.000000e+00 : f32
    %305 = vector.broadcast %cst_111 : f32 to vector<8x128xf32>
    %306 = arith.addf %304, %305 : vector<8x128xf32>
    %cst_112 = arith.constant 5.000000e-01 : f32
    %307 = vector.broadcast %cst_112 : f32 to vector<8x128xf32>
    %308 = arith.mulf %307, %306 : vector<8x128xf32>
    %309 = vector.extract_strided_slice %287 {offsets = [0, 256], sizes = [8, 128], strides = [1, 1]} : vector<8x384xf32> to vector<8x128xf32>
    %310 = vector.extract_strided_slice %288 {offsets = [0, 256], sizes = [8, 128], strides = [1, 1]} : vector<8x384xf32> to vector<8x128xf32>
    %311 = arith.addf %310, %46 : vector<8x128xf32>
    %312 = arith.mulf %298, %311 : vector<8x128xf32>
    %313 = arith.addf %309, %312 : vector<8x128xf32>
    %314 = math.tanh %313 : vector<8x128xf32>
    %cst_113 = arith.constant 1.000000e+00 : f32
    %315 = vector.broadcast %cst_113 : f32 to vector<8x128xf32>
    %316 = arith.subf %315, %308 : vector<8x128xf32>
    %317 = arith.mulf %316, %314 : vector<8x128xf32>
    %318 = arith.mulf %308, %285 : vector<8x128xf32>
    %319 = arith.addf %317, %318 : vector<8x128xf32>
    %c0_114 = arith.constant 0 : index
    %c0_115 = arith.constant 0 : index
    %320 = vector.load %arg13[%c0_114, %c0_115] : memref<128x128xf32, #tpu.memory_space<vmem>>, vector<128x128xf32>
    %cst_116 = arith.constant dense<0.000000e+00> : vector<8x128xf32>
    %321 = tpu.matmul %319, %320, %cst_116 {dimension_numbers = #tpu.dot_dimension_numbers<[1], [0], [0], [1], [0, 0, 1, 1], [], []>} : vector<8x128xf32>, vector<128x128xf32>, vector<8x128xf32> -> vector<8x128xf32>
    %c0_117 = arith.constant 0 : index
    %c0_118 = arith.constant 0 : index
    %322 = vector.load %arg14[%c0_117, %c0_118] : memref<1x128xf32, #tpu.memory_space<vmem>>, vector<1x128xf32>
    %323 = vector.broadcast %322 : vector<1x128xf32> to vector<8x128xf32>
    %324 = arith.addf %321, %323 : vector<8x128xf32>
    %325 = math.tanh %324 : vector<8x128xf32>
    %c0_119 = arith.constant 0 : index
    %c0_120 = arith.constant 0 : index
    %326 = vector.load %arg15[%c0_119, %c0_120] : memref<128x128xf32, #tpu.memory_space<vmem>>, vector<128x128xf32>
    %cst_121 = arith.constant dense<0.000000e+00> : vector<8x128xf32>
    %327 = tpu.matmul %325, %326, %cst_121 {dimension_numbers = #tpu.dot_dimension_numbers<[1], [0], [0], [1], [0, 0, 1, 1], [], []>} : vector<8x128xf32>, vector<128x128xf32>, vector<8x128xf32> -> vector<8x128xf32>
    %c0_122 = arith.constant 0 : index
    %c0_123 = arith.constant 0 : index
    %328 = vector.load %arg16[%c0_122, %c0_123] : memref<1x128xf32, #tpu.memory_space<vmem>>, vector<1x128xf32>
    %329 = vector.broadcast %328 : vector<1x128xf32> to vector<8x128xf32>
    %330 = arith.addf %327, %329 : vector<8x128xf32>
    %c0_124 = arith.constant 0 : index
    %c0_125 = arith.constant 0 : index
    %331 = vector.load %arg17[%c0_124, %c0_125] : memref<8x128xf32, #tpu.memory_space<vmem>>, vector<8x128xf32>
    tpu.vector_store %arg17[%c0_124, %c0_125], %330 {strides = array<i32>} : memref<8x128xf32, #tpu.memory_space<vmem>>, vector<8x128xf32>,
    %c0_126 = arith.constant 0 : index
    %c0_127 = arith.constant 0 : index
    %332 = vector.load %arg18[%c0_126, %c0_127] : memref<8x128xf32, #tpu.memory_space<vmem>>, vector<8x128xf32>
    tpu.vector_store %arg18[%c0_126, %c0_127], %319 {strides = array<i32>} : memref<8x128xf32, #tpu.memory_space<vmem>>, vector<8x128xf32>,
    return
  }
  func.func @transform_0(%arg0: i32) -> (i32, i32, i32) {
    %c0_i32 = arith.constant 0 : i32
    %c0_i32_0 = arith.constant 0 : i32
    %c0_i32_1 = arith.constant 0 : i32
    return %c0_i32, %arg0, %c0_i32_0 : i32, i32, i32
  }
  func.func @transform_1(%arg0: i32) -> (i32, i32) {
    %c0_i32 = arith.constant 0 : i32
    %c0_i32_0 = arith.constant 0 : i32
    return %arg0, %c0_i32 : i32, i32
  }
  func.func @transform_2(%arg0: i32) -> (i32, i32) {
    %c0_i32 = arith.constant 0 : i32
    %c0_i32_0 = arith.constant 0 : i32
    %c0_i32_1 = arith.constant 0 : i32
    return %c0_i32, %c0_i32_0 : i32, i32
  }
  func.func @transform_3(%arg0: i32) -> (i32, i32) {
    %c0_i32 = arith.constant 0 : i32
    %c0_i32_0 = arith.constant 0 : i32
    %c0_i32_1 = arith.constant 0 : i32
    return %c0_i32, %c0_i32_0 : i32, i32
  }
  func.func @transform_4(%arg0: i32) -> (i32, i32) {
    %c0_i32 = arith.constant 0 : i32
    %c0_i32_0 = arith.constant 0 : i32
    %c0_i32_1 = arith.constant 0 : i32
    return %c0_i32, %c0_i32_0 : i32, i32
  }
  func.func @transform_5(%arg0: i32) -> (i32, i32) {
    %c0_i32 = arith.constant 0 : i32
    %c0_i32_0 = arith.constant 0 : i32
    %c0_i32_1 = arith.constant 0 : i32
    return %c0_i32, %c0_i32_0 : i32, i32
  }
  func.func @transform_6(%arg0: i32) -> (i32, i32) {
    %c0_i32 = arith.constant 0 : i32
    %c0_i32_0 = arith.constant 0 : i32
    %c0_i32_1 = arith.constant 0 : i32
    return %c0_i32, %c0_i32_0 : i32, i32
  }
  func.func @transform_7(%arg0: i32) -> (i32, i32) {
    %c0_i32 = arith.constant 0 : i32
    %c0_i32_0 = arith.constant 0 : i32
    %c0_i32_1 = arith.constant 0 : i32
    return %c0_i32, %c0_i32_0 : i32, i32
  }
  func.func @transform_8(%arg0: i32) -> (i32, i32) {
    %c0_i32 = arith.constant 0 : i32
    %c0_i32_0 = arith.constant 0 : i32
    %c0_i32_1 = arith.constant 0 : i32
    return %c0_i32, %c0_i32_0 : i32, i32
  }
  func.func @transform_9(%arg0: i32) -> (i32, i32) {
    %c0_i32 = arith.constant 0 : i32
    %c0_i32_0 = arith.constant 0 : i32
    %c0_i32_1 = arith.constant 0 : i32
    return %c0_i32, %c0_i32_0 : i32, i32
  }
  func.func @transform_10(%arg0: i32) -> (i32, i32) {
    %c0_i32 = arith.constant 0 : i32
    %c0_i32_0 = arith.constant 0 : i32
    %c0_i32_1 = arith.constant 0 : i32
    return %c0_i32, %c0_i32_0 : i32, i32
  }
  func.func @transform_11(%arg0: i32) -> (i32, i32) {
    %c0_i32 = arith.constant 0 : i32
    %c0_i32_0 = arith.constant 0 : i32
    %c0_i32_1 = arith.constant 0 : i32
    return %c0_i32, %c0_i32_0 : i32, i32
  }
  func.func @transform_12(%arg0: i32) -> (i32, i32) {
    %c0_i32 = arith.constant 0 : i32
    %c0_i32_0 = arith.constant 0 : i32
    %c0_i32_1 = arith.constant 0 : i32
    return %c0_i32, %c0_i32_0 : i32, i32
  }
  func.func @transform_13(%arg0: i32) -> (i32, i32) {
    %c0_i32 = arith.constant 0 : i32
    %c0_i32_0 = arith.constant 0 : i32
    %c0_i32_1 = arith.constant 0 : i32
    return %c0_i32, %c0_i32_0 : i32, i32
  }
  func.func @transform_14(%arg0: i32) -> (i32, i32) {
    %c0_i32 = arith.constant 0 : i32
    %c0_i32_0 = arith.constant 0 : i32
    %c0_i32_1 = arith.constant 0 : i32
    return %c0_i32, %c0_i32_0 : i32, i32
  }
  func.func @transform_15(%arg0: i32) -> (i32, i32) {
    %c0_i32 = arith.constant 0 : i32
    %c0_i32_0 = arith.constant 0 : i32
    %c0_i32_1 = arith.constant 0 : i32
    return %c0_i32, %c0_i32_0 : i32, i32
  }
  func.func @transform_16(%arg0: i32) -> (i32, i32) {
    %c0_i32 = arith.constant 0 : i32
    %c0_i32_0 = arith.constant 0 : i32
    return %arg0, %c0_i32 : i32, i32
  }
  func.func @transform_17(%arg0: i32) -> (i32, i32) {
    %c0_i32 = arith.constant 0 : i32
    %c0_i32_0 = arith.constant 0 : i32
    return %arg0, %c0_i32 : i32, i32
  }
}

</mosaic_0001>

<bundles_post_ra>
// kernel: tpu_custom_call.1
= control target key start
LH: loop header
LB: loop body
LE: loop exit
PB: predicated region body
PF: predicated region fallthrough
CT: control target
= control target key end

     0   :  { %s5401_s0 = inlined_call_operand.hbm [shape: f32[8,8,3], index: 0, kind: input, shape index: {}]   ;;  %s5402_s1 = inlined_call_operand.hbm [shape: f32[8,128], index: 1, kind: input, shape index: {}]   ;;  %s5403_s2 = inlined_call_operand.hbm [shape: f32[3,128], index: 2, kind: input, shape index: {}]   ;;  %s5404_s3 = inlined_call_operand.hbm [shape: f32[1,128], index: 3, kind: input, shape index: {}]   ;;  %s5405_s4 = inlined_call_operand.hbm [shape: f32[128,128], index: 4, kind: input, shape index: {}]   ;;  %s5406_s5 = inlined_call_operand.hbm [shape: f32[1,128], index: 5, kind: input, shape index: {}]   ;;  %s5407_s6 = inlined_call_operand.hbm [shape: f32[128,128], index: 6, kind: input, shape index: {}]   ;;  %s5408_s7 = inlined_call_operand.hbm [shape: f32[1,128], index: 7, kind: input, shape index: {}]   ;;  %s5409_s8 = inlined_call_operand.hbm [shape: f32[128,384], index: 8, kind: input, shape index: {}]   ;;  %s5410_s9 = inlined_call_operand.hbm [shape: f32[1,384], index: 9, kind: input, shape index: {}]   ;;  %s5411_s10 = inlined_call_operand.hbm [shape: f32[128,384], index: 10, kind: input, shape index: {}]   ;;  %s5412_s11 = inlined_call_operand.hbm [shape: f32[1,128], index: 11, kind: input, shape index: {}]   ;;  %s5413_s12 = inlined_call_operand.hbm [shape: f32[128,128], index: 12, kind: input, shape index: {}]   ;;  %s5414_s13 = inlined_call_operand.hbm [shape: f32[1,128], index: 13, kind: input, shape index: {}]   ;;  %s5415_s14 = inlined_call_operand.hbm [shape: f32[128,128], index: 14, kind: input, shape index: {}]   ;;  %s5416_s15 = inlined_call_operand.hbm [shape: f32[1,128], index: 15, kind: input, shape index: {}]   ;;  %s5417_s16 = inlined_call_operand.hbm [shape: f32[8,128], index: 16, kind: output, shape index: {0}]   ;;  %s5418_s17 = inlined_call_operand.hbm [shape: f32[8,128], index: 17, kind: output, shape index: {1}]  }
   0x1   :  { %5421 = sst [smem:[#allocation43_spill]] %s5401_s0 }
   0x2   :  { %5422 = sst [smem:[#allocation44_spill]] %s5402_s1 }
   0x3   :  { %23 = vsyncpa [#allocation4], 0 }
   0x4   :  { %24 = vsyncpa [#allocation7], 0 }
   0x5   :  { %25 = vsyncpa [#allocation10], 0 }
   0x6   :  { %26 = vsyncpa [#allocation13], 0 }
   0x7   :  { %27 = vsyncpa [#allocation16], 0 }
   0x8   :  { %28 = vsyncpa [#allocation19], 0 }
   0x9   :  { %29 = vsyncpa [#allocation22], 0 }
   0xa   :  { %30 = vsyncpa [#allocation25], 0 }
   0xb   :  { %31 = vsyncpa [#allocation28], 0 }
   0xc   :  { %32 = vsyncpa [#allocation5], 0 }
   0xd   :  { %33 = vsyncpa [#allocation31], 0  ;;  %s4590_s24 = smov [#allocation6]   ;;  %s4591_s26 = smov [#allocation9]  }
   0xe   :  { %s52_s25 = sshll.u32 %s4590_s24, 4  ;;  %s72_s27 = sshll.u32 %s4591_s26, 4  ;;  %s53_s25 = int_to_ptr.vmem [resolvable:$true] %s52_s25  ;;  %s73_s27 = int_to_ptr.vmem [resolvable:$true] %s72_s27 }
   0xf   :  { %s5423_s0 = sld [smem:[#allocation44_spill]] }
  0x15   :  { %s4172_s30 = scalar_lea.hbm %s5423_s0, 128 }
  0x16   :  { %p4173_p0 = scmp.ne.s32.totalorder %s5423_s0, %s4172_s30  ;;  %p4176_p1 = scmp.lt.u32.totalorder %s4172_s30, %s5423_s0 }
  0x18   :  { %p4178_p2 = pnand %p4176_p1, %p4173_p0 }
  0x1a   :  { %4181 = shalt.err (!%p4178_p2)
}
  0x1b   :  { %s4182_s21 = scalar_lea.vmem %s53_s25, 128  ;;  %p4187_p4 = scmp.lt.s32.totalorder %s53_s25, %s53_s25 }
  0x1c   :  { %p4183_p3 = scmp.ne.s32.totalorder %s53_s25, %s4182_s21  ;;  %p4188_p5 = scmp.lt.s32.totalorder %s4182_s21, %s4182_s21 }
  0x1e   :  { %p4189_p6 = por %p4188_p5, %p4187_p4 }
  0x20   :  { %p4190_p7 = pnand %p4189_p6, %p4183_p3 }
  0x22   :  { %4193 = shalt.err (!%p4190_p7)
}
  0x23   :  { %55 = dma.hbm_to_vmem [thread:$0]  %s5423_s0, 128, %s53_s25, [#allocation7]  }
  0x24   :  { %s4194_s28 = scalar_lea.hbm %s5404_s3, 16 }
  0x25   :  { %p4195_p8 = scmp.ne.s32.totalorder %s5404_s3, %s4194_s28  ;;  %p4198_p9 = scmp.lt.u32.totalorder %s4194_s28, %s5404_s3 }
  0x27   :  { %p4200_p10 = pnand %p4198_p9, %p4195_p8 }
  0x29   :  { %4203 = shalt.err (!%p4200_p10)
}
  0x2a   :  { %s4204_s1 = scalar_lea.vmem %s73_s27, 16  ;;  %s4208_s20 = scalar_lea.vmem %s73_s27, 32 }
  0x2b   :  { %p4205_p11 = scmp.ne.s32.totalorder %s73_s27, %s4204_s1  ;;  %p4209_p12 = scmp.lt.s32.totalorder %s73_s27, %s73_s27 }
  0x2c   :  { %p4210_p13 = scmp.lt.s32.totalorder %s4208_s20, %s4204_s1 }
  0x2e   :  { %p4211_p0 = por %p4210_p13, %p4209_p12 }
  0x30   :  { %p4212_p1 = pnand %p4211_p0, %p4205_p11 }
  0x32   :  { %4215 = shalt.err (!%p4212_p1)
}
  0x33   :  { %75 = dma.hbm_to_vmem [thread:$0]  %s5404_s3, 16, %s73_s27, [#allocation10]  }
  0x34   :  { %s4592_s21 = smov [#allocation12]   ;;  %s4593_s23 = smov [#allocation15]  }
  0x35   :  { %s94_s22 = sshll.u32 %s4592_s21, 4  ;;  %s116_s24 = sshll.u32 %s4593_s23, 4  ;;  %s95_s22 = int_to_ptr.vmem [resolvable:$true] %s94_s22  ;;  %s117_s24 = int_to_ptr.vmem [resolvable:$true] %s116_s24 }
  0x36   :  { %s4216_s29 = scalar_lea.hbm %s5406_s5, 16 }
  0x37   :  { %p4217_p2 = scmp.ne.s32.totalorder %s5406_s5, %s4216_s29  ;;  %p4220_p3 = scmp.lt.u32.totalorder %s4216_s29, %s5406_s5 }
  0x39   :  { %p4222_p4 = pnand %p4220_p3, %p4217_p2 }
  0x3b   :  { %4225 = shalt.err (!%p4222_p4)
}
  0x3c   :  { %s4226_s3 = scalar_lea.vmem %s95_s22, 16  ;;  %s4230_s27 = scalar_lea.vmem %s95_s22, 32 }
  0x3d   :  { %p4227_p5 = scmp.ne.s32.totalorder %s95_s22, %s4226_s3  ;;  %p4231_p6 = scmp.lt.s32.totalorder %s95_s22, %s95_s22 }
  0x3e   :  { %p4232_p7 = scmp.lt.s32.totalorder %s4230_s27, %s4226_s3 }
  0x40   :  { %p4233_p8 = por %p4232_p7, %p4231_p6 }
  0x42   :  { %p4234_p9 = pnand %p4233_p8, %p4227_p5 }
  0x44   :  { %4237 = shalt.err (!%p4234_p9)
}
  0x45   :  { %97 = dma.hbm_to_vmem [thread:$0]  %s5406_s5, 16, %s95_s22, [#allocation13]  }
  0x46   :  { %s4238_s23 = scalar_lea.hbm %s5408_s7, 16 }
  0x47   :  { %p4239_p10 = scmp.ne.s32.totalorder %s5408_s7, %s4238_s23  ;;  %p4242_p11 = scmp.lt.u32.totalorder %s4238_s23, %s5408_s7 }
  0x49   :  { %p4244_p12 = pnand %p4242_p11, %p4239_p10 }
  0x4b   :  { %4247 = shalt.err (!%p4244_p12)
}
  0x4c   :  { %s4248_s30 = scalar_lea.vmem %s117_s24, 16  ;;  %s4252_s19 = scalar_lea.vmem %s117_s24, 32 }
  0x4d   :  { %p4249_p13 = scmp.ne.s32.totalorder %s117_s24, %s4248_s30  ;;  %p4253_p0 = scmp.lt.s32.totalorder %s117_s24, %s117_s24 }
  0x4e   :  { %p4254_p1 = scmp.lt.s32.totalorder %s4252_s19, %s4248_s30 }
  0x50   :  { %p4255_p2 = por %p4254_p1, %p4253_p0 }
  0x52   :  { %p4256_p3 = pnand %p4255_p2, %p4249_p13 }
  0x54   :  { %4259 = shalt.err (!%p4256_p3)
}
  0x55   :  { %119 = dma.hbm_to_vmem [thread:$0]  %s5408_s7, 16, %s117_s24, [#allocation16]  }
  0x56   :  { %s4594_s1 = smov [#allocation18]   ;;  %s4595_s27 = smov [#allocation21]  }
  0x57   :  { %s138_s3 = sshll.u32 %s4594_s1, 4  ;;  %s160_s20 = sshll.u32 %s4595_s27, 4  ;;  %s139_s3 = int_to_ptr.vmem [resolvable:$true] %s138_s3  ;;  %s161_s20 = int_to_ptr.vmem [resolvable:$true] %s160_s20 }
  0x58   :  { %s4260_s21 = scalar_lea.hbm %s5410_s9, 48 }
  0x59   :  { %p4261_p4 = scmp.ne.s32.totalorder %s5410_s9, %s4260_s21  ;;  %p4264_p5 = scmp.lt.u32.totalorder %s4260_s21, %s5410_s9 }
  0x5b   :  { %p4266_p6 = pnand %p4264_p5, %p4261_p4 }
  0x5d   :  { %4269 = shalt.err (!%p4266_p6)
}
  0x5e   :  { %s4270_s7 = scalar_lea.vmem %s139_s3, 48  ;;  %s4274_s24 = scalar_lea.vmem %s139_s3, 64 }
  0x5f   :  { %p4271_p7 = scmp.ne.s32.totalorder %s139_s3, %s4270_s7  ;;  %p4275_p8 = scmp.lt.s32.totalorder %s139_s3, %s139_s3 }
  0x60   :  { %p4276_p9 = scmp.lt.s32.totalorder %s4274_s24, %s4270_s7 }
  0x62   :  { %p4277_p10 = por %p4276_p9, %p4275_p8 }
  0x64   :  { %p4278_p11 = pnand %p4277_p10, %p4271_p7 }
  0x66   :  { %4281 = shalt.err (!%p4278_p11)
}
  0x67   :  { %141 = dma.hbm_to_vmem [thread:$0]  %s5410_s9, 48, %s139_s3, [#allocation19]  }
  0x68   :  { %s4282_s22 = scalar_lea.hbm %s5412_s11, 16 }
  0x69   :  { %p4283_p12 = scmp.ne.s32.totalorder %s5412_s11, %s4282_s22  ;;  %p4286_p13 = scmp.lt.u32.totalorder %s4282_s22, %s5412_s11 }
  0x6b   :  { %p4288_p0 = pnand %p4286_p13, %p4283_p12 }
  0x6d   :  { %4291 = shalt.err (!%p4288_p0)
}
  0x6e   :  { %s4292_s21 = scalar_lea.vmem %s161_s20, 16  ;;  %s4296_s23 = scalar_lea.vmem %s161_s20, 32 }
  0x6f   :  { %p4293_p1 = scmp.ne.s32.totalorder %s161_s20, %s4292_s21  ;;  %p4297_p2 = scmp.lt.s32.totalorder %s161_s20, %s161_s20 }
  0x70   :  { %p4298_p3 = scmp.lt.s32.totalorder %s4296_s23, %s4292_s21 }
  0x72   :  { %p4299_p4 = por %p4298_p3, %p4297_p2 }
  0x74   :  { %p4300_p5 = pnand %p4299_p4, %p4293_p1 }
  0x76   :  { %4303 = shalt.err (!%p4300_p5)
}
  0x77   :  { %163 = dma.hbm_to_vmem [thread:$0]  %s5412_s11, 16, %s161_s20, [#allocation22]  }
  0x78   :  { %s4596_s26 = smov [#allocation24]   ;;  %s4597_s29 = smov [#allocation3]  }
  0x79   :  { %s182_s28 = sshll.u32 %s4596_s26, 4  ;;  %s39_s7 = sshll.u32 %s4597_s29, 4  ;;  %s183_s28 = int_to_ptr.vmem [resolvable:$true] %s182_s28  ;;  %s4777_s7 = int_to_ptr.vmem [resolvable:$true] %s39_s7 }
  0x7a   :  { %s4304_s30 = scalar_lea.hbm %s5414_s13, 16 }
  0x7b   :  { %p4305_p6 = scmp.ne.s32.totalorder %s5414_s13, %s4304_s30  ;;  %p4308_p7 = scmp.lt.u32.totalorder %s4304_s30, %s5414_s13 }
  0x7d   :  { %p4310_p8 = pnand %p4308_p7, %p4305_p6 }
  0x7f   :  { %4313 = shalt.err (!%p4310_p8)
}
  0x80   :  { %s4314_s11 = scalar_lea.vmem %s183_s28, 16  ;;  %s4318_s20 = scalar_lea.vmem %s183_s28, 32 }
  0x81   :  { %p4315_p9 = scmp.ne.s32.totalorder %s183_s28, %s4314_s11  ;;  %p4319_p10 = scmp.lt.s32.totalorder %s183_s28, %s183_s28 }
  0x82   :  { %p4320_p11 = scmp.lt.s32.totalorder %s4318_s20, %s4314_s11 }
  0x84   :  { %p4321_p12 = por %p4320_p11, %p4319_p10 }
  0x86   :  { %p4322_p13 = pnand %p4321_p12, %p4315_p9 }
  0x88   :  { %4325 = shalt.err (!%p4322_p13)
}
  0x89   :  { %185 = dma.hbm_to_vmem [thread:$0]  %s5414_s13, 16, %s183_s28, [#allocation25]  }
  0x8a   :  { %s5424_s23 = sld [smem:[#allocation43_spill]] }
  0x90   :  { %s4326_s9 = scalar_lea.hbm %s5424_s23, 1024 }
  0x91   :  { %p4327_p0 = scmp.ne.s32.totalorder %s5424_s23, %s4326_s9  ;;  %p4330_p1 = scmp.lt.u32.totalorder %s4326_s9, %s5424_s23 }
  0x93   :  { %p4332_p2 = pnand %p4330_p1, %p4327_p0 }
  0x95   :  { %4335 = shalt.err (!%p4332_p2)
}
  0x96   :  { %s4336_s18 = scalar_lea.vmem %s4777_s7, 1024  ;;  %p4341_p4 = scmp.lt.s32.totalorder %s4777_s7, %s4777_s7 }
  0x97   :  { %p4337_p3 = scmp.ne.s32.totalorder %s4777_s7, %s4336_s18  ;;  %p4342_p5 = scmp.lt.s32.totalorder %s4336_s18, %s4336_s18 }
  0x99   :  { %p4343_p6 = por %p4342_p5, %p4341_p4 }
  0x9b   :  { %p4344_p7 = pnand %p4343_p6, %p4337_p3 }
  0x9d   :  { %4347 = shalt.err (!%p4344_p7)
}
  0x9e   :  { %s4598_s13 = smov 128   ;;  %s4599_s28 = smov 8  }
  0x9f   :  { %45 = dma.hbm_to_vmem [thread:$0]  %s5424_s23, 1024, %s4777_s7, [#allocation4], %s4598_s13, %s4598_s13, %s4599_s28  }
  0xa0   :  { %s4600_s5 = smov [#allocation8]   ;;  %s4601_s1 = smov [#allocation11]  }
  0xa1   :  { %s62_s22 = sshll.u32 %s4600_s5, 4  ;;  %s81_s11 = sshll.u32 %s4601_s1, 4  ;;  %s63_s22 = int_to_ptr.vmem [resolvable:$true] %s62_s22  ;;  %s4811_s11 = int_to_ptr.vmem [resolvable:$true] %s81_s11 }
  0xa2   :  { %s4348_s25 = scalar_lea.hbm %s5403_s2, 64 }
  0xa3   :  { %p4349_p8 = scmp.ne.s32.totalorder %s5403_s2, %s4348_s25  ;;  %p4352_p9 = scmp.lt.u32.totalorder %s4348_s25, %s5403_s2 }
  0xa5   :  { %p4354_p10 = pnand %p4352_p9, %p4349_p8 }
  0xa7   :  { %4357 = shalt.err (!%p4354_p10)
}
  0xa8   :  { %s4358_s7 = scalar_lea.vmem %s63_s22, 64  ;;  %p4363_p12 = scmp.lt.s32.totalorder %s63_s22, %s63_s22 }
  0xa9   :  { %p4359_p11 = scmp.ne.s32.totalorder %s63_s22, %s4358_s7  ;;  %p4364_p13 = scmp.lt.s32.totalorder %s4358_s7, %s4358_s7 }
  0xab   :  { %p4365_p0 = por %p4364_p13, %p4363_p12 }
  0xad   :  { %p4366_p1 = pnand %p4365_p0, %p4359_p11 }
  0xaf   :  { %4369 = shalt.err (!%p4366_p1)
}
  0xb0   :  { %65 = dma.hbm_to_vmem [thread:$0]  %s5403_s2, 64, %s63_s22, [#allocation7]  }
  0xb1   :  { %s4370_s18 = scalar_lea.hbm %s5405_s4, 2048 }
  0xb2   :  { %p4371_p2 = scmp.ne.s32.totalorder %s5405_s4, %s4370_s18  ;;  %p4374_p3 = scmp.lt.u32.totalorder %s4370_s18, %s5405_s4 }
  0xb4   :  { %p4376_p4 = pnand %p4374_p3, %p4371_p2 }
  0xb6   :  { %4379 = shalt.err (!%p4376_p4)
}
  0xb7   :  { %s4380_s20 = scalar_lea.vmem %s4811_s11, 2048  ;;  %p4385_p6 = scmp.lt.s32.totalorder %s4811_s11, %s4811_s11 }
  0xb8   :  { %p4381_p5 = scmp.ne.s32.totalorder %s4811_s11, %s4380_s20  ;;  %p4386_p7 = scmp.lt.s32.totalorder %s4380_s20, %s4380_s20 }
  0xba   :  { %p4387_p8 = por %p4386_p7, %p4385_p6 }
  0xbc   :  { %p4388_p9 = pnand %p4387_p8, %p4381_p5 }
  0xbe   :  { %4391 = shalt.err (!%p4388_p9)
}
  0xbf   :  { %87 = dma.hbm_to_vmem [thread:$0]  %s5405_s4, 2048, %s4811_s11, [#allocation10], %s4598_s13, %s4598_s13, %s4599_s28  }
  0xc0   :  { %s4602_s27 = smov [#allocation14]   ;;  %s4603_s0 = smov [#allocation17]  }
  0xc1   :  { %s103_s25 = sshll.u32 %s4602_s27, 4  ;;  %s125_s21 = sshll.u32 %s4603_s0, 4  ;;  %s104_s25 = int_to_ptr.vmem [resolvable:$true] %s103_s25  ;;  %s4845_s21 = int_to_ptr.vmem [resolvable:$true] %s125_s21 }
  0xc2   :  { %s4392_s7 = scalar_lea.hbm %s5407_s6, 2048 }
  0xc3   :  { %p4393_p10 = scmp.ne.s32.totalorder %s5407_s6, %s4392_s7  ;;  %p4396_p11 = scmp.lt.u32.totalorder %s4392_s7, %s5407_s6 }
  0xc5   :  { %p4398_p12 = pnand %p4396_p11, %p4393_p10 }
  0xc7   :  { %4401 = shalt.err (!%p4398_p12)
}
  0xc8   :  { %s4402_s4 = scalar_lea.vmem %s104_s25, 2048  ;;  %p4407_p0 = scmp.lt.s32.totalorder %s104_s25, %s104_s25 }
  0xc9   :  { %p4403_p13 = scmp.ne.s32.totalorder %s104_s25, %s4402_s4  ;;  %p4408_p1 = scmp.lt.s32.totalorder %s4402_s4, %s4402_s4 }
  0xcb   :  { %p4409_p2 = por %p4408_p1, %p4407_p0 }
  0xcd   :  { %p4410_p3 = pnand %p4409_p2, %p4403_p13 }
  0xcf   :  { %4413 = shalt.err (!%p4410_p3)
}
  0xd0   :  { %109 = dma.hbm_to_vmem [thread:$0]  %s5407_s6, 2048, %s104_s25, [#allocation13], %s4598_s13, %s4598_s13, %s4599_s28  }
  0xd1   :  { %s4414_s5 = scalar_lea.hbm %s5409_s8, 6144 }
  0xd2   :  { %p4415_p4 = scmp.ne.s32.totalorder %s5409_s8, %s4414_s5  ;;  %p4418_p5 = scmp.lt.u32.totalorder %s4414_s5, %s5409_s8 }
  0xd4   :  { %p4420_p6 = pnand %p4418_p5, %p4415_p4 }
  0xd6   :  { %4423 = shalt.err (!%p4420_p6)
}
  0xd7   :  { %s4424_s27 = scalar_lea.vmem %s4845_s21, 6144  ;;  %p4429_p8 = scmp.lt.s32.totalorder %s4845_s21, %s4845_s21 }
  0xd8   :  { %p4425_p7 = scmp.ne.s32.totalorder %s4845_s21, %s4424_s27  ;;  %p4430_p9 = scmp.lt.s32.totalorder %s4424_s27, %s4424_s27 }
  0xda   :  { %p4431_p10 = por %p4430_p9, %p4429_p8 }
  0xdc   :  { %p4432_p11 = pnand %p4431_p10, %p4425_p7 }
  0xde   :  { %4435 = shalt.err (!%p4432_p11)
}
  0xdf   :  { %s4604_s6 = smov 384   ;;  %s4605_s25 = smov 24  }
  0xe0   :  { %131 = dma.hbm_to_vmem [thread:$0]  %s5409_s8, 6144, %s4845_s21, [#allocation16], %s4604_s6, %s4604_s6, %s4605_s25  }
  0xe1   :  { %s4606_s3 = smov [#allocation20]   ;;  %s4607_s23 = smov [#allocation23]  }
  0xe2   :  { %s147_s7 = sshll.u32 %s4606_s3, 4  ;;  %s169_s26 = sshll.u32 %s4607_s23, 4  ;;  %s148_s7 = int_to_ptr.vmem [resolvable:$true] %s147_s7  ;;  %s4879_s26 = int_to_ptr.vmem [resolvable:$true] %s169_s26 }
  0xe3   :  { %s4436_s4 = scalar_lea.hbm %s5411_s10, 6144 }
  0xe4   :  { %p4437_p12 = scmp.ne.s32.totalorder %s5411_s10, %s4436_s4  ;;  %p4440_p13 = scmp.lt.u32.totalorder %s4436_s4, %s5411_s10 }
  0xe6   :  { %p4442_p0 = pnand %p4440_p13, %p4437_p12 }
  0xe8   :  { %4445 = shalt.err (!%p4442_p0)
}
  0xe9   :  { %s4446_s8 = scalar_lea.vmem %s148_s7, 6144  ;;  %p4451_p2 = scmp.lt.s32.totalorder %s148_s7, %s148_s7 }
  0xea   :  { %p4447_p1 = scmp.ne.s32.totalorder %s148_s7, %s4446_s8  ;;  %p4452_p3 = scmp.lt.s32.totalorder %s4446_s8, %s4446_s8 }
  0xec   :  { %p4453_p4 = por %p4452_p3, %p4451_p2 }
  0xee   :  { %p4454_p5 = pnand %p4453_p4, %p4447_p1 }
  0xf0   :  { %4457 = shalt.err (!%p4454_p5)
}
  0xf1   :  { %153 = dma.hbm_to_vmem [thread:$0]  %s5411_s10, 6144, %s148_s7, [#allocation19], %s4604_s6, %s4604_s6, %s4605_s25  }
  0xf2   :  { %s4458_s2 = scalar_lea.hbm %s5413_s12, 2048 }
  0xf3   :  { %p4459_p6 = scmp.ne.s32.totalorder %s5413_s12, %s4458_s2  ;;  %p4462_p7 = scmp.lt.u32.totalorder %s4458_s2, %s5413_s12 }
  0xf5   :  { %p4464_p8 = pnand %p4462_p7, %p4459_p6 }
  0xf7   :  { %4467 = shalt.err (!%p4464_p8)
}
  0xf8   :  { %s4468_s3 = scalar_lea.vmem %s4879_s26, 2048  ;;  %p4473_p10 = scmp.lt.s32.totalorder %s4879_s26, %s4879_s26 }
  0xf9   :  { %p4469_p9 = scmp.ne.s32.totalorder %s4879_s26, %s4468_s3  ;;  %p4474_p11 = scmp.lt.s32.totalorder %s4468_s3, %s4468_s3 }
  0xfb   :  { %p4475_p12 = por %p4474_p11, %p4473_p10 }
  0xfd   :  { %p4476_p13 = pnand %p4475_p12, %p4469_p9 }
  0xff   :  { %4479 = shalt.err (!%p4476_p13)
}
 0x100   :  { %175 = dma.hbm_to_vmem [thread:$0]  %s5413_s12, 2048, %s4879_s26, [#allocation22], %s4598_s13, %s4598_s13, %s4599_s28  }
 0x101   :  { %s4608_s25 = smov [#allocation26]   ;;  %s4609_s23 = smov [#allocation27]  }
 0x102   :  { %s191_s7 = sshll.u32 %s4608_s25, 4  ;;  %s204_s29 = sshll.u32 %s4609_s23, 4  ;;  %s192_s7 = int_to_ptr.vmem [resolvable:$true] %s191_s7  ;;  %s205_s29 = int_to_ptr.vmem [resolvable:$true] %s204_s29 }
 0x103   :  { %s4480_s11 = scalar_lea.hbm %s5415_s14, 2048 }
 0x104   :  { %p4481_p0 = scmp.ne.s32.totalorder %s5415_s14, %s4480_s11  ;;  %p4484_p1 = scmp.lt.u32.totalorder %s4480_s11, %s5415_s14 }
 0x106   :  { %p4486_p2 = pnand %p4484_p1, %p4481_p0 }
 0x108   :  { %4489 = shalt.err (!%p4486_p2)
}
 0x109   :  { %s4490_s12 = scalar_lea.vmem %s192_s7, 2048  ;;  %p4495_p4 = scmp.lt.s32.totalorder %s192_s7, %s192_s7 }
 0x10a   :  { %p4491_p3 = scmp.ne.s32.totalorder %s192_s7, %s4490_s12  ;;  %p4496_p5 = scmp.lt.s32.totalorder %s4490_s12, %s4490_s12 }
 0x10c   :  { %p4497_p6 = por %p4496_p5, %p4495_p4 }
 0x10e   :  { %p4498_p7 = pnand %p4497_p6, %p4491_p3 }
 0x110   :  { %4501 = shalt.err (!%p4498_p7)
}
 0x111   :  { %197 = dma.hbm_to_vmem [thread:$0]  %s5415_s14, 2048, %s192_s7, [#allocation25], %s4598_s13, %s4598_s13, %s4599_s28  }
 0x112   :  { %s4502_s20 = scalar_lea.hbm %s5416_s15, 16 }
 0x113   :  { %p4503_p8 = scmp.ne.s32.totalorder %s5416_s15, %s4502_s20  ;;  %p4506_p9 = scmp.lt.u32.totalorder %s4502_s20, %s5416_s15 }
 0x115   :  { %p4508_p10 = pnand %p4506_p9, %p4503_p8 }
 0x117   :  { %4511 = shalt.err (!%p4508_p10)
}
 0x118   :  { %s4512_s9 = scalar_lea.vmem %s205_s29, 16  ;;  %s4516_s3 = scalar_lea.vmem %s205_s29, 32 }
 0x119   :  { %p4513_p11 = scmp.ne.s32.totalorder %s205_s29, %s4512_s9  ;;  %p4517_p12 = scmp.lt.s32.totalorder %s205_s29, %s205_s29 }
 0x11a   :  { %p4518_p13 = scmp.lt.s32.totalorder %s4516_s3, %s4512_s9 }
 0x11c   :  { %p4519_p0 = por %p4518_p13, %p4517_p12 }
 0x11e   :  { %p4520_p1 = pnand %p4519_p0, %p4513_p11 }
 0x120   :  { %4523 = shalt.err (!%p4520_p1)
}
 0x121   :  { %207 = dma.hbm_to_vmem [thread:$0]  %s5416_s15, 16, %s205_s29, [#allocation28]  }
 0x122   :  { %4568 = dma.done.wait [#allocation4], 1024  }
 0x123   :  { %4569 = vsyncadd [#allocation4], 4294966272 }
 0x124   :  { %4570 = dma.done.wait [#allocation7], 192  }
 0x125   :  { %4571 = vsyncadd [#allocation7], 4294967104 }
 0x126   :  { %4572 = dma.done.wait [#allocation10], 2064  }
 0x127   :  { %4573 = vsyncadd [#allocation10], 4294965232 }
 0x128   :  { %4574 = dma.done.wait [#allocation13], 2064  }
 0x129   :  { %4575 = vsyncadd [#allocation13], 4294965232 }
 0x12a   :  { %4576 = dma.done.wait [#allocation16], 6160  }
 0x12b   :  { %4577 = vsyncadd [#allocation16], 4294961136 }
 0x12c   :  { %4578 = dma.done.wait [#allocation19], 6192  }
 0x12d   :  { %4579 = vsyncadd [#allocation19], 4294961104 }
 0x12e   :  { %4580 = dma.done.wait [#allocation22], 2064  }
 0x12f   :  { %4581 = vsyncadd [#allocation22], 4294965232 }
 0x130   :  { %4582 = dma.done.wait [#allocation25], 2064  }
 0x131   :  { %4583 = vsyncadd [#allocation25], 4294965232 }
 0x132   :  { %4584 = dma.done.wait [#allocation28], 16  }
 0x133   :  { %4585 = vsyncadd [#allocation28], 4294967280  ;;  %vm320_vm0 = vcmask 1042432   ;;  %vm264_vm1 = vcmask 23552   ;;  %v288_v0 = vld [vmem:[#allocation8] sm:$0x7] }
 0x134   :  { %v256_v1 = vld [vmem:[#allocation3] sm:$0xff]  ;;  %v257_v2 = vld [vmem:[#allocation3 + $0x8] sm:$0xff]  ;;  %2897 = vmatprep.subr.msk.mxu0 %vm320_vm0, %v288_v0  ;;  %v258_v3 = vld [vmem:[#allocation3 + $0x10] sm:$0xff]  ;;  %vm4612_vm2 = vmmov 0   ;;  %s4613_s15 = smov [#allocation30]  }
 0x135   :  { %v259_v4 = vld [vmem:[#allocation3 + $0x18] sm:$0xff]  ;;  %v260_v5 = vld [vmem:[#allocation3 + $0x20] sm:$0xff]  ;;  %v265_v6 = vsel %vm264_vm1, %v256_v1, -inf  ;;  %v266_v7 = vsel %vm264_vm1, %v257_v2, -inf  ;;  %2898 = vmatpush3.msk.msra.mxu0 %vm320_vm0, %v288_v0  ;;  %v261_v8 = vld [vmem:[#allocation3 + $0x28] sm:$0xff]  ;;  %v267_v11 = vsel %vm264_vm1, %v258_v3, -inf }
 0x136   :  { %v262_v9 = vld [vmem:[#allocation3 + $0x30] sm:$0xff]  ;;  %v263_v10 = vld [vmem:[#allocation3 + $0x38] sm:$0xff]  ;;  %v268_v12 = vsel %vm264_vm1, %v259_v4, -inf  ;;  %v269_v13 = vsel %vm264_vm1, %v260_v5, -inf  ;;  %v271_v15 = vsel %vm264_vm1, %v261_v8, -inf  ;;  %v455_v36 = vld [vmem:[#allocation11 + $0x18] sm:$0xff] }
 0x137   :  { %v270_v14 = vmax.f32 %v265_v6, %v269_v13  ;;  %v273_v16 = vsel %vm264_vm1, %v262_v9, -inf  ;;  %v275_v17 = vsel %vm264_vm1, %v263_v10, -inf  ;;  %v272_v18 = vmax.f32 %v266_v7, %v271_v15  ;;  %v452_v32 = vld [vmem:[#allocation11] sm:$0xff]  ;;  %v453_v33 = vld [vmem:[#allocation11 + $0x8] sm:$0xff]  ;;  %v454_v35 = vld [vmem:[#allocation11 + $0x10] sm:$0xff]  ;;  %s2610_s28 = sshll.u32 %s4613_s15, 4  ;;  %s2611_s28 = int_to_ptr.vmem [resolvable:$true] %s2610_s28 }
 0x138   :  { %v274_v19 = vmax.f32 %v267_v11, %v273_v16  ;;  %v276_v20 = vmax.f32 %v268_v12, %v275_v17  ;;  %v3393_v34 = vpack.c.bf16 %v453_v33, %v452_v32  ;;  %v3397_v37 = vpack.c.bf16 %v455_v36, %v454_v35  ;;  %v456_v38 = vld [vmem:[#allocation11 + $0x20] sm:$0xff]  ;;  %v457_v39 = vld [vmem:[#allocation11 + $0x28] sm:$0xff]  ;;  %v458_v41 = vld [vmem:[#allocation11 + $0x30] sm:$0xff]  ;;  %s4524_s10 = scalar_lea.vmem %s2611_s28, 128  ;;  %p4529_p3 = scmp.lt.s32.totalorder %s2611_s28, %s2611_s28 }
 0x139   :  { %v277_v21 = vmax.f32 %v270_v14, %v272_v18  ;;  %v3401_v40 = vpack.c.bf16 %v457_v39, %v456_v38  ;;  %v459_v42 = vld [vmem:[#allocation11 + $0x38] sm:$0xff]  ;;  %v460_v44 = vld [vmem:[#allocation11 + $0x40] sm:$0xff]  ;;  %v461_v45 = vld [vmem:[#allocation11 + $0x48] sm:$0xff]  ;;  %p4525_p2 = scmp.ne.s32.totalorder %s2611_s28, %s4524_s10  ;;  %p4530_p4 = scmp.lt.s32.totalorder %s4524_s10, %s4524_s10 }
 0x13a   :  { %v278_v22 = vmax.f32 %v274_v19, %v276_v20  ;;  %3394 = vmatprep.subr.bf16.mxu1 %v3393_v34  ;;  %v3405_v43 = vpack.c.bf16 %v459_v42, %v458_v41  ;;  %v3409_v46 = vpack.c.bf16 %v461_v45, %v460_v44  ;;  %v462_v47 = vld [vmem:[#allocation11 + $0x50] sm:$0xff]  ;;  %v463_v48 = vld [vmem:[#allocation11 + $0x58] sm:$0xff]  ;;  %v464_v50 = vld [vmem:[#allocation11 + $0x60] sm:$0xff] }
 0x13b   :  { %3396 = vmatpush3.bf16.msra.mxu1 %v3393_v34  ;;  %v3413_v49 = vpack.c.bf16 %v463_v48, %v462_v47  ;;  %v465_v51 = vld [vmem:[#allocation11 + $0x68] sm:$0xff]  ;;  %v466_v53 = vld [vmem:[#allocation11 + $0x70] sm:$0xff]  ;;  %v467_v54 = vld [vmem:[#allocation11 + $0x78] sm:$0xff]  ;;  %p4531_p5 = por %p4530_p4, %p4529_p3 }
 0x13c   :  { %v279_v23 = vmax.f32 %v277_v21, %v278_v22  ;;  %3398 = vmatprep.subr.bf16.mxu1 %v3397_v37  ;;  %v3417_v52 = vpack.c.bf16 %v465_v51, %v464_v50  ;;  %v3421_v55 = vpack.c.bf16 %v467_v54, %v466_v53  ;;  %v2631_v58 = vld [vmem:[#allocation9] ss:$0 sm:$0xff]  ;;  %v603_v32 = vld [vmem:[#allocation14] sm:$0xff]  ;;  %v604_v33 = vld [vmem:[#allocation14 + $0x8] sm:$0xff] }
 0x13d   :  { %v3425_v34 = vpack.c.bf16 %v604_v33, %v603_v32  ;;  %v605_v35 = vld [vmem:[#allocation14 + $0x10] sm:$0xff]  ;;  %v606_v36 = vld [vmem:[#allocation14 + $0x18] sm:$0xff]  ;;  %v607_v38 = vld [vmem:[#allocation14 + $0x20] sm:$0xff]  ;;  %p4532_p6 = pnand %p4531_p5, %p4525_p2 }
 0x13e   :  { %v280_v24 = vsub.f32 %v256_v1, %v279_v23  ;;  %v281_v25 = vsub.f32 %v257_v2, %v279_v23  ;;  %v282_v26 = vsub.f32 %v258_v3, %v279_v23  ;;  %v283_v27 = vsub.f32 %v259_v4, %v279_v23  ;;  %v608_v39 = vld [vmem:[#allocation14 + $0x28] sm:$0xff]  ;;  %v609_v41 = vld [vmem:[#allocation14 + $0x30] sm:$0xff]  ;;  %v610_v42 = vld [vmem:[#allocation14 + $0x38] sm:$0xff] }
 0x13f   :  { %v284_v28 = vsub.f32 %v260_v5, %v279_v23  ;;  %v285_v29 = vsub.f32 %v261_v8, %v279_v23  ;;  %v286_v30 = vsub.f32 %v262_v9, %v279_v23  ;;  %v287_v31 = vsub.f32 %v263_v10, %v279_v23  ;;  %3400 = vmatpush3.bf16.msra.mxu1 %v3397_v37  ;;  %v611_v44 = vld [vmem:[#allocation14 + $0x40] sm:$0xff]  ;;  %v612_v45 = vld [vmem:[#allocation14 + $0x48] sm:$0xff]  ;;  %v613_v47 = vld [vmem:[#allocation14 + $0x50] sm:$0xff] }
 0x140   :  { %2899 = vmatprep.mubr.msk.f32.mxu0 %vm264_vm1, %v280_v24  ;;  %3402 = vmatprep.subr.bf16.mxu1 %v3401_v40  ;;  %v3429_v37 = vpack.c.bf16 %v606_v36, %v605_v35  ;;  %v614_v48 = vld [vmem:[#allocation14 + $0x58] sm:$0xff]  ;;  %v615_v50 = vld [vmem:[#allocation14 + $0x60] sm:$0xff]  ;;  %v616_v51 = vld [vmem:[#allocation14 + $0x68] sm:$0xff] }
 0x141   :  { %2900 = vmatmul.mubr.msk.f32.vlgmr.msra.gmra.mrb[0].mxu0 %vm264_vm1, %v281_v25  ;;  %3426 = vmatprep.subr.bf16.mxu0 %v3425_v34  ;;  %v617_v53 = vld [vmem:[#allocation14 + $0x70] sm:$0xff]  ;;  %v618_v54 = vld [vmem:[#allocation14 + $0x78] sm:$0xff] }
 0x142   :  { %2902 = vmatprep.mubr.msk.f32.mxu0 %vm264_vm1, %v282_v26  ;;  %3428 = vmatpush3.bf16.msra.mxu0 %v3425_v34 }
 0x143   :  { %3404 = vmatpush3.bf16.msra.mxu1 %v3401_v40  ;;  %3430 = vmatprep.subr.bf16.mxu0 %v3429_v37  ;;  %v3433_v40 = vpack.c.bf16 %v608_v39, %v607_v38 }
 0x144   :  { %3406 = vmatprep.subr.bf16.mxu1 %v3405_v43 }
 0x145   :  { %2903 = vmatmul.mubr.msk.f32.gmra.mrb[2].mxu0 %vm264_vm1, %v283_v27 }
 0x146   :  { %2905 = vmatprep.mubr.msk.f32.mxu0 %vm264_vm1, %v284_v28  ;;  %3432 = vmatpush3.bf16.msra.mxu0 %v3429_v37 }
 0x147   :  { %3408 = vmatpush3.bf16.msra.mxu1 %v3405_v43  ;;  %3434 = vmatprep.subr.bf16.mxu0 %v3433_v40  ;;  %v3437_v43 = vpack.c.bf16 %v610_v42, %v609_v41 }
 0x148   :  { %3410 = vmatprep.subr.bf16.mxu1 %v3409_v46 }
 0x149   :  { %2906 = vmatmul.mubr.msk.f32.gmra.mrb[4].mxu0 %vm264_vm1, %v285_v29 }
 0x14a   :  { %2908 = vmatprep.mubr.msk.f32.mxu0 %vm264_vm1, %v286_v30  ;;  %3436 = vmatpush3.bf16.msra.mxu0 %v3433_v40 }
 0x14b   :  { %3412 = vmatpush3.bf16.msra.mxu1 %v3409_v46  ;;  %3438 = vmatprep.subr.bf16.mxu0 %v3437_v43  ;;  %v3441_v46 = vpack.c.bf16 %v612_v45, %v611_v44 }
 0x14c   :  { %3414 = vmatprep.subr.bf16.mxu1 %v3413_v49 }
 0x14d   :  { %2909 = vmatmul.mubr.msk.f32.gmra.mrb[6].mxu0 %vm264_vm1, %v287_v31 }
 0x14e   :  { %3440 = vmatpush3.bf16.msra.mxu0 %v3437_v43 }
 0x14f   :  { %3416 = vmatpush3.bf16.msra.mxu1 %v3413_v49  ;;  %3442 = vmatprep.subr.bf16.mxu0 %v3441_v46  ;;  %v3445_v49 = vpack.c.bf16 %v614_v48, %v613_v47 }
 0x150   :  { %3418 = vmatprep.subr.bf16.mxu1 %v3417_v52 }
 0x152   :  { %3444 = vmatpush3.bf16.msra.mxu0 %v3441_v46 }
 0x153   :  { %3420 = vmatpush3.bf16.msra.mxu1 %v3417_v52  ;;  %3446 = vmatprep.subr.bf16.mxu0 %v3445_v49  ;;  %v3449_v52 = vpack.c.bf16 %v616_v51, %v615_v50 }
 0x154   :  { %3422 = vmatprep.subr.bf16.mxu1 %v3421_v55 }
 0x156   :  { %3448 = vmatpush3.bf16.msra.mxu0 %v3445_v49 }
 0x157   :  { %3424 = vmatpush3.bf16.msra.mxu1 %v3421_v55  ;;  %3450 = vmatprep.subr.bf16.mxu0 %v3449_v52  ;;  %v3453_v55 = vpack.c.bf16 %v618_v54, %v617_v53 }
 0x15a   :  { %3452 = vmatpush3.bf16.msra.mxu0 %v3449_v52 }
 0x15b   :  { %3454 = vmatprep.subr.bf16.mxu0 %v3453_v55 }
 0x15e   :  { %3456 = vmatpush3.bf16.msra.mxu0 %v3453_v55 }
 0x214   :  { %v2901_v56 = vpop.f32.mrb[0].mxu0 }
 0x215   :  { %v390_v57 = vpop.f32.mrb[1].mxu0  ;;  %v396_v60 = vadd.f32 %v2901_v56, %v2631_v58  ;;  %v740_v56 = vld [vmem:[#allocation17 + $0x8] sm:$0xff] }
 0x216   :  { %v391_v62 = vadd.f32 %v2631_v58, %v390_v57  ;;  %v743_v57 = vld [vmem:[#allocation17 + $0x20] sm:$0xff] }
 0x217   :  { %4074 = vtanh.f32 %v396_v60  ;;  %v742_v60 = vld [vmem:[#allocation17 + $0x18] sm:$0xff] }
 0x218   :  { %v2904_v59 = vpop.f32.mrb[2].mxu0  ;;  %4076 = vtanh.f32 %v391_v62  ;;  %v744_v62 = vld [vmem:[#allocation17 + $0x28] sm:$0xff] }
 0x219   :  { %v400_v61 = vpop.f32.mrb[3].mxu0  ;;  %v406_v0 = vadd.f32 %v2904_v59, %v2631_v58  ;;  %v3457_v59 = vpack.c.bf16 %v743_v57, %v740_v56  ;;  %v747_v56 = vld [vmem:[#allocation17 + $0x40] sm:$0xff]  ;;  %v750_v57 = vld [vmem:[#allocation17 + $0x58] sm:$0xff] }
 0x21a   :  { %v401_v3 = vadd.f32 %v2631_v58, %v400_v61  ;;  %v741_v61 = vld [vmem:[#allocation17 + $0x10] sm:$0xff] }
 0x21b   :  { %3458 = vmatprep.subr.bf16.mxu1 %v3457_v59  ;;  %v3493_v59 = vpack.c.bf16 %v750_v57, %v747_v56  ;;  %v1046_v57 = vld [vmem:[#allocation20] sm:$0xff] }
 0x21c   :  { %v2907_v63 = vpop.f32.mrb[4].mxu0 }
 0x21d   :  { %v416_v1 = vadd.f32 %v2907_v63, %v2631_v58  ;;  %v410_v2 = vpop.f32.mrb[5].mxu0 }
 0x21e   :  { %v411_v4 = vadd.f32 %v2631_v58, %v410_v2  ;;  %v749_v2 = vld [vmem:[#allocation17 + $0x50] sm:$0xff] }
 0x21f   :  { %4078 = vtanh.f32 %v416_v1  ;;  %v746_v1 = vld [vmem:[#allocation17 + $0x38] sm:$0xff] }
 0x220   :  { %4080 = vtanh.f32 %v411_v4  ;;  %v2910_v5 = vpop.f32.mrb[6].mxu0  ;;  %v3461_v4 = vpack.c.bf16 %v749_v2, %v746_v1 }
 0x221   :  { %4082 = vtanh.f32 %v406_v0  ;;  %v426_v6 = vadd.f32 %v2910_v5, %v2631_v58  ;;  %v420_v7 = vpop.f32.mrb[7].mxu0  ;;  %v4075_v9 = vpop.eup %4074  ;;  %v4956_v0 = vpack.c.bf16 %v744_v62, %v741_v61  ;;  %v748_v5 = vld [vmem:[#allocation17 + $0x48] sm:$0xff] }
 0x222   :  { %4084 = vtanh.f32 %v401_v3  ;;  %v421_v8 = vadd.f32 %v2631_v58, %v420_v7  ;;  %v4077_v10 = vpop.eup %4076  ;;  %v739_v58 = vld [vmem:[#allocation17] sm:$0xff]  ;;  %v745_v3 = vld [vmem:[#allocation17 + $0x30] sm:$0xff]  ;;  %v752_v7 = vld [vmem:[#allocation17 + $0x68] sm:$0xff] }
 0x223   :  { %4086 = vtanh.f32 %v426_v6  ;;  %v3459_v63 = vpack.c.bf16 %v742_v60, %v739_v58  ;;  %3490 = vmatprep.subr.bf16.mxu0 %v4956_v0  ;;  %v3463_v6 = vpack.c.bf16 %v748_v5, %v745_v3  ;;  %v753_v5 = vld [vmem:[#allocation17 + $0x70] sm:$0xff] }
 0x224   :  { %4088 = vtanh.f32 %v421_v8  ;;  %v755_v8 = vld [vmem:[#allocation17 + $0x80] sm:$0xff] }
 0x229   :  { %v4079_v11 = vpop.eup %4078 }
 0x22a   :  { %v4081_v12 = vpop.eup %4080  ;;  %v438_v13 = vmax.f32 %v4075_v9, %v4079_v11 }
 0x22b   :  { %v4083_v14 = vpop.eup %4082  ;;  %v437_v15 = vmax.f32 %v4077_v10, %v4081_v12 }
 0x22c   :  { %v4085_v16 = vpop.eup %4084 }
 0x22d   :  { %v4087_v17 = vpop.eup %4086  ;;  %v441_v18 = vmax.f32 %v437_v15, %v438_v13  ;;  %v761_v13 = vld [vmem:[#allocation17 + $0xb0] sm:$0xff] }
 0x22e   :  { %v4089_v19 = vpop.eup %4088  ;;  %v440_v20 = vmax.f32 %v4083_v14, %v4087_v17 }
 0x22f   :  { %v439_v21 = vmax.f32 %v4085_v16, %v4089_v19 }
 0x231   :  { %v442_v22 = vmax.f32 %v439_v21, %v440_v20 }
 0x233   :  { %v443_v23 = vmax.f32 %v441_v18, %v442_v22  ;;  %v764_v18 = vld [vmem:[#allocation17 + $0xc8] sm:$0xff]  ;;  %v763_v22 = vld [vmem:[#allocation17 + $0xc0] sm:$0xff] }
 0x235   :  { %v444_v24 = vsub.f32 %v4077_v10, %v443_v23  ;;  %v445_v25 = vsub.f32 %v4075_v9, %v443_v23  ;;  %v446_v26 = vsub.f32 %v4085_v16, %v443_v23  ;;  %v447_v27 = vsub.f32 %v4083_v14, %v443_v23  ;;  %v751_v10 = vld [vmem:[#allocation17 + $0x60] sm:$0xff]  ;;  %v757_v16 = vld [vmem:[#allocation17 + $0x90] sm:$0xff] }
 0x236   :  { %v448_v28 = vsub.f32 %v4081_v12, %v443_v23  ;;  %v449_v29 = vsub.f32 %v4079_v11, %v443_v23  ;;  %v450_v30 = vsub.f32 %v4089_v19, %v443_v23  ;;  %v451_v31 = vsub.f32 %v4087_v17, %v443_v23  ;;  %v754_v11 = vld [vmem:[#allocation17 + $0x78] sm:$0xff]  ;;  %v760_v17 = vld [vmem:[#allocation17 + $0xa8] sm:$0xff]  ;;  %v767_v19 = vld [vmem:[#allocation17 + $0xe0] sm:$0xff] }
 0x237   :  { %2943 = vmatprep.mubr.f32.mxu1 %v444_v24  ;;  %v3465_v9 = vpack.c.bf16 %v755_v8, %v752_v7  ;;  %v758_v12 = vld [vmem:[#allocation17 + $0x98] sm:$0xff]  ;;  %v3467_v14 = vpack.c.bf16 %v754_v11, %v751_v10  ;;  %v3471_v20 = vpack.c.bf16 %v760_v17, %v757_v16  ;;  %v3473_v21 = vpack.c.bf16 %v767_v19, %v764_v18  ;;  %v759_v8 = vld [vmem:[#allocation17 + $0xa0] sm:$0xff]  ;;  %v765_v11 = vld [vmem:[#allocation17 + $0xd0] sm:$0xff] }
 0x238   :  { %2944 = vmatmul.mubr.f32.vlgmr.msra.gmra.mrb[0].mxu1 %v445_v25  ;;  %v3469_v15 = vpack.c.bf16 %v761_v13, %v758_v12  ;;  %v766_v23 = vld [vmem:[#allocation17 + $0xd8] sm:$0xff]  ;;  %v768_v12 = vld [vmem:[#allocation17 + $0xe8] sm:$0xff]  ;;  %v769_v16 = vld [vmem:[#allocation17 + $0xf0] sm:$0xff] }
 0x239   :  { %2946 = vmatprep.mubr.f32.mxu1 %v446_v26  ;;  %3460 = vmatpush1.bf16.msra.mxu1 %v3459_v63  ;;  %v3475_v24 = vpack.c.bf16 %v766_v23, %v763_v22  ;;  %v3505_v13 = vpack.c.bf16 %v768_v12, %v765_v11  ;;  %v772_v17 = vld [vmem:[#allocation17 + $0x108] sm:$0xff]  ;;  %v771_v18 = vld [vmem:[#allocation17 + $0x100] sm:$0xff] }
 0x23a   :  { %3462 = vmatprep.subr.bf16.mxu1 %v3461_v4  ;;  %v3479_v19 = vpack.c.bf16 %v772_v17, %v769_v16  ;;  %v776_v22 = vld [vmem:[#allocation17 + $0x128] sm:$0xff]  ;;  %v779_v23 = vld [vmem:[#allocation17 + $0x140] sm:$0xff] }
 0x23b   :  { %v1062_v11 = vld [vmem:[#allocation20 + $0x80] sm:$0xff]  ;;  %v1061_v16 = vld [vmem:[#allocation20 + $0x78] sm:$0xff] }
 0x23c   :  { %2947 = vmatmul.mubr.f32.gmra.mrb[2].mxu1 %v447_v27  ;;  %v2641_v27 = vld [vmem:[#allocation12] ss:$0 sm:$0xff] }
 0x23d   :  { %2949 = vmatprep.mubr.f32.mxu1 %v448_v28  ;;  %3464 = vmatpush1.bf16.msra.mxu1 %v3463_v6  ;;  %v756_v6 = vld [vmem:[#allocation17 + $0x88] sm:$0xff] }
 0x23e   :  { %3466 = vmatprep.subr.bf16.mxu1 %v3465_v9  ;;  %v3497_v7 = vpack.c.bf16 %v756_v6, %v753_v5  ;;  %v762_v9 = vld [vmem:[#allocation17 + $0xb8] sm:$0xff] }
 0x23f   :  { %v3501_v10 = vpack.c.bf16 %v762_v9, %v759_v8  ;;  %v1052_v6 = vld [vmem:[#allocation20 + $0x30] sm:$0xff] }
 0x240   :  { %2950 = vmatmul.mubr.f32.gmra.mrb[4].mxu1 %v449_v29 }
 0x241   :  { %2952 = vmatprep.mubr.f32.mxu1 %v450_v30  ;;  %3468 = vmatpush1.bf16.msra.mxu1 %v3467_v14  ;;  %v773_v14 = vld [vmem:[#allocation17 + $0x110] sm:$0xff] }
 0x242   :  { %3470 = vmatprep.subr.bf16.mxu1 %v3469_v15 }
 0x244   :  { %2953 = vmatmul.mubr.f32.gmra.mrb[6].mxu1 %v451_v31 }
 0x245   :  { %3472 = vmatpush1.bf16.msra.mxu1 %v3471_v20  ;;  %v774_v20 = vld [vmem:[#allocation17 + $0x118] sm:$0xff] }
 0x246   :  { %3474 = vmatprep.subr.bf16.mxu1 %v3473_v21  ;;  %v3509_v21 = vpack.c.bf16 %v774_v20, %v771_v18  ;;  %v1065_v18 = vld [vmem:[#allocation20 + $0x98] sm:$0xff] }
 0x249   :  { %3476 = vmatpush1.bf16.msra.mxu1 %v3475_v24  ;;  %v3481_v24 = vpack.c.bf16 %v779_v23, %v776_v22  ;;  %v1057_v22 = vld [vmem:[#allocation20 + $0x58] sm:$0xff] }
 0x30b   :  { %v2945_v25 = vpop.f32.mrb[0].mxu1 }
 0x30c   :  { %v541_v26 = vpop.f32.mrb[1].mxu1  ;;  %v547_v29 = vadd.f32 %v2945_v25, %v2641_v27  ;;  %v775_v25 = vld [vmem:[#allocation17 + $0x120] sm:$0xff] }
 0x30d   :  { %v542_v31 = vadd.f32 %v2641_v27, %v541_v26  ;;  %v778_v26 = vld [vmem:[#allocation17 + $0x138] sm:$0xff] }
 0x30e   :  { %4090 = vtanh.f32 %v547_v29  ;;  %v780_v29 = vld [vmem:[#allocation17 + $0x148] sm:$0xff] }
 0x30f   :  { %v2948_v28 = vpop.f32.mrb[2].mxu1  ;;  %4092 = vtanh.f32 %v542_v31  ;;  %v782_v31 = vld [vmem:[#allocation17 + $0x158] sm:$0xff] }
 0x310   :  { %v551_v30 = vpop.f32.mrb[3].mxu1  ;;  %v557_v33 = vadd.f32 %v2948_v28, %v2641_v27  ;;  %v3483_v28 = vpack.c.bf16 %v778_v26, %v775_v25  ;;  %v1064_v25 = vld [vmem:[#allocation20 + $0x90] sm:$0xff]  ;;  %v1067_v26 = vld [vmem:[#allocation20 + $0xa8] sm:$0xff] }
 0x311   :  { %v552_v36 = vadd.f32 %v2641_v27, %v551_v30 }
 0x313   :  { %v2951_v32 = vpop.f32.mrb[4].mxu1 }
 0x314   :  { %v567_v34 = vadd.f32 %v2951_v32, %v2641_v27  ;;  %v561_v35 = vpop.f32.mrb[5].mxu1  ;;  %v785_v32 = vld [vmem:[#allocation17 + $0x170] sm:$0xff] }
 0x315   :  { %v562_v37 = vadd.f32 %v2641_v27, %v561_v35  ;;  %v784_v35 = vld [vmem:[#allocation17 + $0x168] sm:$0xff] }
 0x316   :  { %4094 = vtanh.f32 %v567_v34  ;;  %v781_v34 = vld [vmem:[#allocation17 + $0x150] sm:$0xff] }
 0x317   :  { %4096 = vtanh.f32 %v562_v37  ;;  %v2954_v38 = vpop.f32.mrb[6].mxu1  ;;  %v3487_v37 = vpack.c.bf16 %v784_v35, %v781_v34  ;;  %v1063_v34 = vld [vmem:[#allocation20 + $0x88] sm:$0xff] }
 0x318   :  { %4098 = vtanh.f32 %v557_v33  ;;  %v577_v39 = vadd.f32 %v2954_v38, %v2641_v27  ;;  %v571_v40 = vpop.f32.mrb[7].mxu1  ;;  %v4091_v42 = vpop.eup %4090  ;;  %v3485_v33 = vpack.c.bf16 %v785_v32, %v782_v31  ;;  %v786_v38 = vld [vmem:[#allocation17 + $0x178] sm:$0xff]  ;;  %v4990_v32 = vpack.c.bf16 %v1067_v26, %v1064_v25  ;;  %v787_v25 = vld [vmem:[#allocation18] sm:$0x7] }
 0x319   :  { %4100 = vtanh.f32 %v552_v36  ;;  %v572_v41 = vadd.f32 %v2641_v27, %v571_v40  ;;  %v4093_v43 = vpop.eup %4092  ;;  %v777_v27 = vld [vmem:[#allocation17 + $0x130] sm:$0xff]  ;;  %v783_v36 = vld [vmem:[#allocation17 + $0x160] sm:$0xff] }
 0x31a   :  { %4102 = vtanh.f32 %v577_v39  ;;  %v3513_v30 = vpack.c.bf16 %v780_v29, %v777_v27  ;;  %v3517_v39 = vpack.c.bf16 %v786_v38, %v783_v36  ;;  %v1047_v40 = vld [vmem:[#allocation20 + $0x8] sm:$0xff]  ;;  %v1074_v29 = vld [vmem:[#allocation20 + $0xe0] sm:$0xff] }
 0x31b   :  { %4104 = vtanh.f32 %v572_v41  ;;  %v1050_v41 = vld [vmem:[#allocation20 + $0x20] sm:$0xff] }
 0x31c   :  { %v1070_v36 = vld [vmem:[#allocation20 + $0xc0] sm:$0xff] }
 0x320   :  { %v4095_v44 = vpop.eup %4094 }
 0x321   :  { %v4097_v45 = vpop.eup %4096  ;;  %v589_v46 = vmax.f32 %v4091_v42, %v4095_v44 }
 0x322   :  { %v4099_v47 = vpop.eup %4098  ;;  %v588_v48 = vmax.f32 %v4093_v43, %v4097_v45 }
 0x323   :  { %v4101_v49 = vpop.eup %4100 }
 0x324   :  { %v4103_v50 = vpop.eup %4102  ;;  %v592_v51 = vmax.f32 %v588_v48, %v589_v46 }
 0x325   :  { %v4105_v52 = vpop.eup %4104  ;;  %v591_v53 = vmax.f32 %v4099_v47, %v4103_v50 }
 0x326   :  { %v590_v54 = vmax.f32 %v4101_v49, %v4105_v52 }
 0x328   :  { %v593_v55 = vmax.f32 %v590_v54, %v591_v53 }
 0x32a   :  { %v594_v58 = vmax.f32 %v592_v51, %v593_v55 }
 0x32c   :  { %v595_v60 = vsub.f32 %v4093_v43, %v594_v58  ;;  %v596_v61 = vsub.f32 %v4091_v42, %v594_v58  ;;  %v597_v62 = vsub.f32 %v4101_v49, %v594_v58  ;;  %v598_v63 = vsub.f32 %v4099_v47, %v594_v58 }
 0x32d   :  { %v599_v1 = vsub.f32 %v4097_v45, %v594_v58  ;;  %v600_v2 = vsub.f32 %v4095_v44, %v594_v58  ;;  %v601_v3 = vsub.f32 %v4105_v52, %v594_v58  ;;  %v602_v4 = vsub.f32 %v4103_v50, %v594_v58  ;;  %v2642_v45 = vld [vmem:[#allocation15] ss:$0 sm:$0xff] }
 0x32e   :  { %2987 = vmatprep.mubr.f32.mxu0 %v595_v60  ;;  %v4960_v42 = vpack.c.bf16 %v1050_v41, %v1047_v40  ;;  %v4610_v43 = vmov 0.0   ;;  %v4611_v44 = vmov 0.0|0.0   ;;  %v1049_v58 = vld [vmem:[#allocation20 + $0x18] sm:$0xff]  ;;  %v1080_v40 = vld [vmem:[#allocation20 + $0x110] sm:$0xff] }
 0x32f   :  { %2988 = vmatmul.mubr.f32.vlgmr.msra.gmra.mrb[8].mxu0 %v596_v61  ;;  %868 = vmatprep.mubr.f32.mxu1 %v4610_v43  ;;  %v1053_v60 = vld [vmem:[#allocation20 + $0x38] sm:$0xff]  ;;  %v1056_v61 = vld [vmem:[#allocation20 + $0x50] sm:$0xff] }
 0x330   :  { %2990 = vmatprep.mubr.f32.mxu0 %v597_v62  ;;  %3492 = vmatpush3.bf16.msra.mxu0 %v4956_v0  ;;  %v770_v0 = vld [vmem:[#allocation17 + $0xf8] sm:$0xff]  ;;  %v4967_v5 = vpack.c.bf16 %v1056_v61, %v1053_v60 }
 0x331   :  { %3494 = vmatprep.subr.bf16.mxu0 %v3493_v59  ;;  %v3477_v15 = vpack.c.bf16 %v773_v14, %v770_v0  ;;  %v1048_v62 = vld [vmem:[#allocation20 + $0x10] sm:$0xff]  ;;  %v1085_v60 = vld [vmem:[#allocation20 + $0x138] sm:$0xff] }
 0x332   :  { %v1089_v61 = vld [vmem:[#allocation20 + $0x158] sm:$0xff] }
 0x333   :  { %2991 = vmatmul.mubr.f32.gmra.mrb[10].mxu0 %v598_v63  ;;  %3478 = vmatprep.subr.bf16.mxu1 %v3477_v15  ;;  %v1051_v63 = vld [vmem:[#allocation20 + $0x28] sm:$0xff]  ;;  %v1058_v15 = vld [vmem:[#allocation20 + $0x60] sm:$0xff] }
 0x334   :  { %2993 = vmatprep.mubr.f32.mxu0 %v599_v1  ;;  %3496 = vmatpush3.bf16.msra.mxu0 %v3493_v59  ;;  %v4969_v12 = vpack.c.bf16 %v1051_v63, %v1048_v62  ;;  %v4980_v23 = vpack.c.bf16 %v1061_v16, %v1058_v15  ;;  %v1092_v62 = vld [vmem:[#allocation20 + $0x170] sm:$0xff] }
 0x335   :  { %3498 = vmatprep.subr.bf16.mxu0 %v3497_v7  ;;  %3480 = vmatpush1.bf16.msra.mxu1 %v3479_v19  ;;  %v1068_v19 = vld [vmem:[#allocation20 + $0xb0] sm:$0xff] }
 0x336   :  { %3482 = vmatprep.subr.bf16.mxu1 %v3481_v24  ;;  %v4984_v24 = vpack.c.bf16 %v1068_v19, %v1065_v18  ;;  %v5045_v16 = vld [vmem:[#allocation6] sm:$0xff]  ;;  %v1093_v18 = vld [vmem:[#allocation20 + $0x178] sm:$0xff] }
 0x337   :  { %2994 = vmatmul.mubr.f32.gmra.mrb[12].mxu0 %v600_v2  ;;  %v4965_v2 = vpack.c.bf16 %v1049_v58, %v1046_v57  ;;  %v1075_v57 = vld [vmem:[#allocation20 + $0xe8] sm:$0xff] }
 0x338   :  { %2996 = vmatprep.mubr.f32.mxu0 %v601_v3  ;;  %3500 = vmatpush3.bf16.msra.mxu0 %v3497_v7  ;;  %v1055_v7 = vld [vmem:[#allocation20 + $0x48] sm:$0xff] }
 0x339   :  { %3502 = vmatprep.subr.bf16.mxu0 %v3501_v10  ;;  %3484 = vmatpush1.bf16.msra.mxu1 %v3483_v28  ;;  %v4972_v0 = vpack.c.bf16 %v1055_v7, %v1052_v6  ;;  %v1071_v28 = vld [vmem:[#allocation20 + $0xc8] sm:$0xff]  ;;  %v5028_v6 = vpack.c.bf16 %v1092_v62, %v1089_v61  ;;  %v1088_v7 = vld [vmem:[#allocation20 + $0x150] sm:$0xff] }
 0x33a   :  { %3486 = vmatprep.subr.bf16.mxu1 %v3485_v33  ;;  %v1060_v33 = vld [vmem:[#allocation20 + $0x70] sm:$0xff]  ;;  %v4994_v35 = vpack.c.bf16 %v1074_v29, %v1071_v28 }
 0x33b   :  { %2997 = vmatmul.mubr.f32.gmra.mrb[14].mxu0 %v602_v4 }
 0x33c   :  { %3504 = vmatpush3.bf16.msra.mxu0 %v3501_v10  ;;  %v1059_v10 = vld [vmem:[#allocation20 + $0x68] sm:$0xff] }
 0x33d   :  { %3506 = vmatprep.subr.bf16.mxu0 %v3505_v13  ;;  %3488 = vmatpush1.bf16.msra.mxu1 %v3487_v37  ;;  %v4976_v14 = vpack.c.bf16 %v1062_v11, %v1059_v10  ;;  %v1073_v37 = vld [vmem:[#allocation20 + $0xd8] sm:$0xff]  ;;  %v1084_v11 = vld [vmem:[#allocation20 + $0x130] sm:$0xff] }
 0x33e   :  { %3522 = vmatprep.subr.bf16.mxu1 %v4960_v42 }
 0x340   :  { %3508 = vmatpush3.bf16.msra.mxu0 %v3505_v13 }
 0x341   :  { %3510 = vmatprep.subr.bf16.mxu0 %v3509_v21 }
 0x344   :  { %3512 = vmatpush3.bf16.msra.mxu0 %v3509_v21  ;;  %v1054_v21 = vld [vmem:[#allocation20 + $0x40] sm:$0xff] }
 0x345   :  { %3514 = vmatprep.subr.bf16.mxu0 %v3513_v30 }
 0x348   :  { %3516 = vmatpush3.bf16.msra.mxu0 %v3513_v30  ;;  %v4987_v30 = vpack.c.bf16 %v1057_v22, %v1054_v21 }
 0x349   :  { %3518 = vmatprep.subr.bf16.mxu0 %v3517_v39 }
 0x34c   :  { %3520 = vmatpush3.bf16.msra.mxu0 %v3517_v39  ;;  %v1077_v39 = vld [vmem:[#allocation20 + $0xf8] sm:$0xff] }
 0x34d   :  { %3553 = vmatprep.subr.bf16.mxu0 %v4611_v44 }
 0x402   :  { %v2989_v46 = vpop.f32.mrb[8].mxu0 }
 0x403   :  { %v698_v47 = vadd.f32 %v2989_v46, %v2642_v45  ;;  %v692_v48 = vpop.f32.mrb[9].mxu0  ;;  %v5000_v46 = vpack.c.bf16 %v1073_v37, %v1070_v36 }
 0x404   :  { %v693_v49 = vadd.f32 %v2642_v45, %v692_v48  ;;  %v1069_v48 = vld [vmem:[#allocation20 + $0xb8] sm:$0xff] }
 0x406   :  { %4106 = vtanh.f32 %v693_v49  ;;  %v2992_v50 = vpop.f32.mrb[10].mxu0  ;;  %v5004_v49 = vpack.c.bf16 %v1080_v40, %v1077_v39 }
 0x407   :  { %4108 = vtanh.f32 %v698_v47  ;;  %v708_v51 = vadd.f32 %v2992_v50, %v2642_v45  ;;  %v702_v52 = vpop.f32.mrb[11].mxu0  ;;  %v1066_v47 = vld [vmem:[#allocation20 + $0xa0] sm:$0xff]  ;;  %v1076_v50 = vld [vmem:[#allocation20 + $0xf0] sm:$0xff] }
 0x408   :  { %v703_v53 = vadd.f32 %v2642_v45, %v702_v52  ;;  %v1083_v52 = vld [vmem:[#allocation20 + $0x128] sm:$0xff] }
 0x40a   :  { %4110 = vtanh.f32 %v703_v53  ;;  %v2995_v54 = vpop.f32.mrb[12].mxu0  ;;  %v1086_v53 = vld [vmem:[#allocation20 + $0x140] sm:$0xff] }
 0x40b   :  { %4112 = vtanh.f32 %v708_v51  ;;  %v718_v55 = vadd.f32 %v2995_v54, %v2642_v45  ;;  %v712_v56 = vpop.f32.mrb[13].mxu0  ;;  %v1079_v51 = vld [vmem:[#allocation20 + $0x108] sm:$0xff]  ;;  %v5010_v54 = vpack.c.bf16 %v1069_v48, %v1066_v47  ;;  %v5017_v58 = vpack.c.bf16 %v1086_v53, %v1083_v52 }
 0x40c   :  { %v713_v59 = vadd.f32 %v2642_v45, %v712_v56  ;;  %v1072_v56 = vld [vmem:[#allocation20 + $0xd0] sm:$0xff] }
 0x40d   :  { %v5021_v63 = vpack.c.bf16 %v1075_v57, %v1072_v56 }
 0x40e   :  { %4114 = vtanh.f32 %v713_v59  ;;  %v2998_v1 = vpop.f32.mrb[14].mxu0  ;;  %v1082_v59 = vld [vmem:[#allocation20 + $0x120] sm:$0xff] }
 0x40f   :  { %4116 = vtanh.f32 %v718_v55  ;;  %v728_v3 = vadd.f32 %v2998_v1, %v2642_v45  ;;  %v722_v4 = vpop.f32.mrb[15].mxu0  ;;  %v5014_v55 = vpack.c.bf16 %v1079_v51, %v1076_v50  ;;  %v5025_v1 = vpack.c.bf16 %v1085_v60, %v1082_v59 }
 0x410   :  { %v4107_v8 = vpop.eup %4106  ;;  %v723_v9 = vadd.f32 %v2642_v45, %v722_v4  ;;  %v4997_v45 = vpack.c.bf16 %v1063_v34, %v1060_v33  ;;  %v1081_v4 = vld [vmem:[#allocation20 + $0x118] sm:$0xff] }
 0x411   :  { %v4109_v13 = vpop.eup %4108  ;;  %869 = vmatmul.mubr.f32.vlgmr.msra.gmra.mrb[8].mxu1 %v4107_v8  ;;  %3031 = vmatprep.mubr.f32.mxu0 %v4107_v8  ;;  %v1091_v8 = vld [vmem:[#allocation20 + $0x168] sm:$0xff] }
 0x412   :  { %4118 = vtanh.f32 %v723_v9  ;;  %3524 = vmatpush1.bf16.msra.mxu1 %v4965_v2  ;;  %3032 = vmatmul.mubr.f32.vlgmr.msra.gmra.mrb[16].mxu0 %v4109_v13  ;;  %v5036_v10 = vpack.c.bf16 %v1091_v8, %v1088_v7  ;;  %v5112_v8 = vld [vmem:[#allocation21] ss:$0 sm:$0xff] }
 0x413   :  { %4120 = vtanh.f32 %v728_v3  ;;  %874 = vmatprep.mubr.f32.mxu1 %v4610_v43  ;;  %3526 = vmatprep.subr.bf16.mxu1 %v4967_v5  ;;  %v1078_v3 = vld [vmem:[#allocation20 + $0x100] sm:$0xff] }
 0x414   :  { %v4111_v17 = vpop.eup %4110  ;;  %3555 = vmatpush3.bf16.msra.mxu0 %v4969_v12  ;;  %v5032_v9 = vpack.c.bf16 %v1081_v4, %v1078_v3 }
 0x415   :  { %v4113_v20 = vpop.eup %4112  ;;  %875 = vmatmul.mubr.f32.gmra.mrb[10].mxu1 %v4109_v13  ;;  %3034 = vmatprep.mubr.f32.mxu0 %v4111_v17  ;;  %v1087_v13 = vld [vmem:[#allocation20 + $0x148] sm:$0xff] }
 0x416   :  { %3528 = vmatpush1.bf16.msra.mxu1 %v4972_v0  ;;  %3035 = vmatmul.mubr.f32.gmra.mrb[18].mxu0 %v4113_v20  ;;  %v5041_v15 = vpack.c.bf16 %v1087_v13, %v1084_v11 }
 0x417   :  { %880 = vmatprep.mubr.f32.mxu1 %v4610_v43  ;;  %3530 = vmatprep.subr.bf16.mxu1 %v4976_v14 }
 0x418   :  { %v4115_v27 = vpop.eup %4114  ;;  %3556 = vmatprep.subr.bf16.mxu0 %v4611_v44 }
 0x419   :  { %v4117_v31 = vpop.eup %4116  ;;  %881 = vmatmul.mubr.f32.gmra.mrb[12].mxu1 %v4111_v17  ;;  %3037 = vmatprep.mubr.f32.mxu0 %v4115_v27  ;;  %v1090_v17 = vld [vmem:[#allocation20 + $0x160] sm:$0xff] }
 0x41a   :  { %3532 = vmatpush1.bf16.msra.mxu1 %v4980_v23  ;;  %3038 = vmatmul.mubr.f32.gmra.mrb[20].mxu0 %v4117_v31  ;;  %v5051_v19 = vpack.c.bf16 %v1093_v18, %v1090_v17 }
 0x41b   :  { %886 = vmatprep.mubr.f32.mxu1 %v4610_v43  ;;  %3534 = vmatprep.subr.bf16.mxu1 %v4984_v24 }
 0x41c   :  { %v4119_v38 = vpop.eup %4118  ;;  %3558 = vmatpush3.bf16.msra.mxu0 %v4987_v30 }
 0x41d   :  { %v4121_v41 = vpop.eup %4120  ;;  %887 = vmatmul.mubr.f32.gmra.mrb[14].mxu1 %v4113_v20  ;;  %3040 = vmatprep.mubr.f32.mxu0 %v4119_v38  ;;  %v789_v20 = vlaneseq }
 0x41e   :  { %3536 = vmatpush1.bf16.msra.mxu1 %v4990_v32  ;;  %3041 = vmatmul.mubr.f32.gmra.mrb[22].mxu0 %v4121_v41 }
 0x41f   :  { %892 = vmatprep.mubr.f32.mxu1 %v4610_v43  ;;  %3538 = vmatprep.subr.bf16.mxu1 %v4994_v35  ;;  %v790_v21 = vshrl.u32 %v789_v20, 7 }
 0x420   :  { %3559 = vmatprep.subr.bf16.mxu0 %v4611_v44  ;;  %3075 = vmatprep.mubr.msk.f32.mxu0 %vm4612_vm2, %v4610_v43 }
 0x421   :  { %893 = vmatmul.mubr.f32.gmra.mrb[16].mxu1 %v4115_v27  ;;  %3561 = vmatpush3.bf16.msra.mxu0 %v4997_v45  ;;  %v799_v22 = vsub.s32 2, %v790_v21  ;;  %v791_v51 = vsub.s32 0, %v790_v21  ;;  %v795_v52 = vsub.s32 1, %v790_v21 }
 0x422   :  { %3540 = vmatpush1.bf16.msra.mxu1 %v5000_v46  ;;  %898 = vmatprep.mubr.f32.mxu1 %v4610_v43 }
 0x423   :  { %3542 = vmatprep.subr.bf16.mxu1 %v5004_v49  ;;  %3562 = vmatprep.subr.bf16.mxu0 %v4611_v44  ;;  %v800_v26 = vrot.slane %v787_v25, %v799_v22  ;;  %v5106_v53 = vrot.slane %v787_v25, %v791_v51  ;;  %v5108_v57 = vrot.slane %v787_v25, %v795_v52 }
 0x425   :  { %899 = vmatmul.mubr.f32.gmra.mrb[18].mxu1 %v4117_v31  ;;  %3564 = vmatpush3.bf16.msra.mxu0 %v5010_v54 }
 0x426   :  { %3544 = vmatpush1.bf16.msra.mxu1 %v5014_v55  ;;  %904 = vmatprep.mubr.f32.mxu1 %v4610_v43 }
 0x427   :  { %3546 = vmatprep.subr.bf16.mxu1 %v5017_v58  ;;  %3565 = vmatprep.subr.bf16.mxu0 %v4611_v44 }
 0x429   :  { %905 = vmatmul.mubr.f32.gmra.mrb[20].mxu1 %v4119_v38  ;;  %3567 = vmatpush3.bf16.msra.mxu0 %v5021_v63 }
 0x42a   :  { %3548 = vmatpush1.bf16.msra.mxu1 %v5025_v1  ;;  %910 = vmatprep.mubr.f32.mxu1 %v4610_v43 }
 0x42b   :  { %3550 = vmatprep.subr.bf16.mxu1 %v5028_v6  ;;  %3568 = vmatprep.subr.bf16.mxu0 %v4611_v44 }
 0x42d   :  { %911 = vmatmul.mubr.f32.gmra.mrb[22].mxu1 %v4121_v41  ;;  %3570 = vmatpush3.bf16.msra.mxu0 %v5032_v9 }
 0x42e   :  { %3552 = vmatpush1.bf16.msra.mxu1 %v5036_v10  ;;  %1169 = vmatprep.mubr.f32.mxu1 %v4610_v43 }
 0x42f   :  { %3571 = vmatprep.subr.bf16.mxu0 %v4611_v44  ;;  %3578 = vmatprep.subr.bf16.mxu1 %v4960_v42 }
 0x431   :  { %1170 = vmatmul.mubr.f32.vlgmr.msra.gmra.mrb[8].mxu1 %v5045_v16  ;;  %3573 = vmatpush3.bf16.msra.mxu0 %v5041_v15 }
 0x432   :  { %3574 = vmatprep.subr.bf16.mxu0 %v4611_v44  ;;  %3580 = vmatpush1.bf16.msra.mxu1 %v4965_v2 }
 0x433   :  { %3582 = vmatprep.subr.bf16.mxu1 %v4967_v5  ;;  %1332 = vmatprep.mubr.f32.mxu1 %v4610_v43 }
 0x435   :  { %3576 = vmatpush3.bf16.msra.mxu0 %v5051_v19 }
 0x436   :  { %3609 = vmatprep.subr.bf16.mxu0 %v4611_v44  ;;  %3584 = vmatpush1.bf16.msra.mxu1 %v4972_v0 }
 0x437   :  { %3586 = vmatprep.subr.bf16.mxu1 %v4976_v14 }
 0x438   :  { %3076 = vmatmul.mubr.f32.vlgmr.msra.gmra.mrb[24].mxu0 %v5045_v16 }
 0x439   :  { %3611 = vmatpush3.bf16.msra.mxu0 %v4969_v12  ;;  %3110 = vmatprep.mubr.msk.f32.mxu0 %vm4612_vm2, %v4610_v43 }
 0x43a   :  { %3612 = vmatprep.subr.bf16.mxu0 %v4611_v44  ;;  %3588 = vmatpush1.bf16.msra.mxu1 %v4980_v23 }
 0x43b   :  { %3590 = vmatprep.subr.bf16.mxu1 %v4984_v24 }
 0x43d   :  { %3614 = vmatpush3.bf16.msra.mxu0 %v4987_v30 }
 0x43e   :  { %3615 = vmatprep.subr.bf16.mxu0 %v4611_v44  ;;  %3592 = vmatpush1.bf16.msra.mxu1 %v4990_v32 }
 0x43f   :  { %3594 = vmatprep.subr.bf16.mxu1 %v4994_v35 }
 0x441   :  { %3617 = vmatpush3.bf16.msra.mxu0 %v4997_v45 }
 0x442   :  { %3618 = vmatprep.subr.bf16.mxu0 %v4611_v44  ;;  %3596 = vmatpush1.bf16.msra.mxu1 %v5000_v46 }
 0x443   :  { %3598 = vmatprep.subr.bf16.mxu1 %v5004_v49 }
 0x445   :  { %3620 = vmatpush3.bf16.msra.mxu0 %v5010_v54 }
 0x446   :  { %3621 = vmatprep.subr.bf16.mxu0 %v4611_v44  ;;  %3600 = vmatpush1.bf16.msra.mxu1 %v5014_v55 }
 0x447   :  { %3602 = vmatprep.subr.bf16.mxu1 %v5017_v58 }
 0x449   :  { %3623 = vmatpush3.bf16.msra.mxu0 %v5021_v63 }
 0x44a   :  { %3624 = vmatprep.subr.bf16.mxu0 %v4611_v44  ;;  %3604 = vmatpush1.bf16.msra.mxu1 %v5025_v1 }
 0x44b   :  { %3606 = vmatprep.subr.bf16.mxu1 %v5028_v6 }
 0x44d   :  { %3626 = vmatpush3.bf16.msra.mxu0 %v5032_v9 }
 0x44e   :  { %3627 = vmatprep.subr.bf16.mxu0 %v4611_v44  ;;  %3608 = vmatpush1.bf16.msra.mxu1 %v5036_v10 }
 0x44f   :  { %3634 = vmatprep.subr.bf16.mxu1 %v4960_v42 }
 0x451   :  { %3629 = vmatpush3.bf16.msra.mxu0 %v5041_v15 }
 0x452   :  { %3630 = vmatprep.subr.bf16.mxu0 %v4611_v44 }
 0x455   :  { %3632 = vmatpush3.bf16.msra.mxu0 %v5051_v19 }
 0x456   :  { %3665 = vmatprep.subr.bf16.mxu0 %v4611_v44 }
 0x4e5   :  { %v3033_v27 = vpop.f32.mrb[16].mxu0 }
 0x4e6   :  { %v5092_v28 = vadd.f32 %v3033_v27, %v800_v26  ;;  %v983_v29 = vpop.f32.mrb[17].mxu0 }
 0x4e7   :  { %v984_v20 = vadd.f32 %v983_v29, %v800_v26 }
 0x4e9   :  { %v3036_v31 = vpop.f32.mrb[18].mxu0 }
 0x4ea   :  { %v5094_v33 = vadd.f32 %v3036_v31, %v800_v26  ;;  %v993_v34 = vpop.f32.mrb[19].mxu0 }
 0x4eb   :  { %v5096_v36 = vadd.f32 %v993_v34, %v800_v26 }
 0x4ed   :  { %v3039_v37 = vpop.f32.mrb[20].mxu0 }
 0x4ee   :  { %v5098_v38 = vadd.f32 %v3039_v37, %v800_v26  ;;  %v1003_v39 = vpop.f32.mrb[21].mxu0 }
 0x4ef   :  { %v5100_v40 = vadd.f32 %v1003_v39, %v800_v26 }
 0x4f1   :  { %v3042_v41 = vpop.f32.mrb[22].mxu0 }
 0x4f2   :  { %v5102_v47 = vadd.f32 %v3042_v41, %v800_v26  ;;  %v1013_v48 = vpop.f32.mrb[23].mxu0 }
 0x4f3   :  { %v5104_v50 = vadd.f32 %v1013_v48, %v800_v26 }
 0x504   :  { %v1171_v56 = vpop.f32.mrb[8].mxu1 }
 0x505   :  { %v4017_v59 = vadd.f32 %v1171_v56, %v5106_v53  ;;  %v1173_v60 = vpop.f32.mrb[9].mxu1 }
 0x506   :  { %v4018_v62 = vadd.f32 %v1173_v60, %v5108_v57 }
 0x507   :  { %v1247_v61 = vmul.f32 0.5, %v4017_v59 }
 0x508   :  { %v1252_v4 = vmul.f32 0.5, %v4018_v62 }
 0x509   :  { %4122 = vtanh.f32 %v1247_v61 }
 0x50a   :  { %4124 = vtanh.f32 %v1252_v4 }
 0x50b   :  { %v1242_v3 = vpop.f32.mrb[24].mxu0 }
 0x50c   :  { %v3077_v7 = vpop.f32.mrb[25].mxu0  ;;  %v1256_v17 = vadd.f32 %v5112_v8, %v1242_v3 }
 0x513   :  { %v4123_v11 = vpop.eup %4122 }
 0x514   :  { %v1249_v13 = vadd.f32 1.0, %v4123_v11  ;;  %v4125_v22 = vpop.eup %4124 }
 0x515   :  { %v1254_v27 = vadd.f32 1.0, %v4125_v22 }
 0x516   :  { %v1250_v18 = vmul.f32 0.5, %v1249_v13 }
 0x517   :  { %v1255_v31 = vmul.f32 0.5, %v1254_v27 }
 0x518   :  { %v1257_v21 = vmul.f32 %v1256_v17, %v1250_v18 }
 0x519   :  { %v1260_v34 = vsub.f32 1.0, %v1255_v31  ;;  %v1262_v39 = vmul.f32 %v1255_v31, %v5045_v16 }
 0x51a   :  { %v1258_v25 = vadd.f32 %v1257_v21, %v984_v20 }
 0x51c   :  { %4126 = vtanh.f32 %v1258_v25 }
 0x526   :  { %v4127_v37 = vpop.eup %4126 }
 0x527   :  { %v1261_v41 = vmul.f32 %v4127_v37, %v1260_v34 }
 0x529   :  { %v1263_v48 = vadd.f32 %v1262_v39, %v1261_v41 }
 0x52b   :  { %1333 = vmatmul.mubr.f32.vlgmr.msra.gmra.mrb[10].mxu1 %v1263_v48  ;;  %3111 = vmatmul.mubr.f32.vlgmr.msra.gmra.mrb[26].mxu0 %v1263_v48 }
 0x52c   :  { %3636 = vmatpush1.bf16.msra.mxu1 %v4965_v2  ;;  %3667 = vmatpush3.bf16.msra.mxu0 %v4969_v12 }
 0x52d   :  { %3638 = vmatprep.subr.bf16.mxu1 %v4967_v5  ;;  %3668 = vmatprep.subr.bf16.mxu0 %v4611_v44 }
 0x52e   :  { %1495 = vmatprep.mubr.f32.mxu1 %v4610_v43  ;;  %3145 = vmatprep.mubr.msk.f32.mxu0 %vm4612_vm2, %v4610_v43 }
 0x530   :  { %3640 = vmatpush1.bf16.msra.mxu1 %v4972_v0  ;;  %3670 = vmatpush3.bf16.msra.mxu0 %v4987_v30 }
 0x531   :  { %3642 = vmatprep.subr.bf16.mxu1 %v4976_v14  ;;  %3671 = vmatprep.subr.bf16.mxu0 %v4611_v44 }
 0x534   :  { %3644 = vmatpush1.bf16.msra.mxu1 %v4980_v23  ;;  %3673 = vmatpush3.bf16.msra.mxu0 %v4997_v45 }
 0x535   :  { %3646 = vmatprep.subr.bf16.mxu1 %v4984_v24  ;;  %3674 = vmatprep.subr.bf16.mxu0 %v4611_v44 }
 0x538   :  { %3648 = vmatpush1.bf16.msra.mxu1 %v4990_v32  ;;  %3676 = vmatpush3.bf16.msra.mxu0 %v5010_v54 }
 0x539   :  { %3650 = vmatprep.subr.bf16.mxu1 %v4994_v35  ;;  %3677 = vmatprep.subr.bf16.mxu0 %v4611_v44 }
 0x53c   :  { %3652 = vmatpush1.bf16.msra.mxu1 %v5000_v46  ;;  %3679 = vmatpush3.bf16.msra.mxu0 %v5021_v63 }
 0x53d   :  { %3654 = vmatprep.subr.bf16.mxu1 %v5004_v49  ;;  %3680 = vmatprep.subr.bf16.mxu0 %v4611_v44 }
 0x540   :  { %3656 = vmatpush1.bf16.msra.mxu1 %v5014_v55  ;;  %3682 = vmatpush3.bf16.msra.mxu0 %v5032_v9 }
 0x541   :  { %3658 = vmatprep.subr.bf16.mxu1 %v5017_v58  ;;  %3683 = vmatprep.subr.bf16.mxu0 %v4611_v44 }
 0x544   :  { %3660 = vmatpush1.bf16.msra.mxu1 %v5025_v1  ;;  %3685 = vmatpush3.bf16.msra.mxu0 %v5041_v15 }
 0x545   :  { %3662 = vmatprep.subr.bf16.mxu1 %v5028_v6  ;;  %3686 = vmatprep.subr.bf16.mxu0 %v4611_v44 }
 0x548   :  { %3664 = vmatpush1.bf16.msra.mxu1 %v5036_v10  ;;  %3688 = vmatpush3.bf16.msra.mxu0 %v5051_v19 }
 0x549   :  { %3690 = vmatprep.subr.bf16.mxu1 %v4960_v42  ;;  %3721 = vmatprep.subr.bf16.mxu0 %v4611_v44 }
 0x5fe   :  { %v1334_v16 = vpop.f32.mrb[10].mxu1  ;;  %v1405_v26 = vpop.f32.mrb[26].mxu0 }
 0x5ff   :  { %v4019_v29 = vadd.f32 %v1334_v16, %v5106_v53  ;;  %v1336_v51 = vpop.f32.mrb[11].mxu1  ;;  %v3112_v52 = vpop.f32.mrb[27].mxu0  ;;  %v1419_v4 = vadd.f32 %v5112_v8, %v1405_v26 }
 0x600   :  { %v4020_v59 = vadd.f32 %v1336_v51, %v5108_v57 }
 0x601   :  { %v1410_v56 = vmul.f32 0.5, %v4019_v29 }
 0x602   :  { %v1415_v60 = vmul.f32 0.5, %v4020_v59 }
 0x603   :  { %4128 = vtanh.f32 %v1410_v56 }
 0x604   :  { %4130 = vtanh.f32 %v1415_v60 }
 0x60d   :  { %v4129_v61 = vpop.eup %4128 }
 0x60e   :  { %v1412_v62 = vadd.f32 1.0, %v4129_v61  ;;  %v4131_v11 = vpop.eup %4130 }
 0x60f   :  { %v1417_v17 = vadd.f32 1.0, %v4131_v11 }
 0x610   :  { %v1413_v3 = vmul.f32 0.5, %v1412_v62 }
 0x611   :  { %v1418_v18 = vmul.f32 0.5, %v1417_v17 }
 0x612   :  { %v1420_v7 = vmul.f32 %v1419_v4, %v1413_v3 }
 0x613   :  { %v1423_v20 = vsub.f32 1.0, %v1418_v18  ;;  %v1425_v25 = vmul.f32 %v1418_v18, %v1263_v48 }
 0x614   :  { %v1421_v13 = vadd.f32 %v1420_v7, %v5092_v28 }
 0x616   :  { %4132 = vtanh.f32 %v1421_v13 }
 0x620   :  { %v4133_v21 = vpop.eup %4132 }
 0x621   :  { %v1424_v22 = vmul.f32 %v4133_v21, %v1423_v20 }
 0x623   :  { %v1426_v27 = vadd.f32 %v1425_v25, %v1424_v22 }
 0x625   :  { %1496 = vmatmul.mubr.f32.vlgmr.msra.gmra.mrb[12].mxu1 %v1426_v27  ;;  %3146 = vmatmul.mubr.f32.vlgmr.msra.gmra.mrb[28].mxu0 %v1426_v27 }
 0x626   :  { %3692 = vmatpush1.bf16.msra.mxu1 %v4965_v2  ;;  %3723 = vmatpush3.bf16.msra.mxu0 %v4969_v12 }
 0x627   :  { %3694 = vmatprep.subr.bf16.mxu1 %v4967_v5  ;;  %3724 = vmatprep.subr.bf16.mxu0 %v4611_v44 }
 0x628   :  { %1658 = vmatprep.mubr.f32.mxu1 %v4610_v43  ;;  %3180 = vmatprep.mubr.msk.f32.mxu0 %vm4612_vm2, %v4610_v43 }
 0x62a   :  { %3696 = vmatpush1.bf16.msra.mxu1 %v4972_v0  ;;  %3726 = vmatpush3.bf16.msra.mxu0 %v4987_v30 }
 0x62b   :  { %3698 = vmatprep.subr.bf16.mxu1 %v4976_v14  ;;  %3727 = vmatprep.subr.bf16.mxu0 %v4611_v44 }
 0x62e   :  { %3700 = vmatpush1.bf16.msra.mxu1 %v4980_v23  ;;  %3729 = vmatpush3.bf16.msra.mxu0 %v4997_v45 }
 0x62f   :  { %3702 = vmatprep.subr.bf16.mxu1 %v4984_v24  ;;  %3730 = vmatprep.subr.bf16.mxu0 %v4611_v44 }
 0x632   :  { %3704 = vmatpush1.bf16.msra.mxu1 %v4990_v32  ;;  %3732 = vmatpush3.bf16.msra.mxu0 %v5010_v54 }
 0x633   :  { %3706 = vmatprep.subr.bf16.mxu1 %v4994_v35  ;;  %3733 = vmatprep.subr.bf16.mxu0 %v4611_v44 }
 0x636   :  { %3708 = vmatpush1.bf16.msra.mxu1 %v5000_v46  ;;  %3735 = vmatpush3.bf16.msra.mxu0 %v5021_v63 }
 0x637   :  { %3710 = vmatprep.subr.bf16.mxu1 %v5004_v49  ;;  %3736 = vmatprep.subr.bf16.mxu0 %v4611_v44 }
 0x63a   :  { %3712 = vmatpush1.bf16.msra.mxu1 %v5014_v55  ;;  %3738 = vmatpush3.bf16.msra.mxu0 %v5032_v9 }
 0x63b   :  { %3714 = vmatprep.subr.bf16.mxu1 %v5017_v58  ;;  %3739 = vmatprep.subr.bf16.mxu0 %v4611_v44 }
 0x63e   :  { %3716 = vmatpush1.bf16.msra.mxu1 %v5025_v1  ;;  %3741 = vmatpush3.bf16.msra.mxu0 %v5041_v15 }
 0x63f   :  { %3718 = vmatprep.subr.bf16.mxu1 %v5028_v6  ;;  %3742 = vmatprep.subr.bf16.mxu0 %v4611_v44 }
 0x642   :  { %3720 = vmatpush1.bf16.msra.mxu1 %v5036_v10  ;;  %3744 = vmatpush3.bf16.msra.mxu0 %v5051_v19 }
 0x643   :  { %3746 = vmatprep.subr.bf16.mxu1 %v4960_v42  ;;  %3777 = vmatprep.subr.bf16.mxu0 %v4611_v44 }
 0x6f8   :  { %v1497_v28 = vpop.f32.mrb[12].mxu1  ;;  %v1568_v31 = vpop.f32.mrb[28].mxu0 }
 0x6f9   :  { %v4021_v34 = vadd.f32 %v1497_v28, %v5106_v53  ;;  %v1499_v37 = vpop.f32.mrb[13].mxu1  ;;  %v3147_v39 = vpop.f32.mrb[29].mxu0  ;;  %v1582_v52 = vadd.f32 %v5112_v8, %v1568_v31 }
 0x6fa   :  { %v4022_v48 = vadd.f32 %v1499_v37, %v5108_v57 }
 0x6fb   :  { %v1573_v41 = vmul.f32 0.5, %v4021_v34 }
 0x6fc   :  { %v1578_v16 = vmul.f32 0.5, %v4022_v48 }
 0x6fd   :  { %4134 = vtanh.f32 %v1573_v41 }
 0x6fe   :  { %4136 = vtanh.f32 %v1578_v16 }
 0x707   :  { %v4135_v26 = vpop.eup %4134 }
 0x708   :  { %v1575_v29 = vadd.f32 1.0, %v4135_v26  ;;  %v4137_v59 = vpop.eup %4136 }
 0x709   :  { %v1580_v61 = vadd.f32 1.0, %v4137_v59 }
 0x70a   :  { %v1576_v51 = vmul.f32 0.5, %v1575_v29 }
 0x70b   :  { %v1581_v62 = vmul.f32 0.5, %v1580_v61 }
 0x70c   :  { %v1583_v56 = vmul.f32 %v1582_v52, %v1576_v51 }
 0x70d   :  { %v1586_v3 = vsub.f32 1.0, %v1581_v62  ;;  %v1588_v11 = vmul.f32 %v1581_v62, %v1426_v27 }
 0x70e   :  { %v1584_v60 = vadd.f32 %v1583_v56, %v5096_v36 }
 0x710   :  { %4138 = vtanh.f32 %v1584_v60 }
 0x71a   :  { %v4139_v4 = vpop.eup %4138 }
 0x71b   :  { %v1587_v7 = vmul.f32 %v4139_v4, %v1586_v3 }
 0x71d   :  { %v1589_v13 = vadd.f32 %v1588_v11, %v1587_v7 }
 0x71f   :  { %1659 = vmatmul.mubr.f32.vlgmr.msra.gmra.mrb[14].mxu1 %v1589_v13  ;;  %3181 = vmatmul.mubr.f32.vlgmr.msra.gmra.mrb[30].mxu0 %v1589_v13 }
 0x720   :  { %3748 = vmatpush1.bf16.msra.mxu1 %v4965_v2  ;;  %3779 = vmatpush3.bf16.msra.mxu0 %v4969_v12 }
 0x721   :  { %3750 = vmatprep.subr.bf16.mxu1 %v4967_v5  ;;  %3780 = vmatprep.subr.bf16.mxu0 %v4611_v44 }
 0x722   :  { %1821 = vmatprep.mubr.f32.mxu1 %v4610_v43  ;;  %3215 = vmatprep.mubr.msk.f32.mxu0 %vm4612_vm2, %v4610_v43 }
 0x724   :  { %3752 = vmatpush1.bf16.msra.mxu1 %v4972_v0  ;;  %3782 = vmatpush3.bf16.msra.mxu0 %v4987_v30 }
 0x725   :  { %3754 = vmatprep.subr.bf16.mxu1 %v4976_v14  ;;  %3783 = vmatprep.subr.bf16.mxu0 %v4611_v44 }
 0x728   :  { %3756 = vmatpush1.bf16.msra.mxu1 %v4980_v23  ;;  %3785 = vmatpush3.bf16.msra.mxu0 %v4997_v45 }
 0x729   :  { %3758 = vmatprep.subr.bf16.mxu1 %v4984_v24  ;;  %3786 = vmatprep.subr.bf16.mxu0 %v4611_v44 }
 0x72c   :  { %3760 = vmatpush1.bf16.msra.mxu1 %v4990_v32  ;;  %3788 = vmatpush3.bf16.msra.mxu0 %v5010_v54 }
 0x72d   :  { %3762 = vmatprep.subr.bf16.mxu1 %v4994_v35  ;;  %3789 = vmatprep.subr.bf16.mxu0 %v4611_v44 }
 0x730   :  { %3764 = vmatpush1.bf16.msra.mxu1 %v5000_v46  ;;  %3791 = vmatpush3.bf16.msra.mxu0 %v5021_v63 }
 0x731   :  { %3766 = vmatprep.subr.bf16.mxu1 %v5004_v49  ;;  %3792 = vmatprep.subr.bf16.mxu0 %v4611_v44 }
 0x734   :  { %3768 = vmatpush1.bf16.msra.mxu1 %v5014_v55  ;;  %3794 = vmatpush3.bf16.msra.mxu0 %v5032_v9 }
 0x735   :  { %3770 = vmatprep.subr.bf16.mxu1 %v5017_v58  ;;  %3795 = vmatprep.subr.bf16.mxu0 %v4611_v44 }
 0x738   :  { %3772 = vmatpush1.bf16.msra.mxu1 %v5025_v1  ;;  %3797 = vmatpush3.bf16.msra.mxu0 %v5041_v15 }
 0x739   :  { %3774 = vmatprep.subr.bf16.mxu1 %v5028_v6  ;;  %3798 = vmatprep.subr.bf16.mxu0 %v4611_v44 }
 0x73c   :  { %3776 = vmatpush1.bf16.msra.mxu1 %v5036_v10  ;;  %3800 = vmatpush3.bf16.msra.mxu0 %v5051_v19 }
 0x73d   :  { %3802 = vmatprep.subr.bf16.mxu1 %v4960_v42  ;;  %3833 = vmatprep.subr.bf16.mxu0 %v4611_v44 }
 0x7f2   :  { %v1660_v36 = vpop.f32.mrb[14].mxu1  ;;  %v1731_v17 = vpop.f32.mrb[30].mxu0 }
 0x7f3   :  { %v4023_v18 = vadd.f32 %v1660_v36, %v5106_v53  ;;  %v1662_v20 = vpop.f32.mrb[15].mxu1  ;;  %v3182_v21 = vpop.f32.mrb[31].mxu0  ;;  %v1745_v37 = vadd.f32 %v5112_v8, %v1731_v17 }
 0x7f4   :  { %v4024_v25 = vadd.f32 %v1662_v20, %v5108_v57 }
 0x7f5   :  { %v1736_v22 = vmul.f32 0.5, %v4023_v18 }
 0x7f6   :  { %v1741_v27 = vmul.f32 0.5, %v4024_v25 }
 0x7f7   :  { %4140 = vtanh.f32 %v1736_v22 }
 0x7f8   :  { %4142 = vtanh.f32 %v1741_v27 }
 0x801   :  { %v4141_v28 = vpop.eup %4140 }
 0x802   :  { %v1738_v31 = vadd.f32 1.0, %v4141_v28  ;;  %v4143_v41 = vpop.eup %4142 }
 0x803   :  { %v1743_v16 = vadd.f32 1.0, %v4143_v41 }
 0x804   :  { %v1739_v34 = vmul.f32 0.5, %v1738_v31 }
 0x805   :  { %v1744_v26 = vmul.f32 0.5, %v1743_v16 }
 0x806   :  { %v1746_v39 = vmul.f32 %v1745_v37, %v1739_v34 }
 0x807   :  { %v1749_v29 = vsub.f32 1.0, %v1744_v26  ;;  %v1751_v56 = vmul.f32 %v1744_v26, %v1589_v13 }
 0x808   :  { %v1747_v48 = vadd.f32 %v1746_v39, %v5094_v33 }
 0x80a   :  { %4144 = vtanh.f32 %v1747_v48 }
 0x814   :  { %v4145_v51 = vpop.eup %4144 }
 0x815   :  { %v1750_v52 = vmul.f32 %v4145_v51, %v1749_v29 }
 0x817   :  { %v1752_v59 = vadd.f32 %v1751_v56, %v1750_v52 }
 0x819   :  { %1822 = vmatmul.mubr.f32.vlgmr.msra.gmra.mrb[16].mxu1 %v1752_v59  ;;  %3216 = vmatmul.mubr.f32.vlgmr.msra.gmra.mrb[32].mxu0 %v1752_v59 }
 0x81a   :  { %3804 = vmatpush1.bf16.msra.mxu1 %v4965_v2  ;;  %3835 = vmatpush3.bf16.msra.mxu0 %v4969_v12 }
 0x81b   :  { %3806 = vmatprep.subr.bf16.mxu1 %v4967_v5  ;;  %3836 = vmatprep.subr.bf16.mxu0 %v4611_v44 }
 0x81c   :  { %1984 = vmatprep.mubr.f32.mxu1 %v4610_v43  ;;  %3250 = vmatprep.mubr.msk.f32.mxu0 %vm4612_vm2, %v4610_v43 }
 0x81e   :  { %3808 = vmatpush1.bf16.msra.mxu1 %v4972_v0  ;;  %3838 = vmatpush3.bf16.msra.mxu0 %v4987_v30 }
 0x81f   :  { %3810 = vmatprep.subr.bf16.mxu1 %v4976_v14  ;;  %3839 = vmatprep.subr.bf16.mxu0 %v4611_v44 }
 0x822   :  { %3812 = vmatpush1.bf16.msra.mxu1 %v4980_v23  ;;  %3841 = vmatpush3.bf16.msra.mxu0 %v4997_v45 }
 0x823   :  { %3814 = vmatprep.subr.bf16.mxu1 %v4984_v24  ;;  %3842 = vmatprep.subr.bf16.mxu0 %v4611_v44 }
 0x826   :  { %3816 = vmatpush1.bf16.msra.mxu1 %v4990_v32  ;;  %3844 = vmatpush3.bf16.msra.mxu0 %v5010_v54 }
 0x827   :  { %3818 = vmatprep.subr.bf16.mxu1 %v4994_v35  ;;  %3845 = vmatprep.subr.bf16.mxu0 %v4611_v44 }
 0x82a   :  { %3820 = vmatpush1.bf16.msra.mxu1 %v5000_v46  ;;  %3847 = vmatpush3.bf16.msra.mxu0 %v5021_v63 }
 0x82b   :  { %3822 = vmatprep.subr.bf16.mxu1 %v5004_v49  ;;  %3848 = vmatprep.subr.bf16.mxu0 %v4611_v44 }
 0x82e   :  { %3824 = vmatpush1.bf16.msra.mxu1 %v5014_v55  ;;  %3850 = vmatpush3.bf16.msra.mxu0 %v5032_v9 }
 0x82f   :  { %3826 = vmatprep.subr.bf16.mxu1 %v5017_v58  ;;  %3851 = vmatprep.subr.bf16.mxu0 %v4611_v44 }
 0x832   :  { %3828 = vmatpush1.bf16.msra.mxu1 %v5025_v1  ;;  %3853 = vmatpush3.bf16.msra.mxu0 %v5041_v15 }
 0x833   :  { %3830 = vmatprep.subr.bf16.mxu1 %v5028_v6  ;;  %3854 = vmatprep.subr.bf16.mxu0 %v4611_v44 }
 0x836   :  { %3832 = vmatpush1.bf16.msra.mxu1 %v5036_v10  ;;  %3856 = vmatpush3.bf16.msra.mxu0 %v5051_v19 }
 0x837   :  { %3858 = vmatprep.subr.bf16.mxu1 %v4960_v42  ;;  %3889 = vmatprep.subr.bf16.mxu0 %v4611_v44 }
 0x8ec   :  { %v1823_v33 = vpop.f32.mrb[16].mxu1  ;;  %v1894_v60 = vpop.f32.mrb[32].mxu0 }
 0x8ed   :  { %v4025_v61 = vadd.f32 %v1823_v33, %v5106_v53  ;;  %v1825_v62 = vpop.f32.mrb[17].mxu1  ;;  %v3217_v3 = vpop.f32.mrb[33].mxu0  ;;  %v1908_v18 = vadd.f32 %v5112_v8, %v1894_v60 }
 0x8ee   :  { %v4026_v7 = vadd.f32 %v1825_v62, %v5108_v57 }
 0x8ef   :  { %v1899_v4 = vmul.f32 0.5, %v4025_v61 }
 0x8f0   :  { %v1904_v11 = vmul.f32 0.5, %v4026_v7 }
 0x8f1   :  { %4146 = vtanh.f32 %v1899_v4 }
 0x8f2   :  { %4148 = vtanh.f32 %v1904_v11 }
 0x8fb   :  { %v4147_v13 = vpop.eup %4146 }
 0x8fc   :  { %v1901_v36 = vadd.f32 1.0, %v4147_v13  ;;  %v4149_v21 = vpop.eup %4148 }
 0x8fd   :  { %v1906_v25 = vadd.f32 1.0, %v4149_v21 }
 0x8fe   :  { %v1902_v17 = vmul.f32 0.5, %v1901_v36 }
 0x8ff   :  { %v1907_v27 = vmul.f32 0.5, %v1906_v25  ;;  %v2410_v25 = vld [vmem:[#allocation23 + $0x28] sm:$0xff] }
 0x900   :  { %v1909_v20 = vmul.f32 %v1908_v18, %v1902_v17  ;;  %v2407_v18 = vld [vmem:[#allocation23 + $0x10] sm:$0xff] }
 0x901   :  { %v1912_v28 = vsub.f32 1.0, %v1907_v27  ;;  %v1914_v37 = vmul.f32 %v1907_v27, %v1752_v59 }
 0x902   :  { %v1910_v22 = vadd.f32 %v1909_v20, %v5100_v40  ;;  %v2408_v20 = vld [vmem:[#allocation23 + $0x18] sm:$0xff] }
 0x903   :  { %v3973_v21 = vpack.c.bf16 %v2408_v20, %v2407_v18  ;;  %v2511_v20 = vld [vmem:[#allocation26 + $0x60] sm:$0xff] }
 0x904   :  { %4150 = vtanh.f32 %v1910_v22  ;;  %v2409_v22 = vld [vmem:[#allocation23 + $0x20] sm:$0xff] }
 0x905   :  { %v3976_v27 = vpack.c.bf16 %v2410_v25, %v2409_v22  ;;  %v2514_v22 = vld [vmem:[#allocation26 + $0x78] sm:$0xff] }
 0x90e   :  { %v4151_v31 = vpop.eup %4150 }
 0x90f   :  { %v1913_v34 = vmul.f32 %v4151_v31, %v1912_v28  ;;  %v2411_v28 = vld [vmem:[#allocation23 + $0x30] sm:$0xff] }
 0x911   :  { %v1915_v39 = vadd.f32 %v1914_v37, %v1913_v34  ;;  %v2413_v34 = vld [vmem:[#allocation23 + $0x40] sm:$0xff]  ;;  %v2414_v37 = vld [vmem:[#allocation23 + $0x48] sm:$0xff] }
 0x913   :  { %1985 = vmatmul.mubr.f32.vlgmr.msra.gmra.mrb[18].mxu1 %v1915_v39  ;;  %3251 = vmatmul.mubr.f32.vlgmr.msra.gmra.mrb[34].mxu0 %v1915_v39 }
 0x914   :  { %3860 = vmatpush1.bf16.msra.mxu1 %v4965_v2  ;;  %3891 = vmatpush3.bf16.msra.mxu0 %v4969_v12 }
 0x915   :  { %3862 = vmatprep.subr.bf16.mxu1 %v4967_v5  ;;  %3892 = vmatprep.subr.bf16.mxu0 %v4611_v44 }
 0x916   :  { %2147 = vmatprep.mubr.f32.mxu1 %v4610_v43  ;;  %3285 = vmatprep.mubr.msk.f32.mxu0 %vm4612_vm2, %v4610_v43 }
 0x918   :  { %3864 = vmatpush1.bf16.msra.mxu1 %v4972_v0  ;;  %3894 = vmatpush3.bf16.msra.mxu0 %v4987_v30 }
 0x919   :  { %3866 = vmatprep.subr.bf16.mxu1 %v4976_v14  ;;  %3895 = vmatprep.subr.bf16.mxu0 %v4611_v44 }
 0x91c   :  { %3868 = vmatpush1.bf16.msra.mxu1 %v4980_v23  ;;  %3897 = vmatpush3.bf16.msra.mxu0 %v4997_v45 }
 0x91d   :  { %3870 = vmatprep.subr.bf16.mxu1 %v4984_v24  ;;  %3898 = vmatprep.subr.bf16.mxu0 %v4611_v44 }
 0x920   :  { %3872 = vmatpush1.bf16.msra.mxu1 %v4990_v32  ;;  %3900 = vmatpush3.bf16.msra.mxu0 %v5010_v54 }
 0x921   :  { %3874 = vmatprep.subr.bf16.mxu1 %v4994_v35  ;;  %3901 = vmatprep.subr.bf16.mxu0 %v4611_v44 }
 0x924   :  { %3876 = vmatpush1.bf16.msra.mxu1 %v5000_v46  ;;  %3903 = vmatpush3.bf16.msra.mxu0 %v5021_v63 }
 0x925   :  { %3878 = vmatprep.subr.bf16.mxu1 %v5004_v49  ;;  %3904 = vmatprep.subr.bf16.mxu0 %v4611_v44 }
 0x928   :  { %3880 = vmatpush1.bf16.msra.mxu1 %v5014_v55  ;;  %3906 = vmatpush3.bf16.msra.mxu0 %v5032_v9 }
 0x929   :  { %3882 = vmatprep.subr.bf16.mxu1 %v5017_v58  ;;  %3907 = vmatprep.subr.bf16.mxu0 %v4611_v44 }
 0x92c   :  { %3884 = vmatpush1.bf16.msra.mxu1 %v5025_v1  ;;  %3909 = vmatpush3.bf16.msra.mxu0 %v5041_v15 }
 0x92d   :  { %3886 = vmatprep.subr.bf16.mxu1 %v5028_v6  ;;  %3910 = vmatprep.subr.bf16.mxu0 %v4611_v44 }
 0x930   :  { %3888 = vmatpush1.bf16.msra.mxu1 %v5036_v10  ;;  %3912 = vmatpush3.bf16.msra.mxu0 %v5051_v19 }
 0x931   :  { %3914 = vmatprep.subr.bf16.mxu1 %v4960_v42  ;;  %3945 = vmatprep.subr.bf16.mxu0 %v4611_v44 }
 0x9e6   :  { %v1986_v40 = vpop.f32.mrb[18].mxu1  ;;  %v2057_v41 = vpop.f32.mrb[34].mxu0 }
 0x9e7   :  { %v4027_v48 = vadd.f32 %v1986_v40, %v5106_v53  ;;  %v1988_v16 = vpop.f32.mrb[19].mxu1  ;;  %v3252_v26 = vpop.f32.mrb[35].mxu0  ;;  %v2071_v60 = vadd.f32 %v5112_v8, %v2057_v41  ;;  %v2415_v40 = vld [vmem:[#allocation23 + $0x50] sm:$0xff]  ;;  %v2416_v41 = vld [vmem:[#allocation23 + $0x58] sm:$0xff] }
 0x9e8   :  { %v4028_v51 = vadd.f32 %v1988_v16, %v5108_v57  ;;  %v2417_v16 = vld [vmem:[#allocation23 + $0x60] sm:$0xff]  ;;  %v2418_v26 = vld [vmem:[#allocation23 + $0x68] sm:$0xff] }
 0x9e9   :  { %v2062_v29 = vmul.f32 0.5, %v4027_v48  ;;  %v3985_v48 = vpack.c.bf16 %v2416_v41, %v2415_v40 }
 0x9ea   :  { %v2067_v52 = vmul.f32 0.5, %v4028_v51  ;;  %v2419_v51 = vld [vmem:[#allocation23 + $0x70] sm:$0xff] }
 0x9eb   :  { %4152 = vtanh.f32 %v2062_v29  ;;  %v3988_v29 = vpack.c.bf16 %v2418_v26, %v2417_v16 }
 0x9ec   :  { %4154 = vtanh.f32 %v2067_v52  ;;  %v2420_v52 = vld [vmem:[#allocation23 + $0x78] sm:$0xff] }
 0x9f5   :  { %v4153_v56 = vpop.eup %4152 }
 0x9f6   :  { %v2064_v59 = vadd.f32 1.0, %v4153_v56  ;;  %v4155_v61 = vpop.eup %4154  ;;  %v3991_v56 = vpack.c.bf16 %v2420_v52, %v2419_v51 }
 0x9f7   :  { %v2069_v3 = vadd.f32 1.0, %v4155_v61  ;;  %v2502_v61 = vld [vmem:[#allocation26 + $0x18] sm:$0xff] }
 0x9f8   :  { %v2065_v33 = vmul.f32 0.5, %v2064_v59  ;;  %v2499_v59 = vld [vmem:[#allocation26] sm:$0xff] }
 0x9f9   :  { %v2070_v4 = vmul.f32 0.5, %v2069_v3  ;;  %v2503_v3 = vld [vmem:[#allocation26 + $0x20] sm:$0xff] }
 0x9fa   :  { %v2072_v42 = vmul.f32 %v2071_v60, %v2065_v33  ;;  %v2500_v33 = vld [vmem:[#allocation26 + $0x8] sm:$0xff]  ;;  %v2501_v60 = vld [vmem:[#allocation26 + $0x10] sm:$0xff] }
 0x9fb   :  { %v2075_v7 = vsub.f32 1.0, %v2070_v4  ;;  %v2077_v36 = vmul.f32 %v2070_v4, %v1915_v39  ;;  %v3982_v39 = vpack.c.bf16 %v2414_v37, %v2413_v34  ;;  %v2504_v4 = vld [vmem:[#allocation26 + $0x28] sm:$0xff] }
 0x9fc   :  { %v2073_v62 = vadd.f32 %v2072_v42, %v5098_v38  ;;  %v2406_v38 = vld [vmem:[#allocation23 + $0x8] sm:$0xff]  ;;  %v3994_v42 = vpack.c.bf16 %v2500_v33, %v2499_v59 }
 0x9fe   :  { %4156 = vtanh.f32 %v2073_v62  ;;  %v3997_v62 = vpack.c.bf16 %v2502_v61, %v2501_v60 }
 0xa08   :  { %v4157_v11 = vpop.eup %4156 }
 0xa09   :  { %v2076_v13 = vmul.f32 %v4157_v11, %v2075_v7  ;;  %v4000_v7 = vpack.c.bf16 %v2504_v4, %v2503_v3  ;;  %v2505_v11 = vld [vmem:[#allocation26 + $0x30] sm:$0xff] }
 0xa0b   :  { %v2078_v17 = vadd.f32 %v2077_v36, %v2076_v13  ;;  %v2506_v13 = vld [vmem:[#allocation26 + $0x38] sm:$0xff] }
 0xa0c   :  { %v4003_v36 = vpack.c.bf16 %v2506_v13, %v2505_v11 }
 0xa0d   :  { %2148 = vmatmul.mubr.f32.vlgmr.msra.gmra.mrb[20].mxu1 %v2078_v17  ;;  %3286 = vmatmul.mubr.f32.vlgmr.msra.gmra.mrb[36].mxu0 %v2078_v17 }
 0xa0e   :  { %3916 = vmatpush1.bf16.msra.mxu1 %v4965_v2  ;;  %3947 = vmatpush3.bf16.msra.mxu0 %v4969_v12 }
 0xa0f   :  { %3918 = vmatprep.subr.bf16.mxu1 %v4967_v5  ;;  %3948 = vmatprep.subr.bf16.mxu0 %v4611_v44 }
 0xa10   :  { %2310 = vmatprep.mubr.f32.mxu1 %v4610_v43  ;;  %3320 = vmatprep.mubr.msk.f32.mxu0 %vm4612_vm2, %v4610_v43 }
 0xa12   :  { %3920 = vmatpush1.bf16.msra.mxu1 %v4972_v0  ;;  %3950 = vmatpush3.bf16.msra.mxu0 %v4987_v30 }
 0xa13   :  { %3922 = vmatprep.subr.bf16.mxu1 %v4976_v14  ;;  %3951 = vmatprep.subr.bf16.mxu0 %v4611_v44 }
 0xa16   :  { %3924 = vmatpush1.bf16.msra.mxu1 %v4980_v23  ;;  %3953 = vmatpush3.bf16.msra.mxu0 %v4997_v45 }
 0xa17   :  { %3926 = vmatprep.subr.bf16.mxu1 %v4984_v24  ;;  %3954 = vmatprep.subr.bf16.mxu0 %v4611_v44 }
 0xa1a   :  { %3928 = vmatpush1.bf16.msra.mxu1 %v4990_v32  ;;  %3956 = vmatpush3.bf16.msra.mxu0 %v5010_v54 }
 0xa1b   :  { %3930 = vmatprep.subr.bf16.mxu1 %v4994_v35  ;;  %3957 = vmatprep.subr.bf16.mxu0 %v4611_v44 }
 0xa1e   :  { %3932 = vmatpush1.bf16.msra.mxu1 %v5000_v46  ;;  %3959 = vmatpush3.bf16.msra.mxu0 %v5021_v63 }
 0xa1f   :  { %3934 = vmatprep.subr.bf16.mxu1 %v5004_v49  ;;  %3960 = vmatprep.subr.bf16.mxu0 %v4611_v44 }
 0xa22   :  { %3936 = vmatpush1.bf16.msra.mxu1 %v5014_v55  ;;  %3962 = vmatpush3.bf16.msra.mxu0 %v5032_v9 }
 0xa23   :  { %3938 = vmatprep.subr.bf16.mxu1 %v5017_v58  ;;  %3963 = vmatprep.subr.bf16.mxu0 %v4611_v44 }
 0xa26   :  { %3940 = vmatpush1.bf16.msra.mxu1 %v5025_v1  ;;  %3965 = vmatpush3.bf16.msra.mxu0 %v5041_v15 }
 0xa27   :  { %3942 = vmatprep.subr.bf16.mxu1 %v5028_v6  ;;  %3966 = vmatprep.subr.bf16.mxu0 %v4611_v44 }
 0xa2a   :  { %3944 = vmatpush1.bf16.msra.mxu1 %v5036_v10  ;;  %3968 = vmatpush3.bf16.msra.mxu0 %v5051_v19  ;;  %v2405_v19 = vld [vmem:[#allocation23] sm:$0xff] }
 0xa2b   :  { %3969 = vmatprep.subr.bf16.mxu1 %v4611_v44  ;;  %3993 = vmatprep.subr.bf16.mxu0 %v4611_v44 }
 0xae0   :  { %v2149_v2 = vpop.f32.mrb[20].mxu1  ;;  %v2220_v5 = vpop.f32.mrb[36].mxu0 }
 0xae1   :  { %v4029_v12 = vadd.f32 %v2149_v2, %v5106_v53  ;;  %v2151_v0 = vpop.f32.mrb[21].mxu1  ;;  %v3287_v14 = vpop.f32.mrb[37].mxu0  ;;  %v2234_v46 = vadd.f32 %v5112_v8, %v2220_v5  ;;  %v2508_v2 = vld [vmem:[#allocation26 + $0x48] sm:$0xff] }
 0xae2   :  { %v4030_v24 = vadd.f32 %v2151_v0, %v5108_v57 }
 0xae3   :  { %v2225_v23 = vmul.f32 0.5, %v4029_v12 }
 0xae4   :  { %v2230_v30 = vmul.f32 0.5, %v4030_v24 }
 0xae5   :  { %4158 = vtanh.f32 %v2225_v23 }
 0xae6   :  { %4160 = vtanh.f32 %v2230_v30 }
 0xaef   :  { %v4159_v32 = vpop.eup %4158 }
 0xaf0   :  { %v2227_v35 = vadd.f32 1.0, %v4159_v32  ;;  %v4161_v54 = vpop.eup %4160 }
 0xaf1   :  { %v2232_v58 = vadd.f32 1.0, %v4161_v54 }
 0xaf2   :  { %v2228_v45 = vmul.f32 0.5, %v2227_v35 }
 0xaf3   :  { %v2233_v63 = vmul.f32 0.5, %v2232_v58 }
 0xaf4   :  { %v2235_v49 = vmul.f32 %v2234_v46, %v2228_v45 }
 0xaf5   :  { %v2238_v1 = vsub.f32 1.0, %v2233_v63  ;;  %v2240_v10 = vmul.f32 %v2233_v63, %v2078_v17  ;;  %v2507_v17 = vld [vmem:[#allocation26 + $0x40] sm:$0xff] }
 0xaf6   :  { %v2236_v55 = vadd.f32 %v2235_v49, %v5104_v50  ;;  %v3970_v50 = vpack.c.bf16 %v2406_v38, %v2405_v19  ;;  %v4006_v5 = vpack.c.bf16 %v2508_v2, %v2507_v17  ;;  %v2509_v38 = vld [vmem:[#allocation26 + $0x50] sm:$0xff] }
 0xaf8   :  { %4162 = vtanh.f32 %v2236_v55 }
 0xb02   :  { %v4163_v6 = vpop.eup %4162 }
 0xb03   :  { %v2239_v9 = vmul.f32 %v4163_v6, %v2238_v1 }
 0xb05   :  { %v5350_v15 = vadd.f32 %v2240_v10, %v2239_v9 }
 0xb07   :  { %2311 = vmatmul.mubr.f32.vlgmr.msra.gmra.mrb[22].mxu1 %v5350_v15  ;;  %3321 = vmatmul.mubr.f32.vlgmr.msra.gmra.mrb[38].mxu0 %v5350_v15 }
 0xb08   :  { %3355 = vmatprep.mubr.msk.f32.mxu1 %vm4612_vm2, %v4610_v43  ;;  %3390 = vmatprep.mubr.msk.f32.mxu0 %vm4612_vm2, %v4610_v43  ;;  %v2412_v43 = vld [vmem:[#allocation23 + $0x38] sm:$0xff] }
 0xb09   :  { %3971 = vmatpush3.bf16.msra.mxu1 %v3970_v50  ;;  %v3979_v31 = vpack.c.bf16 %v2412_v43, %v2411_v28  ;;  %3995 = vmatpush3.bf16.msra.mxu0 %v3994_v42  ;;  %v2510_v50 = vld [vmem:[#allocation26 + $0x58] sm:$0xff] }
 0xb0a   :  { %3972 = vmatprep.subr.bf16.mxu1 %v4611_v44  ;;  %3996 = vmatprep.subr.bf16.mxu0 %v4611_v44  ;;  %v4009_v18 = vpack.c.bf16 %v2510_v50, %v2509_v38 }
 0xb0d   :  { %3974 = vmatpush3.bf16.msra.mxu1 %v3973_v21  ;;  %3998 = vmatpush3.bf16.msra.mxu0 %v3997_v62 }
 0xb0e   :  { %3975 = vmatprep.subr.bf16.mxu1 %v4611_v44  ;;  %3999 = vmatprep.subr.bf16.mxu0 %v4611_v44 }
 0xb11   :  { %3977 = vmatpush3.bf16.msra.mxu1 %v3976_v27  ;;  %4001 = vmatpush3.bf16.msra.mxu0 %v4000_v7 }
 0xb12   :  { %3978 = vmatprep.subr.bf16.mxu1 %v4611_v44  ;;  %4002 = vmatprep.subr.bf16.mxu0 %v4611_v44 }
 0xb15   :  { %3980 = vmatpush3.bf16.msra.mxu1 %v3979_v31  ;;  %4004 = vmatpush3.bf16.msra.mxu0 %v4003_v36 }
 0xb16   :  { %3981 = vmatprep.subr.bf16.mxu1 %v4611_v44  ;;  %4005 = vmatprep.subr.bf16.mxu0 %v4611_v44 }
 0xb19   :  { %3983 = vmatpush3.bf16.msra.mxu1 %v3982_v39  ;;  %4007 = vmatpush3.bf16.msra.mxu0 %v4006_v5 }
 0xb1a   :  { %3984 = vmatprep.subr.bf16.mxu1 %v4611_v44  ;;  %4008 = vmatprep.subr.bf16.mxu0 %v4611_v44 }
 0xb1d   :  { %3986 = vmatpush3.bf16.msra.mxu1 %v3985_v48  ;;  %4010 = vmatpush3.bf16.msra.mxu0 %v4009_v18 }
 0xb1e   :  { %3987 = vmatprep.subr.bf16.mxu1 %v4611_v44  ;;  %4011 = vmatprep.subr.bf16.mxu0 %v4611_v44 }
 0xb21   :  { %3989 = vmatpush3.bf16.msra.mxu1 %v3988_v29 }
 0xb22   :  { %3990 = vmatprep.subr.bf16.mxu1 %v4611_v44 }
 0xb25   :  { %3992 = vmatpush3.bf16.msra.mxu1 %v3991_v56 }
 0xbda   :  { %v2312_v12 = vpop.f32.mrb[22].mxu1  ;;  %v2383_v0 = vpop.f32.mrb[38].mxu0 }
 0xbdb   :  { %v4031_v14 = vadd.f32 %v2312_v12, %v5106_v53  ;;  %v2314_v23 = vpop.f32.mrb[23].mxu1  ;;  %v3322_v24 = vpop.f32.mrb[39].mxu0  ;;  %v2397_v54 = vadd.f32 %v5112_v8, %v2383_v0  ;;  %v2512_v8 = vld [vmem:[#allocation26 + $0x68] sm:$0xff] }
 0xbdc   :  { %v4032_v32 = vadd.f32 %v2314_v23, %v5108_v57  ;;  %v4012_v21 = vpack.c.bf16 %v2512_v8, %v2511_v20 }
 0xbdd   :  { %v2388_v30 = vmul.f32 0.5, %v4031_v14 }
 0xbde   :  { %v2393_v35 = vmul.f32 0.5, %v4032_v32  ;;  %4013 = vmatpush3.bf16.msra.mxu0 %v4012_v21 }
 0xbdf   :  { %4164 = vtanh.f32 %v2388_v30  ;;  %4014 = vmatprep.subr.bf16.mxu0 %v4611_v44 }
 0xbe0   :  { %4166 = vtanh.f32 %v2393_v35 }
 0xbe9   :  { %v4165_v45 = vpop.eup %4164 }
 0xbea   :  { %v2390_v46 = vadd.f32 1.0, %v4165_v45  ;;  %v4167_v58 = vpop.eup %4166 }
 0xbeb   :  { %v2395_v1 = vadd.f32 1.0, %v4167_v58 }
 0xbec   :  { %v2391_v49 = vmul.f32 0.5, %v2390_v46 }
 0xbed   :  { %v2396_v53 = vmul.f32 0.5, %v2395_v1 }
 0xbee   :  { %v2398_v55 = vmul.f32 %v2397_v54, %v2391_v49 }
 0xbef   :  { %v2401_v6 = vsub.f32 1.0, %v2396_v53  ;;  %v2403_v57 = vmul.f32 %v2396_v53, %v5350_v15  ;;  %v2644_v15 = vld [vmem:[#allocation24] ss:$0 sm:$0xff] }
 0xbf0   :  { %v2399_v63 = vadd.f32 %v2398_v55, %v5102_v47  ;;  %v2513_v47 = vld [vmem:[#allocation26 + $0x70] sm:$0xff] }
 0xbf1   :  { %v4015_v25 = vpack.c.bf16 %v2514_v22, %v2513_v47 }
 0xbf2   :  { %4168 = vtanh.f32 %v2399_v63 }
 0xbf3   :  { %4016 = vmatpush3.bf16.msra.mxu0 %v4015_v25 }
 0xbfc   :  { %v4169_v9 = vpop.eup %4168 }
 0xbfd   :  { %v2402_v10 = vmul.f32 %v4169_v9, %v2401_v6 }
 0xbff   :  { %v2404_v19 = vadd.f32 %v2403_v57, %v2402_v10 }
 0xc01   :  { %3356 = vmatmul.mubr.f32.vlgmr.msra.gmra.mrb[24].mxu1 %v2404_v19  ;;  %2593 = vst [vmem:[#allocation30] sm:$0xff] %v2404_v19 }
 0xcd4   :  { %v2494_v27 = vpop.f32.mrb[24].mxu1 }
 0xcd5   :  { %v2495_v28 = vadd.f32 %v2644_v15, %v2494_v27  ;;  %v3357_v43 = vpop.f32.mrb[25].mxu1 }
 0xcd7   :  { %4170 = vtanh.f32 %v2495_v28 }
 0xce1   :  { %v4171_v31 = vpop.eup %4170 }
 0xce2   :  { %3391 = vmatmul.mubr.f32.vlgmr.msra.gmra.mrb[40].mxu0 %v4171_v31 }
 0xce3   :  { %4535 = shalt.err (!%p4532_p6)
}
 0xce4   :  { %s4536_s7 = scalar_lea.hbm %s5418_s17, 128 }
 0xce5   :  { %p4537_p7 = scmp.ne.s32.totalorder %s5418_s17, %s4536_s7  ;;  %p4540_p8 = scmp.lt.u32.totalorder %s4536_s7, %s5418_s17 }
 0xce7   :  { %p4542_p9 = pnand %p4540_p8, %p4537_p7 }
 0xce9   :  { %4545 = shalt.err (!%p4542_p9)
}
 0xcea   :  { %2613 = dma.vmem_to_hbm [thread:$0]  %s2611_s28, 128, %s5418_s17, [#allocation31]   ;;  %v2645_v44 = vld [vmem:[#allocation27] ss:$0 sm:$0xff] }
 0xceb   :  { %s4614_s30 = smov [#allocation29]  }
 0xcec   :  { %s2600_s19 = sshll.u32 %s4614_s30, 4  ;;  %s2601_s19 = int_to_ptr.vmem [resolvable:$true] %s2600_s19 }
 0xced   :  { %s4546_s8 = scalar_lea.vmem %s2601_s19, 128  ;;  %p4551_p11 = scmp.lt.s32.totalorder %s2601_s19, %s2601_s19 }
 0xcee   :  { %p4547_p10 = scmp.ne.s32.totalorder %s2601_s19, %s4546_s8  ;;  %p4552_p12 = scmp.lt.s32.totalorder %s4546_s8, %s4546_s8 }
 0xcf0   :  { %p4553_p13 = por %p4552_p12, %p4551_p11 }
 0xcf2   :  { %p4554_p0 = pnand %p4553_p13, %p4547_p10 }
 0xdb5   :  { %v2588_v34 = vpop.f32.mrb[40].mxu0 }
 0xdb6   :  { %v2589_v37 = vadd.f32 %v2645_v44, %v2588_v34  ;;  %v3392_v39 = vpop.f32.mrb[41].mxu0 }
 0xdb8   :  { %2592 = vst [vmem:[#allocation29] sm:$0xff] %v2589_v37 }
 0xdb9   :  { %4557 = shalt.err (!%p4554_p0)
}
 0xdba   :  { %s4558_s21 = scalar_lea.hbm %s5417_s16, 128 }
 0xdbb   :  { %p4559_p1 = scmp.ne.s32.totalorder %s5417_s16, %s4558_s21  ;;  %p4562_p2 = scmp.lt.u32.totalorder %s4558_s21, %s5417_s16 }
 0xdbd   :  { %p4564_p3 = pnand %p4562_p2, %p4559_p1 }
 0xdbf   :  { %4567 = shalt.err (!%p4564_p3)
}
 0xdc0   :  { %2603 = dma.vmem_to_hbm [thread:$0]  %s2601_s19, 128, %s5417_s16, [#allocation5]  }
 0xdc1   :  { %4586 = dma.done.wait [#allocation5], 128  }
 0xdc2   :  { %4587 = vsyncadd [#allocation5], 4294967168 }
 0xdc3   :  { %4588 = dma.done.wait [#allocation31], 128  }
 0xdc4   :  { %4589 = vsyncadd [#allocation31], 4294967168 }
 0xdc5   :  { %2620 = vsyncpa [#allocation4], 1 }
 0xdc6   :  { %2621 = vsyncpa [#allocation7], 1 }
 0xdc7   :  { %2622 = vsyncpa [#allocation10], 1 }
 0xdc8   :  { %2623 = vsyncpa [#allocation13], 1 }
 0xdc9   :  { %2624 = vsyncpa [#allocation16], 1 }
 0xdca   :  { %2625 = vsyncpa [#allocation19], 1 }
 0xdcb   :  { %2626 = vsyncpa [#allocation22], 1 }
 0xdcc   :  { %2627 = vsyncpa [#allocation25], 1 }
 0xdcd   :  { %2628 = vsyncpa [#allocation28], 1 }
 0xdce   :  { %2629 = vsyncpa [#allocation5], 1 }
 0xdcf   :  { %2630 = vsyncpa [#allocation31], 1 }

</bundles_post_ra>
